<compile_context>
chip_gen: v7x
topology: tpu7x:2x2x1
jax: 0.10.0
libtpu: 0.0.40
codegen_flags: <defaults>
</compile_context>

<pallas_src>
import jax
import jax.numpy as jnp
from jax.experimental import pallas as pl
from jax.experimental.pallas import tpu as pltpu

_PITCH = 104        # padded rows per image on the 10x10 full grid (multiple of 8)
_TB_MAX = 8         # images per grid step
_SHIFT_PAD = 40     # zero rows appended before shifted-slice convs (max shift = 33)


# ---------------------------------------------------------------------------
# Fused kernel: conv1+pool -> conv2 -> conv3 -> fc1 -> fc2 (all ReLU'd)
# ---------------------------------------------------------------------------
def _brain_kernel(patches_ref, sel_ref,
                  w1_ref, b1_ref, w2_ref, b2_ref, w3_ref, b3_ref,
                  w4_ref, b4_ref, w5_ref, b5_ref, o_ref):
    f32 = jnp.float32
    bf16 = jnp.bfloat16
    R = patches_ref.shape[1]          # tb * _PITCH (rows of the per-image full grid)
    tb = o_ref.shape[1]               # images in this tile

    # conv1 (8x8, s4) + ReLU + MaxPool2d(2):
    # pool(relu(conv)+b) == relu(max_q(patch_q @ w1) + b)  (bias-add / ReLU monotone).
    w1 = w1_ref[...]
    acc = jnp.dot(patches_ref[0], w1, preferred_element_type=f32)
    for q in (1, 2, 3):
        acc = jnp.maximum(acc, jnp.dot(patches_ref[q], w1, preferred_element_type=f32))
    y1 = jnp.maximum(acc + b1_ref[...], 0.0).astype(bf16)                  # [R, 32]

    # conv2 (4x4) + ReLU on the full 10x10 grid via shifted-row concatenation.
    y1p = jnp.concatenate([y1, jnp.zeros((_SHIFT_PAD, 32), bf16)], axis=0)
    p2 = jnp.concatenate([y1p[10 * i + j: 10 * i + j + R, :]
                          for i in range(4) for j in range(4)], axis=1)    # [R, 512]
    y2 = jnp.maximum(jnp.dot(p2, w2_ref[...], preferred_element_type=f32)
                     + b2_ref[...], 0.0).astype(bf16)                      # [R, 64]

    # conv3 (3x3) + ReLU, same trick.
    y2p = jnp.concatenate([y2, jnp.zeros((_SHIFT_PAD, 64), bf16)], axis=0)
    p3 = jnp.concatenate([y2p[10 * i + j: 10 * i + j + R, :]
                          for i in range(3) for j in range(3)], axis=1)    # [R, 576]
    y3 = jnp.maximum(jnp.dot(p3, w3_ref[...], preferred_element_type=f32)
                     + b3_ref[...], 0.0).astype(bf16)                      # [R, 64]

    # Gather the 25 valid 5x5 positions per image (rows ordered (s, b)) with a
    # 0/1 selection matmul, then lay them out lane-contiguously as [tb, 1600].
    g = jnp.dot(sel_ref[...], y3, preferred_element_type=f32).astype(bf16)  # [25*tb, 64]
    fcin = jnp.concatenate([g[s * tb:(s + 1) * tb, :] for s in range(25)],
                           axis=1)                                          # [tb, 1600]

    # fc1 + ReLU + fc2 + ReLU (final ReLU is in the torch forward).
    h = jnp.maximum(jnp.dot(fcin, w4_ref[...], preferred_element_type=f32)
                    + b4_ref[...], 0.0).astype(bf16)                        # [tb, 256]
    out = jnp.maximum(jnp.dot(h, w5_ref[...], preferred_element_type=f32)
                      + b5_ref[...], 0.0)                                   # [tb, 2]
    o_ref[0] = out.astype(o_ref.dtype)


# ---------------------------------------------------------------------------
# JAX-side helpers (cheap ops on the small raw input + tiny constants)
# ---------------------------------------------------------------------------
def _choose_tiling(batch):
    if batch <= 1:
        return 1, 1
    n_tiles = max(2, -(-batch // _TB_MAX))   # >= 2 programs -> both v7x TCs used
    tb = -(-batch // n_tiles)
    n_tiles = -(-batch // tb)
    return tb, n_tiles


def _conv1_quadrant_patches(x_nhwc):
    """NHWC [B,84,84,4] -> [4, B*_PITCH, 256] bf16 stride-8 quadrant patch matrices.

    Quadrant (dy,dx) row (b, ph, pw) holds the 8x8xC input window of conv1 output
    position (2*ph+dy, 2*pw+dx); feature order is (kh, kw, c)."""
    b = x_nhwc.shape[0]
    quads = []
    for dy in (0, 1):
        for dx in (0, 1):
            cols = []
            for i in range(8):
                for j in range(8):
                    cols.append(x_nhwc[:, 4 * dy + i: 4 * dy + i + 73: 8,
                                          4 * dx + j: 4 * dx + j + 73: 8, :])
            quads.append(jnp.stack(cols, axis=3).reshape(b, 100, 256))
    q = jnp.stack(quads, axis=0)                               # [4, B, 100, 256]
    q = jnp.pad(q, ((0, 0), (0, 0), (0, _PITCH - 100), (0, 0)))
    return q.reshape(4, b * _PITCH, 256).astype(jnp.bfloat16)


def _fc_gather_matrix(tb):
    """0/1 matrix [25*tb, tb*_PITCH]; row s*tb+b selects grid row b*_PITCH + 10*(s//5) + s%5."""
    k = jnp.arange(25 * tb)
    s, b = k // tb, k % tb
    src = b * _PITCH + (s // 5) * 10 + (s % 5)
    r = jnp.arange(tb * _PITCH)
    return (src[:, None] == r[None, :]).astype(jnp.bfloat16)


def _const_spec(arr):
    nd = arr.ndim

    def idx(i):
        return (0,) * nd

    return pl.BlockSpec(arr.shape, idx)


# ---------------------------------------------------------------------------
# Parameters (distribution matches init_weights; pre-reshaped for the kernel)
# ---------------------------------------------------------------------------
def _conv_w_to_2d(w):
    # torch [OC, C, KH, KW] -> [KH*KW*C, OC], rows ordered (kh, kw, c).
    oc, c, kh, kw = w.shape
    return jnp.transpose(w, (2, 3, 1, 0)).reshape(kh * kw * c, oc)


def init_params(seed=0):
    keys = jax.random.split(jax.random.PRNGKey(seed), 5)
    u = lambda key, shape: jax.random.uniform(key, shape, jnp.float32, -0.01, 0.01)
    w1 = u(keys[0], (32, 4, 8, 8))
    w2 = u(keys[1], (64, 32, 4, 4))
    w3 = u(keys[2], (64, 64, 3, 3))
    w4 = u(keys[3], (256, 1600))
    w5 = u(keys[4], (2, 256))
    # Permute w4's input columns from torch's NCHW flatten (c,h,w) to NHWC (h,w,c).
    w4_nhwc = jnp.transpose(w4.reshape(256, 64, 5, 5), (0, 2, 3, 1)).reshape(256, 1600)
    bias = lambda n: jnp.full((1, n), 0.01, jnp.float32)   # m.bias.data.fill_(0.01)
    bf = lambda a: a.astype(jnp.bfloat16)
    return {
        "w1": bf(_conv_w_to_2d(w1)), "b1": bias(32),
        "w2": bf(_conv_w_to_2d(w2)), "b2": bias(64),
        "w3": bf(_conv_w_to_2d(w3)), "b3": bias(64),
        "w4": bf(w4_nhwc.T),         "b4": bias(256),
        "w5": bf(w5.T),              "b5": bias(2),
    }


# ---------------------------------------------------------------------------
# Forward
# ---------------------------------------------------------------------------
def brain_forward(params, x):
    # TODO(synk): Adam optimizer / MSELoss from Brain.__init__ are training-only and
    # not part of the forward pass; they are not implemented here.
    batch = x.shape[0]
    tb, n_tiles = _choose_tiling(batch)
    bp = tb * n_tiles
    if bp != batch:
        x = jnp.concatenate([x, jnp.zeros((bp - batch,) + x.shape[1:], x.dtype)], axis=0)
    x = jnp.transpose(x, (0, 2, 3, 1))                     # NCHW -> NHWC, once
    patches = _conv1_quadrant_patches(x)                   # [4, bp*104, 256] bf16
    sel = _fc_gather_matrix(tb)                            # [25*tb, tb*104] bf16

    rows = tb * _PITCH
    p = params
    out = pl.pallas_call(
        _brain_kernel,
        out_shape=jax.ShapeDtypeStruct((n_tiles, tb, 2), jnp.float32),
        grid=(n_tiles,),
        in_specs=[
            pl.BlockSpec((4, rows, 256), lambda i: (0, i, 0)),
            _const_spec(sel),
            _const_spec(p["w1"]), _const_spec(p["b1"]),
            _const_spec(p["w2"]), _const_spec(p["b2"]),
            _const_spec(p["w3"]), _const_spec(p["b3"]),
            _const_spec(p["w4"]), _const_spec(p["b4"]),
            _const_spec(p["w5"]), _const_spec(p["b5"]),
        ],
        out_specs=pl.BlockSpec((1, tb, 2), lambda i: (i, 0, 0)),
        compiler_params=pltpu.CompilerParams(dimension_semantics=("parallel",)),
    )(patches, sel, p["w1"], p["b1"], p["w2"], p["b2"],
      p["w3"], p["b3"], p["w4"], p["b4"], p["w5"], p["b5"])
    return out.reshape(bp, 2)[:batch]


# ---------------------------------------------------------------------------
# Plain-JAX f32 reference (same pre-reshaped weights) for self-validation
# ---------------------------------------------------------------------------
def _im2col_ref(x, kh, kw, stride, off_h=0, off_w=0):
    b, h, w, c = x.shape
    oh = (h - off_h - kh) // stride + 1
    ow = (w - off_w - kw) // stride + 1
    cols = [x[:, off_h + i: off_h + i + stride * (oh - 1) + 1: stride,
               off_w + j: off_w + j + stride * (ow - 1) + 1: stride, :]
            for i in range(kh) for j in range(kw)]
    return jnp.stack(cols, axis=3).reshape(b * oh * ow, kh * kw * c), oh, ow


def brain_reference(params, x):
    b = x.shape[0]
    f = lambda a: a.astype(jnp.float32)
    xh = jnp.transpose(x, (0, 2, 3, 1))
    quads = [_im2col_ref(xh, 8, 8, 8, 4 * dy, 4 * dx)[0]
             for dy in (0, 1) for dx in (0, 1)]
    pre = jnp.max(jnp.stack([q @ f(params["w1"]) for q in quads]), axis=0)
    y = jnp.maximum(pre + params["b1"], 0.0).reshape(b, 10, 10, 32)
    for w_key, b_key, k in (("w2", "b2", 4), ("w3", "b3", 3)):
        bh, hh, ww, cc = y.shape
        oh = hh - k + 1
        cols = [y[:, i:i + oh, j:j + oh, :] for i in range(k) for j in range(k)]
        pat = jnp.concatenate(cols, axis=-1).reshape(bh * oh * oh, k * k * cc)
        y = jnp.maximum(pat @ f(params[w_key]) + params[b_key], 0.0)
        y = y.reshape(bh, oh, oh, params[w_key].shape[1])
    y = y.reshape(b, 1600)
    y = jnp.maximum(y @ f(params["w4"]) + params["b4"], 0.0)
    return jnp.maximum(y @ f(params["w5"]) + params["b5"], 0.0)


if __name__ == "__main__":
    params = init_params(0)
    # Input shape implied by the module: 4 stacked 84x84 frames (1600 = 64*5*5).
    x = jax.random.uniform(jax.random.PRNGKey(0), (2, 4, 84, 84), jnp.float32)
    out = jax.block_until_ready(jax.jit(brain_forward)(params, x))
    assert out.shape == (2, 2) and out.dtype == jnp.float32
    ref = jax.block_until_ready(jax.jit(brain_reference)(params, x))
    assert jnp.allclose(out, ref, rtol=1e-1, atol=1e-3), (out, ref)
    print("KERNEL_OK")
</pallas_src>

<mosaic_0001>
module attributes {stable_mosaic.version = 11 : i64} {
  func.func @_brain_kernel(%arg0: i32, %arg1: memref<4x104x256xbf16, #tpu.memory_space<vmem>>, %arg2: memref<25x104xbf16, #tpu.memory_space<vmem>>, %arg3: memref<256x32xbf16, #tpu.memory_space<vmem>>, %arg4: memref<1x32xf32, #tpu.memory_space<vmem>>, %arg5: memref<512x64xbf16, #tpu.memory_space<vmem>>, %arg6: memref<1x64xf32, #tpu.memory_space<vmem>>, %arg7: memref<576x64xbf16, #tpu.memory_space<vmem>>, %arg8: memref<1x64xf32, #tpu.memory_space<vmem>>, %arg9: memref<1600x256xbf16, #tpu.memory_space<vmem>>, %arg10: memref<1x256xf32, #tpu.memory_space<vmem>>, %arg11: memref<256x2xbf16, #tpu.memory_space<vmem>>, %arg12: memref<1x2xf32, #tpu.memory_space<vmem>>, %arg13: memref<1x1x2xf32, #tpu.memory_space<vmem>>) attributes {dimension_semantics = [#tpu.dimension_semantics<parallel>], iteration_bounds = array<i64: 2>, scalar_prefetch = 0 : i64, scratch_operands = 0 : i64, tpu.core_type = #tpu.core_type<tc>, window_params = [{transform_indices = @transform_0, window_bounds = array<i64: 4, 104, 256>}, {pipeline_mode = #tpu.pipeline_mode<synchronous>, transform_indices = @transform_1, window_bounds = array<i64: 25, 104>}, {pipeline_mode = #tpu.pipeline_mode<synchronous>, transform_indices = @transform_2, window_bounds = array<i64: 256, 32>}, {pipeline_mode = #tpu.pipeline_mode<synchronous>, transform_indices = @transform_3, window_bounds = array<i64: 1, 32>}, {pipeline_mode = #tpu.pipeline_mode<synchronous>, transform_indices = @transform_4, window_bounds = array<i64: 512, 64>}, {pipeline_mode = #tpu.pipeline_mode<synchronous>, transform_indices = @transform_5, window_bounds = array<i64: 1, 64>}, {pipeline_mode = #tpu.pipeline_mode<synchronous>, transform_indices = @transform_6, window_bounds = array<i64: 576, 64>}, {pipeline_mode = #tpu.pipeline_mode<synchronous>, transform_indices = @transform_7, window_bounds = array<i64: 1, 64>}, {pipeline_mode = #tpu.pipeline_mode<synchronous>, transform_indices = @transform_8, window_bounds = array<i64: 1600, 256>}, {pipeline_mode = #tpu.pipeline_mode<synchronous>, transform_indices = @transform_9, window_bounds = array<i64: 1, 256>}, {pipeline_mode = #tpu.pipeline_mode<synchronous>, transform_indices = @transform_10, window_bounds = array<i64: 256, 2>}, {pipeline_mode = #tpu.pipeline_mode<synchronous>, transform_indices = @transform_11, window_bounds = array<i64: 1, 2>}, {transform_indices = @transform_12, window_bounds = array<i64: 1, 1, 2>}]} {
    %c0 = arith.constant 0 : index
    %c0_0 = arith.constant 0 : index
    %0 = vector.load %arg3[%c0, %c0_0] : memref<256x32xbf16, #tpu.memory_space<vmem>>, vector<256x32xbf16>
    %c0_1 = arith.constant 0 : index
    %c0_2 = arith.constant 0 : index
    %c0_3 = arith.constant 0 : index
    %1 = vector.load %arg1[%c0_1, %c0_2, %c0_3] : memref<4x104x256xbf16, #tpu.memory_space<vmem>>, vector<1x104x256xbf16>
    %2 = vector.shape_cast %1 : vector<1x104x256xbf16> to vector<104x256xbf16>
    %cst = arith.constant dense<0.000000e+00> : vector<104x32xf32>
    %3 = tpu.matmul %2, %0, %cst {dimension_numbers = #tpu.dot_dimension_numbers<[1], [0], [0], [1], [0, 0, 1, 1], [], []>} : vector<104x256xbf16>, vector<256x32xbf16>, vector<104x32xf32> -> vector<104x32xf32>
    %c1 = arith.constant 1 : index
    %c0_4 = arith.constant 0 : index
    %c0_5 = arith.constant 0 : index
    %4 = vector.load %arg1[%c1, %c0_4, %c0_5] : memref<4x104x256xbf16, #tpu.memory_space<vmem>>, vector<1x104x256xbf16>
    %5 = vector.shape_cast %4 : vector<1x104x256xbf16> to vector<104x256xbf16>
    %cst_6 = arith.constant dense<0.000000e+00> : vector<104x32xf32>
    %6 = tpu.matmul %5, %0, %cst_6 {dimension_numbers = #tpu.dot_dimension_numbers<[1], [0], [0], [1], [0, 0, 1, 1], [], []>} : vector<104x256xbf16>, vector<256x32xbf16>, vector<104x32xf32> -> vector<104x32xf32>
    %7 = arith.maximumf %3, %6 : vector<104x32xf32>
    %c2 = arith.constant 2 : index
    %c0_7 = arith.constant 0 : index
    %c0_8 = arith.constant 0 : index
    %8 = vector.load %arg1[%c2, %c0_7, %c0_8] : memref<4x104x256xbf16, #tpu.memory_space<vmem>>, vector<1x104x256xbf16>
    %9 = vector.shape_cast %8 : vector<1x104x256xbf16> to vector<104x256xbf16>
    %cst_9 = arith.constant dense<0.000000e+00> : vector<104x32xf32>
    %10 = tpu.matmul %9, %0, %cst_9 {dimension_numbers = #tpu.dot_dimension_numbers<[1], [0], [0], [1], [0, 0, 1, 1], [], []>} : vector<104x256xbf16>, vector<256x32xbf16>, vector<104x32xf32> -> vector<104x32xf32>
    %11 = arith.maximumf %7, %10 : vector<104x32xf32>
    %c3 = arith.constant 3 : index
    %c0_10 = arith.constant 0 : index
    %c0_11 = arith.constant 0 : index
    %12 = vector.load %arg1[%c3, %c0_10, %c0_11] : memref<4x104x256xbf16, #tpu.memory_space<vmem>>, vector<1x104x256xbf16>
    %13 = vector.shape_cast %12 : vector<1x104x256xbf16> to vector<104x256xbf16>
    %cst_12 = arith.constant dense<0.000000e+00> : vector<104x32xf32>
    %14 = tpu.matmul %13, %0, %cst_12 {dimension_numbers = #tpu.dot_dimension_numbers<[1], [0], [0], [1], [0, 0, 1, 1], [], []>} : vector<104x256xbf16>, vector<256x32xbf16>, vector<104x32xf32> -> vector<104x32xf32>
    %15 = arith.maximumf %11, %14 : vector<104x32xf32>
    %c0_13 = arith.constant 0 : index
    %c0_14 = arith.constant 0 : index
    %16 = vector.load %arg4[%c0_13, %c0_14] : memref<1x32xf32, #tpu.memory_space<vmem>>, vector<1x32xf32>
    %17 = vector.broadcast %16 : vector<1x32xf32> to vector<104x32xf32>
    %18 = arith.addf %15, %17 : vector<104x32xf32>
    %cst_15 = arith.constant 0.000000e+00 : f32
    %19 = vector.broadcast %cst_15 : f32 to vector<104x32xf32>
    %20 = arith.maximumf %18, %19 : vector<104x32xf32>
    %21 = arith.truncf %20 : vector<104x32xf32> to vector<104x32xbf16>
    %cst_16 = arith.constant 0.000000e+00 : bf16
    %22 = vector.broadcast %cst_16 : bf16 to vector<40x32xbf16>
    %23 = tpu.concatenate %21, %22 in 0 : vector<104x32xbf16>, vector<40x32xbf16> -> vector<144x32xbf16>
    %24 = vector.extract_strided_slice %23 {offsets = [0, 0], sizes = [104, 32], strides = [1, 1]} : vector<144x32xbf16> to vector<104x32xbf16>
    %25 = vector.extract_strided_slice %23 {offsets = [1, 0], sizes = [104, 32], strides = [1, 1]} : vector<144x32xbf16> to vector<104x32xbf16>
    %26 = vector.extract_strided_slice %23 {offsets = [2, 0], sizes = [104, 32], strides = [1, 1]} : vector<144x32xbf16> to vector<104x32xbf16>
    %27 = vector.extract_strided_slice %23 {offsets = [3, 0], sizes = [104, 32], strides = [1, 1]} : vector<144x32xbf16> to vector<104x32xbf16>
    %28 = vector.extract_strided_slice %23 {offsets = [10, 0], sizes = [104, 32], strides = [1, 1]} : vector<144x32xbf16> to vector<104x32xbf16>
    %29 = vector.extract_strided_slice %23 {offsets = [11, 0], sizes = [104, 32], strides = [1, 1]} : vector<144x32xbf16> to vector<104x32xbf16>
    %30 = vector.extract_strided_slice %23 {offsets = [12, 0], sizes = [104, 32], strides = [1, 1]} : vector<144x32xbf16> to vector<104x32xbf16>
    %31 = vector.extract_strided_slice %23 {offsets = [13, 0], sizes = [104, 32], strides = [1, 1]} : vector<144x32xbf16> to vector<104x32xbf16>
    %32 = vector.extract_strided_slice %23 {offsets = [20, 0], sizes = [104, 32], strides = [1, 1]} : vector<144x32xbf16> to vector<104x32xbf16>
    %33 = vector.extract_strided_slice %23 {offsets = [21, 0], sizes = [104, 32], strides = [1, 1]} : vector<144x32xbf16> to vector<104x32xbf16>
    %34 = vector.extract_strided_slice %23 {offsets = [22, 0], sizes = [104, 32], strides = [1, 1]} : vector<144x32xbf16> to vector<104x32xbf16>
    %35 = vector.extract_strided_slice %23 {offsets = [23, 0], sizes = [104, 32], strides = [1, 1]} : vector<144x32xbf16> to vector<104x32xbf16>
    %36 = vector.extract_strided_slice %23 {offsets = [30, 0], sizes = [104, 32], strides = [1, 1]} : vector<144x32xbf16> to vector<104x32xbf16>
    %37 = vector.extract_strided_slice %23 {offsets = [31, 0], sizes = [104, 32], strides = [1, 1]} : vector<144x32xbf16> to vector<104x32xbf16>
    %38 = vector.extract_strided_slice %23 {offsets = [32, 0], sizes = [104, 32], strides = [1, 1]} : vector<144x32xbf16> to vector<104x32xbf16>
    %39 = vector.extract_strided_slice %23 {offsets = [33, 0], sizes = [104, 32], strides = [1, 1]} : vector<144x32xbf16> to vector<104x32xbf16>
    %40 = tpu.concatenate %24, %25, %26, %27, %28, %29, %30, %31, %32, %33, %34, %35, %36, %37, %38, %39 in 1 : vector<104x32xbf16>, vector<104x32xbf16>, vector<104x32xbf16>, vector<104x32xbf16>, vector<104x32xbf16>, vector<104x32xbf16>, vector<104x32xbf16>, vector<104x32xbf16>, vector<104x32xbf16>, vector<104x32xbf16>, vector<104x32xbf16>, vector<104x32xbf16>, vector<104x32xbf16>, vector<104x32xbf16>, vector<104x32xbf16>, vector<104x32xbf16> -> vector<104x512xbf16>
    %c0_17 = arith.constant 0 : index
    %c0_18 = arith.constant 0 : index
    %41 = vector.load %arg5[%c0_17, %c0_18] : memref<512x64xbf16, #tpu.memory_space<vmem>>, vector<512x64xbf16>
    %cst_19 = arith.constant dense<0.000000e+00> : vector<104x64xf32>
    %42 = tpu.matmul %40, %41, %cst_19 {dimension_numbers = #tpu.dot_dimension_numbers<[1], [0], [0], [1], [0, 0, 1, 1], [], []>} : vector<104x512xbf16>, vector<512x64xbf16>, vector<104x64xf32> -> vector<104x64xf32>
    %c0_20 = arith.constant 0 : index
    %c0_21 = arith.constant 0 : index
    %43 = vector.load %arg6[%c0_20, %c0_21] : memref<1x64xf32, #tpu.memory_space<vmem>>, vector<1x64xf32>
    %44 = vector.broadcast %43 : vector<1x64xf32> to vector<104x64xf32>
    %45 = arith.addf %42, %44 : vector<104x64xf32>
    %cst_22 = arith.constant 0.000000e+00 : f32
    %46 = vector.broadcast %cst_22 : f32 to vector<104x64xf32>
    %47 = arith.maximumf %45, %46 : vector<104x64xf32>
    %48 = arith.truncf %47 : vector<104x64xf32> to vector<104x64xbf16>
    %cst_23 = arith.constant 0.000000e+00 : bf16
    %49 = vector.broadcast %cst_23 : bf16 to vector<40x64xbf16>
    %50 = tpu.concatenate %48, %49 in 0 : vector<104x64xbf16>, vector<40x64xbf16> -> vector<144x64xbf16>
    %51 = vector.extract_strided_slice %50 {offsets = [0, 0], sizes = [104, 64], strides = [1, 1]} : vector<144x64xbf16> to vector<104x64xbf16>
    %52 = vector.extract_strided_slice %50 {offsets = [1, 0], sizes = [104, 64], strides = [1, 1]} : vector<144x64xbf16> to vector<104x64xbf16>
    %53 = vector.extract_strided_slice %50 {offsets = [2, 0], sizes = [104, 64], strides = [1, 1]} : vector<144x64xbf16> to vector<104x64xbf16>
    %54 = vector.extract_strided_slice %50 {offsets = [10, 0], sizes = [104, 64], strides = [1, 1]} : vector<144x64xbf16> to vector<104x64xbf16>
    %55 = vector.extract_strided_slice %50 {offsets = [11, 0], sizes = [104, 64], strides = [1, 1]} : vector<144x64xbf16> to vector<104x64xbf16>
    %56 = vector.extract_strided_slice %50 {offsets = [12, 0], sizes = [104, 64], strides = [1, 1]} : vector<144x64xbf16> to vector<104x64xbf16>
    %57 = vector.extract_strided_slice %50 {offsets = [20, 0], sizes = [104, 64], strides = [1, 1]} : vector<144x64xbf16> to vector<104x64xbf16>
    %58 = vector.extract_strided_slice %50 {offsets = [21, 0], sizes = [104, 64], strides = [1, 1]} : vector<144x64xbf16> to vector<104x64xbf16>
    %59 = vector.extract_strided_slice %50 {offsets = [22, 0], sizes = [104, 64], strides = [1, 1]} : vector<144x64xbf16> to vector<104x64xbf16>
    %60 = tpu.concatenate %51, %52, %53, %54, %55, %56, %57, %58, %59 in 1 : vector<104x64xbf16>, vector<104x64xbf16>, vector<104x64xbf16>, vector<104x64xbf16>, vector<104x64xbf16>, vector<104x64xbf16>, vector<104x64xbf16>, vector<104x64xbf16>, vector<104x64xbf16> -> vector<104x576xbf16>
    %c0_24 = arith.constant 0 : index
    %c0_25 = arith.constant 0 : index
    %61 = vector.load %arg7[%c0_24, %c0_25] : memref<576x64xbf16, #tpu.memory_space<vmem>>, vector<576x64xbf16>
    %cst_26 = arith.constant dense<0.000000e+00> : vector<104x64xf32>
    %62 = tpu.matmul %60, %61, %cst_26 {dimension_numbers = #tpu.dot_dimension_numbers<[1], [0], [0], [1], [0, 0, 1, 1], [], []>} : vector<104x576xbf16>, vector<576x64xbf16>, vector<104x64xf32> -> vector<104x64xf32>
    %c0_27 = arith.constant 0 : index
    %c0_28 = arith.constant 0 : index
    %63 = vector.load %arg8[%c0_27, %c0_28] : memref<1x64xf32, #tpu.memory_space<vmem>>, vector<1x64xf32>
    %64 = vector.broadcast %63 : vector<1x64xf32> to vector<104x64xf32>
    %65 = arith.addf %62, %64 : vector<104x64xf32>
    %cst_29 = arith.constant 0.000000e+00 : f32
    %66 = vector.broadcast %cst_29 : f32 to vector<104x64xf32>
    %67 = arith.maximumf %65, %66 : vector<104x64xf32>
    %68 = arith.truncf %67 : vector<104x64xf32> to vector<104x64xbf16>
    %c0_30 = arith.constant 0 : index
    %c0_31 = arith.constant 0 : index
    %69 = vector.load %arg2[%c0_30, %c0_31] : memref<25x104xbf16, #tpu.memory_space<vmem>>, vector<25x104xbf16>
    %cst_32 = arith.constant dense<0.000000e+00> : vector<25x64xf32>
    %70 = tpu.matmul %69, %68, %cst_32 {dimension_numbers = #tpu.dot_dimension_numbers<[1], [0], [0], [1], [0, 0, 1, 1], [], []>} : vector<25x104xbf16>, vector<104x64xbf16>, vector<25x64xf32> -> vector<25x64xf32>
    %71 = arith.truncf %70 : vector<25x64xf32> to vector<25x64xbf16>
    %72 = vector.extract_strided_slice %71 {offsets = [0, 0], sizes = [1, 64], strides = [1, 1]} : vector<25x64xbf16> to vector<1x64xbf16>
    %73 = vector.extract_strided_slice %71 {offsets = [1, 0], sizes = [1, 64], strides = [1, 1]} : vector<25x64xbf16> to vector<1x64xbf16>
    %74 = vector.extract_strided_slice %71 {offsets = [2, 0], sizes = [1, 64], strides = [1, 1]} : vector<25x64xbf16> to vector<1x64xbf16>
    %75 = vector.extract_strided_slice %71 {offsets = [3, 0], sizes = [1, 64], strides = [1, 1]} : vector<25x64xbf16> to vector<1x64xbf16>
    %76 = vector.extract_strided_slice %71 {offsets = [4, 0], sizes = [1, 64], strides = [1, 1]} : vector<25x64xbf16> to vector<1x64xbf16>
    %77 = vector.extract_strided_slice %71 {offsets = [5, 0], sizes = [1, 64], strides = [1, 1]} : vector<25x64xbf16> to vector<1x64xbf16>
    %78 = vector.extract_strided_slice %71 {offsets = [6, 0], sizes = [1, 64], strides = [1, 1]} : vector<25x64xbf16> to vector<1x64xbf16>
    %79 = vector.extract_strided_slice %71 {offsets = [7, 0], sizes = [1, 64], strides = [1, 1]} : vector<25x64xbf16> to vector<1x64xbf16>
    %80 = vector.extract_strided_slice %71 {offsets = [8, 0], sizes = [1, 64], strides = [1, 1]} : vector<25x64xbf16> to vector<1x64xbf16>
    %81 = vector.extract_strided_slice %71 {offsets = [9, 0], sizes = [1, 64], strides = [1, 1]} : vector<25x64xbf16> to vector<1x64xbf16>
    %82 = vector.extract_strided_slice %71 {offsets = [10, 0], sizes = [1, 64], strides = [1, 1]} : vector<25x64xbf16> to vector<1x64xbf16>
    %83 = vector.extract_strided_slice %71 {offsets = [11, 0], sizes = [1, 64], strides = [1, 1]} : vector<25x64xbf16> to vector<1x64xbf16>
    %84 = vector.extract_strided_slice %71 {offsets = [12, 0], sizes = [1, 64], strides = [1, 1]} : vector<25x64xbf16> to vector<1x64xbf16>
    %85 = vector.extract_strided_slice %71 {offsets = [13, 0], sizes = [1, 64], strides = [1, 1]} : vector<25x64xbf16> to vector<1x64xbf16>
    %86 = vector.extract_strided_slice %71 {offsets = [14, 0], sizes = [1, 64], strides = [1, 1]} : vector<25x64xbf16> to vector<1x64xbf16>
    %87 = vector.extract_strided_slice %71 {offsets = [15, 0], sizes = [1, 64], strides = [1, 1]} : vector<25x64xbf16> to vector<1x64xbf16>
    %88 = vector.extract_strided_slice %71 {offsets = [16, 0], sizes = [1, 64], strides = [1, 1]} : vector<25x64xbf16> to vector<1x64xbf16>
    %89 = vector.extract_strided_slice %71 {offsets = [17, 0], sizes = [1, 64], strides = [1, 1]} : vector<25x64xbf16> to vector<1x64xbf16>
    %90 = vector.extract_strided_slice %71 {offsets = [18, 0], sizes = [1, 64], strides = [1, 1]} : vector<25x64xbf16> to vector<1x64xbf16>
    %91 = vector.extract_strided_slice %71 {offsets = [19, 0], sizes = [1, 64], strides = [1, 1]} : vector<25x64xbf16> to vector<1x64xbf16>
    %92 = vector.extract_strided_slice %71 {offsets = [20, 0], sizes = [1, 64], strides = [1, 1]} : vector<25x64xbf16> to vector<1x64xbf16>
    %93 = vector.extract_strided_slice %71 {offsets = [21, 0], sizes = [1, 64], strides = [1, 1]} : vector<25x64xbf16> to vector<1x64xbf16>
    %94 = vector.extract_strided_slice %71 {offsets = [22, 0], sizes = [1, 64], strides = [1, 1]} : vector<25x64xbf16> to vector<1x64xbf16>
    %95 = vector.extract_strided_slice %71 {offsets = [23, 0], sizes = [1, 64], strides = [1, 1]} : vector<25x64xbf16> to vector<1x64xbf16>
    %96 = vector.extract_strided_slice %71 {offsets = [24, 0], sizes = [1, 64], strides = [1, 1]} : vector<25x64xbf16> to vector<1x64xbf16>
    %97 = tpu.concatenate %72, %73, %74, %75, %76, %77, %78, %79, %80, %81, %82, %83, %84, %85, %86, %87 in 1 : vector<1x64xbf16>, vector<1x64xbf16>, vector<1x64xbf16>, vector<1x64xbf16>, vector<1x64xbf16>, vector<1x64xbf16>, vector<1x64xbf16>, vector<1x64xbf16>, vector<1x64xbf16>, vector<1x64xbf16>, vector<1x64xbf16>, vector<1x64xbf16>, vector<1x64xbf16>, vector<1x64xbf16>, vector<1x64xbf16>, vector<1x64xbf16> -> vector<1x1024xbf16>
    %98 = tpu.concatenate %88, %89, %90, %91, %92, %93, %94, %95, %96 in 1 : vector<1x64xbf16>, vector<1x64xbf16>, vector<1x64xbf16>, vector<1x64xbf16>, vector<1x64xbf16>, vector<1x64xbf16>, vector<1x64xbf16>, vector<1x64xbf16>, vector<1x64xbf16> -> vector<1x576xbf16>
    %99 = tpu.concatenate %97, %98 in 1 : vector<1x1024xbf16>, vector<1x576xbf16> -> vector<1x1600xbf16>
    %c0_33 = arith.constant 0 : index
    %c0_34 = arith.constant 0 : index
    %100 = vector.load %arg9[%c0_33, %c0_34] : memref<1600x256xbf16, #tpu.memory_space<vmem>>, vector<1600x256xbf16>
    %cst_35 = arith.constant dense<0.000000e+00> : vector<1x256xf32>
    %101 = tpu.matmul %99, %100, %cst_35 {dimension_numbers = #tpu.dot_dimension_numbers<[1], [0], [0], [1], [0, 0, 1, 1], [], []>} : vector<1x1600xbf16>, vector<1600x256xbf16>, vector<1x256xf32> -> vector<1x256xf32>
    %c0_36 = arith.constant 0 : index
    %c0_37 = arith.constant 0 : index
    %102 = vector.load %arg10[%c0_36, %c0_37] : memref<1x256xf32, #tpu.memory_space<vmem>>, vector<1x256xf32>
    %103 = arith.addf %101, %102 : vector<1x256xf32>
    %cst_38 = arith.constant 0.000000e+00 : f32
    %104 = vector.broadcast %cst_38 : f32 to vector<1x256xf32>
    %105 = arith.maximumf %103, %104 : vector<1x256xf32>
    %106 = arith.truncf %105 : vector<1x256xf32> to vector<1x256xbf16>
    %c0_39 = arith.constant 0 : index
    %c0_40 = arith.constant 0 : index
    %107 = vector.load %arg11[%c0_39, %c0_40] : memref<256x2xbf16, #tpu.memory_space<vmem>>, vector<256x2xbf16>
    %cst_41 = arith.constant dense<0.000000e+00> : vector<1x2xf32>
    %108 = tpu.matmul %106, %107, %cst_41 {dimension_numbers = #tpu.dot_dimension_numbers<[1], [0], [0], [1], [0, 0, 1, 1], [], []>} : vector<1x256xbf16>, vector<256x2xbf16>, vector<1x2xf32> -> vector<1x2xf32>
    %c0_42 = arith.constant 0 : index
    %c0_43 = arith.constant 0 : index
    %109 = vector.load %arg12[%c0_42, %c0_43] : memref<1x2xf32, #tpu.memory_space<vmem>>, vector<1x2xf32>
    %110 = arith.addf %108, %109 : vector<1x2xf32>
    %cst_44 = arith.constant 0.000000e+00 : f32
    %111 = vector.broadcast %cst_44 : f32 to vector<1x2xf32>
    %112 = arith.maximumf %110, %111 : vector<1x2xf32>
    %c0_45 = arith.constant 0 : index
    %c0_46 = arith.constant 0 : index
    %c0_47 = arith.constant 0 : index
    %113 = vector.load %arg13[%c0_45, %c0_46, %c0_47] : memref<1x1x2xf32, #tpu.memory_space<vmem>>, vector<1x1x2xf32>
    %114 = vector.shape_cast %113 : vector<1x1x2xf32> to vector<1x2xf32>
    %115 = vector.shape_cast %112 : vector<1x2xf32> to vector<1x1x2xf32>
    tpu.vector_store %arg13[%c0_45, %c0_46, %c0_47], %115 {strides = array<i32>} : memref<1x1x2xf32, #tpu.memory_space<vmem>>, vector<1x1x2xf32>,
    return
  }
  func.func @transform_0(%arg0: i32) -> (i32, i32, i32) {
    %c0_i32 = arith.constant 0 : i32
    %c0_i32_0 = arith.constant 0 : i32
    %c0_i32_1 = arith.constant 0 : i32
    return %c0_i32, %arg0, %c0_i32_0 : i32, i32, i32
  }
  func.func @transform_1(%arg0: i32) -> (i32, i32) {
    %c0_i32 = arith.constant 0 : i32
    %c0_i32_0 = arith.constant 0 : i32
    %c0_i32_1 = arith.constant 0 : i32
    return %c0_i32, %c0_i32_0 : i32, i32
  }
  func.func @transform_2(%arg0: i32) -> (i32, i32) {
    %c0_i32 = arith.constant 0 : i32
    %c0_i32_0 = arith.constant 0 : i32
    %c0_i32_1 = arith.constant 0 : i32
    return %c0_i32, %c0_i32_0 : i32, i32
  }
  func.func @transform_3(%arg0: i32) -> (i32, i32) {
    %c0_i32 = arith.constant 0 : i32
    %c0_i32_0 = arith.constant 0 : i32
    %c0_i32_1 = arith.constant 0 : i32
    return %c0_i32, %c0_i32_0 : i32, i32
  }
  func.func @transform_4(%arg0: i32) -> (i32, i32) {
    %c0_i32 = arith.constant 0 : i32
    %c0_i32_0 = arith.constant 0 : i32
    %c0_i32_1 = arith.constant 0 : i32
    return %c0_i32, %c0_i32_0 : i32, i32
  }
  func.func @transform_5(%arg0: i32) -> (i32, i32) {
    %c0_i32 = arith.constant 0 : i32
    %c0_i32_0 = arith.constant 0 : i32
    %c0_i32_1 = arith.constant 0 : i32
    return %c0_i32, %c0_i32_0 : i32, i32
  }
  func.func @transform_6(%arg0: i32) -> (i32, i32) {
    %c0_i32 = arith.constant 0 : i32
    %c0_i32_0 = arith.constant 0 : i32
    %c0_i32_1 = arith.constant 0 : i32
    return %c0_i32, %c0_i32_0 : i32, i32
  }
  func.func @transform_7(%arg0: i32) -> (i32, i32) {
    %c0_i32 = arith.constant 0 : i32
    %c0_i32_0 = arith.constant 0 : i32
    %c0_i32_1 = arith.constant 0 : i32
    return %c0_i32, %c0_i32_0 : i32, i32
  }
  func.func @transform_8(%arg0: i32) -> (i32, i32) {
    %c0_i32 = arith.constant 0 : i32
    %c0_i32_0 = arith.constant 0 : i32
    %c0_i32_1 = arith.constant 0 : i32
    return %c0_i32, %c0_i32_0 : i32, i32
  }
  func.func @transform_9(%arg0: i32) -> (i32, i32) {
    %c0_i32 = arith.constant 0 : i32
    %c0_i32_0 = arith.constant 0 : i32
    %c0_i32_1 = arith.constant 0 : i32
    return %c0_i32, %c0_i32_0 : i32, i32
  }
  func.func @transform_10(%arg0: i32) -> (i32, i32) {
    %c0_i32 = arith.constant 0 : i32
    %c0_i32_0 = arith.constant 0 : i32
    %c0_i32_1 = arith.constant 0 : i32
    return %c0_i32, %c0_i32_0 : i32, i32
  }
  func.func @transform_11(%arg0: i32) -> (i32, i32) {
    %c0_i32 = arith.constant 0 : i32
    %c0_i32_0 = arith.constant 0 : i32
    %c0_i32_1 = arith.constant 0 : i32
    return %c0_i32, %c0_i32_0 : i32, i32
  }
  func.func @transform_12(%arg0: i32) -> (i32, i32, i32) {
    %c0_i32 = arith.constant 0 : i32
    %c0_i32_0 = arith.constant 0 : i32
    %c0_i32_1 = arith.constant 0 : i32
    return %arg0, %c0_i32, %c0_i32_0 : i32, i32, i32
  }
}

</mosaic_0001>

<bundles_post_ra>
// kernel: brain_forward.1
= control target key start
LH: loop header
LB: loop body
LE: loop exit
PB: predicated region body
PF: predicated region fallthrough
CT: control target
= control target key end

     0   :  { %s9652_s0 = inlined_call_operand.vmem [shape: bf16[4,208,256], index: 0, kind: input, shape index: {}]   ;;  %s9653_s1 = inlined_call_operand.vmem [shape: bf16[25,104], index: 1, kind: input, shape index: {}]   ;;  %s9654_s2 = inlined_call_operand.vmem [shape: bf16[256,32], index: 2, kind: input, shape index: {}]   ;;  %s9655_s3 = inlined_call_operand.vmem [shape: f32[1,32], index: 3, kind: input, shape index: {}]   ;;  %s9656_s4 = inlined_call_operand.vmem [shape: bf16[512,64], index: 4, kind: input, shape index: {}]   ;;  %s9657_s5 = inlined_call_operand.vmem [shape: f32[1,64], index: 5, kind: input, shape index: {}]   ;;  %s9658_s6 = inlined_call_operand.vmem [shape: bf16[576,64], index: 6, kind: input, shape index: {}]   ;;  %s9659_s7 = inlined_call_operand.vmem [shape: f32[1,64], index: 7, kind: input, shape index: {}]   ;;  %s9660_s8 = inlined_call_operand.vmem [shape: bf16[1600,256], index: 8, kind: input, shape index: {}]   ;;  %s9661_s9 = inlined_call_operand.vmem [shape: f32[1,256], index: 9, kind: input, shape index: {}]   ;;  %s9662_s10 = inlined_call_operand.vmem [shape: bf16[256,2], index: 10, kind: input, shape index: {}]   ;;  %s9663_s11 = inlined_call_operand.vmem [shape: f32[1,2], index: 11, kind: input, shape index: {}]   ;;  %s9664_s12 = inlined_call_operand.hbm [shape: f32[2,1,2], index: 12, kind: output, shape index: {}]  }
   0x1   :  { %9672 = sst [smem:[#allocation6_spill]] %s9652_s0 }
   0x2   :  { %9673 = sst [smem:[#allocation7_spill]] %s9654_s2 }
   0x3   :  { %17 = vsyncpa [#allocation4], 0 }
   0x4   :  { %19 = vsyncpa [#allocation4 + $0x1], 0  ;;  %s7250_s21 = smov 0   ;;  %s7252_s22 = smov 0  }
   0x5   :  { %s7254_s23 = smov 0   ;;  %s7256_s24 = smov 0  }
   0x6 LB: > { %s9665_s25 = sadd.s32 4294967295, %s7176_s24   ;;  %s5578_s26 = sadd.s32 4294967294, %s7176_s24   ;;  %s7176_s24 = sphi %s7256_s24, %s9685_s24   ;;  %s7172_s23 = sphi %s7254_s23, %s9684_s23   ;;  %s7168_s22 = sphi %s7252_s22, %s9683_s22   ;;  %s7164_s21 = sphi %s7250_s21, %s9682_s21  }
   0x7   : > { %s7273_s27 = sadd.s32 1, %s7176_s24   ;;  %s32_s28 = sadd.s32 1, %s7172_s23 }
   0x8   : > { %s29_s29 = ssub.s32 %s7176_s24, %s7273_s27  ;;  %p39_p0 = scmp.ne.s32.totalorder %s7172_s23, %s7168_s22 }
   0x9   : > { %p30_p1 = scmp.eq.s32.totalorder %s29_s29, 0  ;;  %p40_p2 = scmp.eq.s32.totalorder %s7176_s24, 0 }
   0xa   : > { %p300_p3 = scmp.eq.s32.totalorder %s9665_s25, 1  ;;  %p305_p4 = scmp.ne.s32.totalorder %s7168_s22, %s7164_s21 }
   0xb   : > { %s7286_s30 = scalar_select %p30_p1, %s7172_s23, %s32_s28  }
   0xc   : > { %p41_p5 = por %p40_p2, %p39_p0  ;;  %p7288_p6 = por %p300_p3, %p39_p0 }
   0xd   : > { %p306_p7 = scmp.eq.s32.totalorder %s5578_s26, 1  ;;  %p5580_p9 = scmp.ge.s32.totalorder %s7176_s24, 2 }
   0xf   : > { %p7292_p8 = por %p306_p7, %p305_p4  ;;  %355 = sbr.rel (%p5580_p9) target bundleno = 57 (0x39), region = 60 }
  0x16   : > { %358 = sbr.rel (!%p41_p5) target bundleno = 57 (0x39), region = 64  ;;  %s360_s15 = sand.u32 (%p41_p5), 1, %s7172_s23  }
  0x17   : > { %s5999_s16 = smul.u32 (%p41_p5), 104, %s7176_s24  ;;  %s9676_s0 = sld [smem:[#allocation6_spill]] (%p41_p5) }
  0x18   : > { %s6585_s17 = smul.u32 (%p41_p5), 416, %s360_s15 }
  0x1a   : > { %s7309_s26 = scalar_lea.vmem (%p41_p5), [#allocation2], %s6585_s17 }
  0x1d   : > { %s7304_s20 = scalar_lea.vmem %s9676_s0, %s5999_s16 }
  0x1e   : > { %v496_v0 = vld [vmem:[%s7304_s20] sm:$0xff]  ;;  %v498_v1 = vld [vmem:[%s7304_s20 + $0x8] sm:$0xff]  ;;  %v500_v2 = vld [vmem:[%s7304_s20 + $0x10] sm:$0xff] }
  0x1f   : > { %497 = vst [vmem:[%s7309_s26] sm:$0xff] %v496_v0  ;;  %499 = vst [vmem:[%s7309_s26 + $0x8] sm:$0xff] %v498_v1  ;;  %v502_v3 = vld [vmem:[%s7304_s20 + $0x18] sm:$0xff]  ;;  %v504_v4 = vld [vmem:[%s7304_s20 + $0x20] sm:$0xff] }
  0x20   : > { %501 = vst [vmem:[%s7309_s26 + $0x10] sm:$0xff] %v500_v2  ;;  %v506_v5 = vld [vmem:[%s7304_s20 + $0x28] sm:$0xff]  ;;  %503 = vst [vmem:[%s7309_s26 + $0x18] sm:$0xff] %v502_v3  ;;  %v508_v6 = vld [vmem:[%s7304_s20 + $0x30] sm:$0xff] }
  0x21   : > { %505 = vst [vmem:[%s7309_s26 + $0x20] sm:$0xff] %v504_v4  ;;  %507 = vst [vmem:[%s7309_s26 + $0x28] sm:$0xff] %v506_v5  ;;  %v510_v7 = vld [vmem:[%s7304_s20 + $0x38] sm:$0xff]  ;;  %v512_v8 = vld [vmem:[%s7304_s20 + $0x40] sm:$0xff] }
  0x22   : > { %509 = vst [vmem:[%s7309_s26 + $0x30] sm:$0xff] %v508_v6  ;;  %511 = vst [vmem:[%s7309_s26 + $0x38] sm:$0xff] %v510_v7  ;;  %v514_v9 = vld [vmem:[%s7304_s20 + $0x48] sm:$0xff]  ;;  %v516_v10 = vld [vmem:[%s7304_s20 + $0x50] sm:$0xff] }
  0x23   : > { %513 = vst [vmem:[%s7309_s26 + $0x40] sm:$0xff] %v512_v8  ;;  %v518_v11 = vld [vmem:[%s7304_s20 + $0x58] sm:$0xff]  ;;  %515 = vst [vmem:[%s7309_s26 + $0x48] sm:$0xff] %v514_v9  ;;  %v520_v12 = vld [vmem:[%s7304_s20 + $0x60] sm:$0xff] }
  0x24   : > { %517 = vst [vmem:[%s7309_s26 + $0x50] sm:$0xff] %v516_v10  ;;  %519 = vst [vmem:[%s7309_s26 + $0x58] sm:$0xff] %v518_v11  ;;  %v522_v13 = vld [vmem:[%s7304_s20 + $0xd0] sm:$0xff]  ;;  %v524_v14 = vld [vmem:[%s7304_s20 + $0xd8] sm:$0xff] }
  0x25   : > { %521 = vst [vmem:[%s7309_s26 + $0x60] sm:$0xff] %v520_v12  ;;  %523 = vst [vmem:[%s7309_s26 + $0x68] sm:$0xff] %v522_v13  ;;  %v526_v15 = vld [vmem:[%s7304_s20 + $0xe0] sm:$0xff]  ;;  %v528_v16 = vld [vmem:[%s7304_s20 + $0xe8] sm:$0xff] }
  0x26   : > { %525 = vst [vmem:[%s7309_s26 + $0x70] sm:$0xff] %v524_v14  ;;  %v530_v17 = vld [vmem:[%s7304_s20 + $0xf0] sm:$0xff]  ;;  %527 = vst [vmem:[%s7309_s26 + $0x78] sm:$0xff] %v526_v15  ;;  %v532_v18 = vld [vmem:[%s7304_s20 + $0xf8] sm:$0xff] }
  0x27   : > { %529 = vst [vmem:[%s7309_s26 + $0x80] sm:$0xff] %v528_v16  ;;  %531 = vst [vmem:[%s7309_s26 + $0x88] sm:$0xff] %v530_v17  ;;  %v534_v19 = vld [vmem:[%s7304_s20 + $0x100] sm:$0xff]  ;;  %v536_v20 = vld [vmem:[%s7304_s20 + $0x108] sm:$0xff] }
  0x28   : > { %533 = vst [vmem:[%s7309_s26 + $0x90] sm:$0xff] %v532_v18  ;;  %535 = vst [vmem:[%s7309_s26 + $0x98] sm:$0xff] %v534_v19  ;;  %v538_v21 = vld [vmem:[%s7304_s20 + $0x110] sm:$0xff]  ;;  %v540_v22 = vld [vmem:[%s7304_s20 + $0x118] sm:$0xff] }
  0x29   : > { %537 = vst [vmem:[%s7309_s26 + $0xa0] sm:$0xff] %v536_v20  ;;  %v542_v23 = vld [vmem:[%s7304_s20 + $0x120] sm:$0xff]  ;;  %539 = vst [vmem:[%s7309_s26 + $0xa8] sm:$0xff] %v538_v21  ;;  %v544_v24 = vld [vmem:[%s7304_s20 + $0x128] sm:$0xff] }
  0x2a   : > { %541 = vst [vmem:[%s7309_s26 + $0xb0] sm:$0xff] %v540_v22  ;;  %543 = vst [vmem:[%s7309_s26 + $0xb8] sm:$0xff] %v542_v23  ;;  %v546_v25 = vld [vmem:[%s7304_s20 + $0x130] sm:$0xff]  ;;  %v548_v26 = vld [vmem:[%s7304_s20 + $0x1a0] sm:$0xff] }
  0x2b   : > { %545 = vst [vmem:[%s7309_s26 + $0xc0] sm:$0xff] %v544_v24  ;;  %547 = vst [vmem:[%s7309_s26 + $0xc8] sm:$0xff] %v546_v25  ;;  %v550_v27 = vld [vmem:[%s7304_s20 + $0x1a8] sm:$0xff]  ;;  %v552_v28 = vld [vmem:[%s7304_s20 + $0x1b0] sm:$0xff] }
  0x2c   : > { %549 = vst [vmem:[%s7309_s26 + $0xd0] sm:$0xff] %v548_v26  ;;  %v554_v29 = vld [vmem:[%s7304_s20 + $0x1b8] sm:$0xff]  ;;  %551 = vst [vmem:[%s7309_s26 + $0xd8] sm:$0xff] %v550_v27  ;;  %v556_v30 = vld [vmem:[%s7304_s20 + $0x1c0] sm:$0xff] }
  0x2d   : > { %553 = vst [vmem:[%s7309_s26 + $0xe0] sm:$0xff] %v552_v28  ;;  %555 = vst [vmem:[%s7309_s26 + $0xe8] sm:$0xff] %v554_v29  ;;  %v558_v31 = vld [vmem:[%s7304_s20 + $0x1c8] sm:$0xff]  ;;  %v560_v32 = vld [vmem:[%s7304_s20 + $0x1d0] sm:$0xff] }
  0x2e   : > { %557 = vst [vmem:[%s7309_s26 + $0xf0] sm:$0xff] %v556_v30  ;;  %559 = vst [vmem:[%s7309_s26 + $0xf8] sm:$0xff] %v558_v31  ;;  %v562_v33 = vld [vmem:[%s7304_s20 + $0x1d8] sm:$0xff]  ;;  %v564_v34 = vld [vmem:[%s7304_s20 + $0x1e0] sm:$0xff] }
  0x2f   : > { %561 = vst [vmem:[%s7309_s26 + $0x100] sm:$0xff] %v560_v32  ;;  %v566_v35 = vld [vmem:[%s7304_s20 + $0x1e8] sm:$0xff]  ;;  %563 = vst [vmem:[%s7309_s26 + $0x108] sm:$0xff] %v562_v33  ;;  %v568_v36 = vld [vmem:[%s7304_s20 + $0x1f0] sm:$0xff] }
  0x30   : > { %565 = vst [vmem:[%s7309_s26 + $0x110] sm:$0xff] %v564_v34  ;;  %567 = vst [vmem:[%s7309_s26 + $0x118] sm:$0xff] %v566_v35  ;;  %v570_v37 = vld [vmem:[%s7304_s20 + $0x1f8] sm:$0xff]  ;;  %v572_v38 = vld [vmem:[%s7304_s20 + $0x200] sm:$0xff] }
  0x31   : > { %569 = vst [vmem:[%s7309_s26 + $0x120] sm:$0xff] %v568_v36  ;;  %571 = vst [vmem:[%s7309_s26 + $0x128] sm:$0xff] %v570_v37  ;;  %v574_v39 = vld [vmem:[%s7304_s20 + $0x270] sm:$0xff]  ;;  %v576_v40 = vld [vmem:[%s7304_s20 + $0x278] sm:$0xff] }
  0x32   : > { %573 = vst [vmem:[%s7309_s26 + $0x130] sm:$0xff] %v572_v38  ;;  %v578_v41 = vld [vmem:[%s7304_s20 + $0x280] sm:$0xff]  ;;  %575 = vst [vmem:[%s7309_s26 + $0x138] sm:$0xff] %v574_v39  ;;  %v580_v42 = vld [vmem:[%s7304_s20 + $0x288] sm:$0xff] }
  0x33   : > { %577 = vst [vmem:[%s7309_s26 + $0x140] sm:$0xff] %v576_v40  ;;  %579 = vst [vmem:[%s7309_s26 + $0x148] sm:$0xff] %v578_v41  ;;  %v582_v43 = vld [vmem:[%s7304_s20 + $0x290] sm:$0xff]  ;;  %v584_v44 = vld [vmem:[%s7304_s20 + $0x298] sm:$0xff] }
  0x34   : > { %581 = vst [vmem:[%s7309_s26 + $0x150] sm:$0xff] %v580_v42  ;;  %583 = vst [vmem:[%s7309_s26 + $0x158] sm:$0xff] %v582_v43  ;;  %v586_v45 = vld [vmem:[%s7304_s20 + $0x2a0] sm:$0xff]  ;;  %v588_v46 = vld [vmem:[%s7304_s20 + $0x2a8] sm:$0xff] }
  0x35   : > { %585 = vst [vmem:[%s7309_s26 + $0x160] sm:$0xff] %v584_v44  ;;  %v590_v47 = vld [vmem:[%s7304_s20 + $0x2b0] sm:$0xff]  ;;  %587 = vst [vmem:[%s7309_s26 + $0x168] sm:$0xff] %v586_v45  ;;  %v592_v48 = vld [vmem:[%s7304_s20 + $0x2b8] sm:$0xff] }
  0x36   : > { %589 = vst [vmem:[%s7309_s26 + $0x170] sm:$0xff] %v588_v46  ;;  %591 = vst [vmem:[%s7309_s26 + $0x178] sm:$0xff] %v590_v47  ;;  %v594_v49 = vld [vmem:[%s7304_s20 + $0x2c0] sm:$0xff]  ;;  %v596_v50 = vld [vmem:[%s7304_s20 + $0x2c8] sm:$0xff] }
  0x37   : > { %593 = vst [vmem:[%s7309_s26 + $0x180] sm:$0xff] %v592_v48  ;;  %595 = vst [vmem:[%s7309_s26 + $0x188] sm:$0xff] %v594_v49  ;;  %v598_v51 = vld [vmem:[%s7304_s20 + $0x2d0] sm:$0xff] }
  0x38   : > { %597 = vst [vmem:[%s7309_s26 + $0x190] sm:$0xff] %v596_v50  ;;  %599 = vst [vmem:[%s7309_s26 + $0x198] sm:$0xff] %v598_v51 }
  0x39 PF: > { %p5583_p10 = scmp.ge.s32.totalorder %s7176_s24, 1  ;;  %p604_p11 = scmp.lt.s32.totalorder %s7176_s24, 3 }
  0x3b   : > { %p605_p12 = pnand %p5583_p10, %p604_p11 }
  0x3c   : > { %s9677_s2 = sld [smem:[#allocation7_spill]] (!%p605_p12)  ;;  %s7452_s16 = sand.u32 (!%p605_p12), 1, %s7168_s22   ;;  %vm1752_vm0 = vcmask (!%p605_p12), 1041408   ;;  %vm1615_vm1 = vcmask (!%p605_p12), 1046528   ;;  %vm1539_vm2 = vsmask.f32 (!%p605_p12), 7424 }
  0x3d   : > { %608 = sbr.rel (%p605_p12) target bundleno = 2349 (0x92d), region = 102  ;;  %s9668_s17 = smov (!%p605_p12), 32   ;;  %vm1702_vm3 = vsmask.f32 (!%p605_p12), 2304  ;;  %vm1884_vm4 = vcmask (!%p605_p12), 1044480   ;;  %vm1535_vm10 = vcmask (!%p605_p12), 1043456  }
  0x3e   : > { %s6586_s19 = smul.u32 (!%p605_p12), 416, %s7452_s16  ;;  %vm1782_vm5 = vsmask.f32 (!%p605_p12), 1280  ;;  %s9679_s25 = smov (!%p605_p12), 96   ;;  %vm1643_vm6 = vsmask.f32 (!%p605_p12), 6400 }
  0x3f   : > { %vm1969_vm7 = vsmask.f32 (!%p605_p12), 256  ;;  %vm1842_vm8 = vsmask.f32 (!%p605_p12), 5376  ;;  %vm1912_vm9 = vsmask.f32 (!%p605_p12), 4352 }
  0x40   : > { %s7490_s26 = scalar_lea.vmem (!%p605_p12), [#allocation2], %s6586_s19  ;;  %s9666_s19 = smov (!%p605_p12), 96   ;;  %vm1686_vm11 = vcmask (!%p605_p12), 1042432   ;;  %vm2034_vm12 = vcmask (!%p605_p12), 261120   ;;  %vm2064_vm13 = vcmask (!%p605_p12), 785408   ;;  %vm2049_vm14 = vcmask (!%p605_p12), 523264  }
  0x41   : > { %v6650_v63 = vld [vmem:[%s7490_s26 + $0x4] ss:$8 sps:$4 sm:$0xff] (!%p605_p12)   ;;  %v6673_v4 = vld [vmem:[%s7490_s26 + $0xd4] ss:$8 sps:$4 sm:$0xff] (!%p605_p12)   ;;  %v6648_v6 = vld [vmem:[%s7490_s26] ss:$8 sps:$4 sm:$0xff] (!%p605_p12)  }
  0x42   : > { %v7417_v52 = vld [vmem:[%s9677_s2 + $0x40] sm:$0xff] (!%p605_p12)   ;;  %v7428_v54 = vld [vmem:[%s9677_s2 + $0x48] sm:$0xff] (!%p605_p12)   ;;  %v7442_v56 = vld [vmem:[%s9677_s2 + $0x50] sm:$0xff] (!%p605_p12)   ;;  %893 = vmatprep.mubr.bf16.mxu1 (!%p605_p12), %v6650_v63  ;;  %1244 = vmatprep.mubr.bf16.mxu0 (!%p605_p12), %v6673_v4  ;;  %vm1954_vm15 = vcmask (!%p605_p12), 1040384   ;;  %s650_s29 = scalar_lea.vmem (!%p605_p12), [#allocation3], %s7452_s16  ;;  %s5505_s20 = scalar_lea.sflag (!%p605_p12), [#allocation4], %s7452_s16 }
  0x43   : > { %v7422_v53 = vld [vmem:[%s9677_s2] sm:$0xff] (!%p605_p12)   ;;  %6000 = vmatprep.subr.bf16.mxu1 (!%p605_p12), %v7417_v52  ;;  %6116 = vmatprep.subr.bf16.mxu0 (!%p605_p12), %v7417_v52  ;;  %v7435_v55 = vld [vmem:[%s9677_s2 + $0x8] sm:$0xff] (!%p605_p12)   ;;  %v7449_v57 = vld [vmem:[%s9677_s2 + $0x10] sm:$0xff] (!%p605_p12)   ;;  %s7184_s0 = smov (!%p605_p12), [#allocation3]  }
  0x44   : > { %6001 = vmatpush3.bf16.msra.mxu1 %v7422_v53  ;;  %6117 = vmatpush3.bf16.msra.mxu0 %v7422_v53  ;;  %v7459_v58 = vld [vmem:[%s9677_s2 + $0x58] sm:$0xff]   ;;  %v7474_v60 = vld [vmem:[%s9677_s2 + $0x60] sm:$0xff]   ;;  %v7488_v62 = vld [vmem:[%s9677_s2 + $0x68] sm:$0xff]  }
  0x45   : > { %6002 = vmatprep.subr.bf16.mxu1 %v7428_v54  ;;  %6118 = vmatprep.subr.bf16.mxu0 %v7428_v54  ;;  %v7467_v59 = vld [vmem:[%s9677_s2 + $0x18] sm:$0xff]   ;;  %v7481_v61 = vld [vmem:[%s9677_s2 + $0x20] sm:$0xff]   ;;  %v7498_v0 = vld [vmem:[%s9677_s2 + $0x28] sm:$0xff]  }
  0x46   : > { %v7504_v1 = vld [vmem:[%s9677_s2 + $0x70] sm:$0xff]   ;;  %v7518_v3 = vld [vmem:[%s9677_s2 + $0x78] sm:$0xff]   ;;  %v6677_v9 = vld [vmem:[%s7490_s26 + $0xe4] ss:$8 sps:$4 sm:$0xff]  }
  0x47   : > { %v7512_v2 = vld [vmem:[%s9677_s2 + $0x30] sm:$0xff]   ;;  %v7527_v5 = vld [vmem:[%s9677_s2 + $0x38] sm:$0xff]   ;;  %v6654_v11 = vld [vmem:[%s7490_s26 + $0x24] ss:$8 sps:$4 sm:$0xff]   ;;  %s7118_s2 = sshll.u32 %s7184_s0, 4  ;;  %s7119_s2 = int_to_ptr.vmem [resolvable:$false] %s7118_s2 }
  0x48   : > { %6003 = vmatpush3.bf16.msra.mxu1 %v7435_v55  ;;  %6119 = vmatpush3.bf16.msra.mxu0 %v7435_v55  ;;  %v6651_v7 = vld [vmem:[%s7490_s26 + $0x14] ss:$8 sps:$4 sm:$0xff]   ;;  %v6671_v8 = vld [vmem:[%s7490_s26 + $0xd0] ss:$8 sps:$4 sm:$0xff]   ;;  %v6679_v12 = vld [vmem:[%s7490_s26 + $0xe0] ss:$8 sps:$4 sm:$0xff]  }
  0x49   : > { %6004 = vmatprep.subr.bf16.mxu1 %v7442_v56  ;;  %6120 = vmatprep.subr.bf16.mxu0 %v7442_v56  ;;  %v6653_v10 = vld [vmem:[%s7490_s26 + $0x10] ss:$8 sps:$4 sm:$0xff]   ;;  %v6683_v13 = vld [vmem:[%s7490_s26 + $0xf4] ss:$8 sps:$4 sm:$0xff]   ;;  %v6656_v14 = vld [vmem:[%s7490_s26 + $0x20] ss:$8 sps:$4 sm:$0xff]  }
  0x4a   : > { %v6657_v15 = vld [vmem:[%s7490_s26 + $0x34] ss:$8 sps:$4 sm:$0xff]   ;;  %v6685_v16 = vld [vmem:[%s7490_s26 + $0xf0] ss:$8 sps:$4 sm:$0xff]   ;;  %v6689_v17 = vld [vmem:[%s7490_s26 + $0x104] ss:$8 sps:$4 sm:$0xff]  }
  0x4b   : > { %v6659_v18 = vld [vmem:[%s7490_s26 + $0x30] ss:$8 sps:$4 sm:$0xff]   ;;  %v6660_v19 = vld [vmem:[%s7490_s26 + $0x44] ss:$8 sps:$4 sm:$0xff]   ;;  %v6691_v20 = vld [vmem:[%s7490_s26 + $0x100] ss:$8 sps:$4 sm:$0xff]  }
  0x4c   : > { %6005 = vmatpush3.bf16.msra.mxu1 %v7449_v57  ;;  %6121 = vmatpush3.bf16.msra.mxu0 %v7449_v57  ;;  %v6695_v21 = vld [vmem:[%s7490_s26 + $0x114] ss:$8 sps:$4 sm:$0xff]   ;;  %v6662_v22 = vld [vmem:[%s7490_s26 + $0x40] ss:$8 sps:$4 sm:$0xff]   ;;  %v6697_v24 = vld [vmem:[%s7490_s26 + $0x110] ss:$8 sps:$4 sm:$0xff]  }
  0x4d   : > { %6006 = vmatprep.subr.bf16.mxu1 %v7459_v58  ;;  %6122 = vmatprep.subr.bf16.mxu0 %v7459_v58  ;;  %v6663_v23 = vld [vmem:[%s7490_s26 + $0x54] ss:$8 sps:$4 sm:$0xff]   ;;  %v6701_v25 = vld [vmem:[%s7490_s26 + $0x124] ss:$8 sps:$4 sm:$0xff]   ;;  %v6665_v27 = vld [vmem:[%s7490_s26 + $0x50] ss:$8 sps:$4 sm:$0xff]  }
  0x4e   : > { %v697_v26 = vld [vmem:[%s7490_s26 + $0x60] sm:$0xff]  ;;  %v5653_v28 = vld [vmem:[%s7490_s26 + $0x130] sm:$0xff]  ;;  %v5626_v45 = vld [vmem:[%s7490_s26 + $0xc8] sm:$0xff] }
  0x4f   : > { %v6703_v29 = vld [vmem:[%s7490_s26 + $0x120] ss:$8 sps:$4 sm:$0xff]   ;;  %v5597_v30 = vcombine.high %v697_v26, %v697_v26  ;;  %v5667_v31 = vcombine.high %v5653_v28, %v5653_v28  ;;  %v6670_v32 = vld [vmem:[%s7490_s26 + $0x6c] ss:$8 sps:$4 sm:$0xff]   ;;  %v5596_v33 = vcombine.low %v697_v26, %v697_v26  ;;  %v5666_v34 = vcombine.low %v5653_v28, %v5653_v28  ;;  %v6674_v36 = vld [vmem:[%s7490_s26 + $0x7c] ss:$8 sps:$4 sm:$0xff]  }
  0x50   : > { %6007 = vmatpush3.bf16.msra.mxu1 %v7467_v59  ;;  %6123 = vmatpush3.bf16.msra.mxu0 %v7467_v59  ;;  %v6668_v35 = vld [vmem:[%s7490_s26 + $0x68] ss:$8 sps:$4 sm:$0xff]   ;;  %v6676_v37 = vld [vmem:[%s7490_s26 + $0x78] ss:$8 sps:$4 sm:$0xff]   ;;  %v6680_v38 = vld [vmem:[%s7490_s26 + $0x8c] ss:$8 sps:$4 sm:$0xff]   ;;  %v5640_v47 = vcombine.high %v5626_v45, %v5626_v45  ;;  %v5639_v49 = vcombine.low %v5626_v45, %v5626_v45 }
  0x51   : > { %6008 = vmatprep.subr.bf16.mxu1 %v7474_v60  ;;  %6124 = vmatprep.subr.bf16.mxu0 %v7474_v60  ;;  %v6682_v39 = vld [vmem:[%s7490_s26 + $0x88] ss:$8 sps:$4 sm:$0xff]   ;;  %v6686_v40 = vld [vmem:[%s7490_s26 + $0x9c] ss:$8 sps:$4 sm:$0xff]   ;;  %v6688_v41 = vld [vmem:[%s7490_s26 + $0x98] ss:$8 sps:$4 sm:$0xff]  }
  0x52   : > { %v6692_v42 = vld [vmem:[%s7490_s26 + $0xac] ss:$8 sps:$4 sm:$0xff]   ;;  %v6694_v43 = vld [vmem:[%s7490_s26 + $0xa8] ss:$8 sps:$4 sm:$0xff]   ;;  %v6698_v44 = vld [vmem:[%s7490_s26 + $0xbc] ss:$8 sps:$4 sm:$0xff]  }
  0x53   : > { %v6700_v46 = vld [vmem:[%s7490_s26 + $0xb8] ss:$8 sps:$4 sm:$0xff]   ;;  %v6710_v48 = vld [vmem:[%s7490_s26 + $0x13c] ss:$8 sps:$4 sm:$0xff]   ;;  %v6711_v51 = vld [vmem:[%s7490_s26 + $0x14c] ss:$8 sps:$4 sm:$0xff]  }
  0x54   : > { %6009 = vmatpush3.bf16.msra.mxu1 %v7481_v61  ;;  %6125 = vmatpush3.bf16.msra.mxu0 %v7481_v61  ;;  %v6708_v50 = vld [vmem:[%s7490_s26 + $0x138] ss:$8 sps:$4 sm:$0xff]  }
  0x55   : > { %6010 = vmatprep.subr.bf16.mxu1 %v7488_v62  ;;  %6126 = vmatprep.subr.bf16.mxu0 %v7488_v62 }
  0x58   : > { %6011 = vmatpush3.bf16.msra.mxu1 %v7498_v0  ;;  %6127 = vmatpush3.bf16.msra.mxu0 %v7498_v0 }
  0x59   : > { %6012 = vmatprep.subr.bf16.mxu1 %v7504_v1  ;;  %6128 = vmatprep.subr.bf16.mxu0 %v7504_v1 }
  0x5c   : > { %6013 = vmatpush3.bf16.msra.mxu1 %v7512_v2  ;;  %6129 = vmatpush3.bf16.msra.mxu0 %v7512_v2 }
  0x5d   : > { %6014 = vmatprep.subr.bf16.mxu1 %v7518_v3  ;;  %6130 = vmatprep.subr.bf16.mxu0 %v7518_v3 }
  0x60   : > { %6015 = vmatpush3.bf16.msra.mxu1 %v7527_v5  ;;  %6131 = vmatpush3.bf16.msra.mxu0 %v7527_v5 }
  0x61   : > { %6058 = vmatprep.subr.bf16.mxu1 %v7417_v52 }
  0x63   : > { %894 = vmatmul.mubr.bf16.vlgmr.msra.gmra.mrb[0].mxu1 %v6648_v6  ;;  %1245 = vmatmul.mubr.bf16.vlgmr.msra.gmra.mrb[0].mxu0 %v6671_v8 }
  0x64   : > { %901 = vmatprep.mubr.bf16.mxu1 %v6651_v7  ;;  %6059 = vmatpush3.bf16.msra.mxu1 %v7422_v53 }
  0x65   : > { %6060 = vmatprep.subr.bf16.mxu1 %v7428_v54  ;;  %1252 = vmatprep.mubr.bf16.mxu0 %v6677_v9 }
  0x68   : > { %6061 = vmatpush3.bf16.msra.mxu1 %v7435_v55 }
  0x69   : > { %6062 = vmatprep.subr.bf16.mxu1 %v7442_v56 }
  0x6b   : > { %902 = vmatmul.mubr.bf16.gmra.mrb[4].mxu1 %v6653_v10  ;;  %1253 = vmatmul.mubr.bf16.gmra.mrb[4].mxu0 %v6679_v12 }
  0x6c   : > { %909 = vmatprep.mubr.bf16.mxu1 %v6654_v11  ;;  %6063 = vmatpush3.bf16.msra.mxu1 %v7449_v57 }
  0x6d   : > { %6064 = vmatprep.subr.bf16.mxu1 %v7459_v58  ;;  %1260 = vmatprep.mubr.bf16.mxu0 %v6683_v13 }
  0x70   : > { %6065 = vmatpush3.bf16.msra.mxu1 %v7467_v59 }
  0x71   : > { %6066 = vmatprep.subr.bf16.mxu1 %v7474_v60 }
  0x73   : > { %910 = vmatmul.mubr.bf16.gmra.mrb[8].mxu1 %v6656_v14  ;;  %1261 = vmatmul.mubr.bf16.gmra.mrb[8].mxu0 %v6685_v16 }
  0x74   : > { %917 = vmatprep.mubr.bf16.mxu1 %v6657_v15  ;;  %6067 = vmatpush3.bf16.msra.mxu1 %v7481_v61 }
  0x75   : > { %6068 = vmatprep.subr.bf16.mxu1 %v7488_v62  ;;  %1268 = vmatprep.mubr.bf16.mxu0 %v6689_v17 }
  0x78   : > { %6069 = vmatpush3.bf16.msra.mxu1 %v7498_v0 }
  0x79   : > { %6070 = vmatprep.subr.bf16.mxu1 %v7504_v1 }
  0x7b   : > { %918 = vmatmul.mubr.bf16.gmra.mrb[12].mxu1 %v6659_v18  ;;  %1269 = vmatmul.mubr.bf16.gmra.mrb[12].mxu0 %v6691_v20 }
  0x7c   : > { %925 = vmatprep.mubr.bf16.mxu1 %v6660_v19  ;;  %6071 = vmatpush3.bf16.msra.mxu1 %v7512_v2 }
  0x7d   : > { %6072 = vmatprep.subr.bf16.mxu1 %v7518_v3  ;;  %1276 = vmatprep.mubr.bf16.mxu0 %v6695_v21 }
  0x80   : > { %6073 = vmatpush3.bf16.msra.mxu1 %v7527_v5 }
  0x81   : > { %6174 = vmatprep.subr.bf16.mxu1 %v7417_v52  ;;  %v6713_v52 = vld [vmem:[%s7490_s26 + $0x148] ss:$8 sps:$4 sm:$0xff]  }
  0x83   : > { %926 = vmatmul.mubr.bf16.gmra.mrb[16].mxu1 %v6662_v22  ;;  %1277 = vmatmul.mubr.bf16.gmra.mrb[16].mxu0 %v6697_v24 }
  0x84   : > { %933 = vmatprep.mubr.bf16.mxu1 %v6663_v23  ;;  %1284 = vmatprep.mubr.bf16.mxu0 %v6701_v25 }
  0x8b   : > { %934 = vmatmul.mubr.bf16.gmra.mrb[20].mxu1 %v6665_v27  ;;  %1285 = vmatmul.mubr.bf16.gmra.mrb[20].mxu0 %v6703_v29 }
  0x8c   : > { %941 = vmatprep.mubr.bf16.mxu1 %v5597_v30  ;;  %1292 = vmatprep.mubr.bf16.mxu0 %v5667_v31 }
  0x93   : > { %942 = vmatmul.mubr.bf16.gmra.mrb[24].mxu1 %v5596_v33  ;;  %1293 = vmatmul.mubr.bf16.gmra.mrb[24].mxu0 %v5666_v34 }
  0x94   : > { %1062 = vmatprep.mubr.bf16.mxu1 %v6670_v32 }
  0x9b   : > { %1063 = vmatmul.mubr.bf16.vlgmr.msra.gmra.mrb[28].mxu1 %v6668_v35 }
  0x9c   : > { %1070 = vmatprep.mubr.bf16.mxu1 %v6674_v36  ;;  %6175 = vmatpush3.bf16.msra.mxu1 %v7422_v53  ;;  %v6714_v53 = vld [vmem:[%s7490_s26 + $0x15c] ss:$8 sps:$4 sm:$0xff]  }
  0x9d   : > { %6176 = vmatprep.subr.bf16.mxu1 %v7428_v54  ;;  %v6716_v54 = vld [vmem:[%s7490_s26 + $0x158] ss:$8 sps:$4 sm:$0xff]  }
  0xa0   : > { %6177 = vmatpush3.bf16.msra.mxu1 %v7435_v55  ;;  %v6717_v55 = vld [vmem:[%s7490_s26 + $0x16c] ss:$8 sps:$4 sm:$0xff]  }
  0xa1   : > { %6178 = vmatprep.subr.bf16.mxu1 %v7442_v56  ;;  %v6719_v56 = vld [vmem:[%s7490_s26 + $0x168] ss:$8 sps:$4 sm:$0xff]  }
  0xa3   : > { %1071 = vmatmul.mubr.bf16.gmra.mrb[32].mxu1 %v6676_v37 }
  0xa4   : > { %1078 = vmatprep.mubr.bf16.mxu1 %v6680_v38  ;;  %6179 = vmatpush3.bf16.msra.mxu1 %v7449_v57  ;;  %v6720_v57 = vld [vmem:[%s7490_s26 + $0x17c] ss:$8 sps:$4 sm:$0xff]  }
  0xa5   : > { %6180 = vmatprep.subr.bf16.mxu1 %v7459_v58  ;;  %v6722_v58 = vld [vmem:[%s7490_s26 + $0x178] ss:$8 sps:$4 sm:$0xff]  }
  0xa8   : > { %6181 = vmatpush3.bf16.msra.mxu1 %v7467_v59  ;;  %v6723_v59 = vld [vmem:[%s7490_s26 + $0x18c] ss:$8 sps:$4 sm:$0xff]  }
  0xa9   : > { %6182 = vmatprep.subr.bf16.mxu1 %v7474_v60  ;;  %v5680_v60 = vld [vmem:[%s7490_s26 + $0x198] sm:$0xff] }
  0xaa   : > { %v5693_v63 = vcombine.low %v5680_v60, %v5680_v60 }
  0xab   : > { %1079 = vmatmul.mubr.bf16.gmra.mrb[36].mxu1 %v6682_v39 }
  0xac   : > { %1086 = vmatprep.mubr.bf16.mxu1 %v6686_v40  ;;  %6183 = vmatpush3.bf16.msra.mxu1 %v7481_v61  ;;  %v6725_v61 = vld [vmem:[%s7490_s26 + $0x188] ss:$8 sps:$4 sm:$0xff]   ;;  %s9670_s26 = smov 64  }
  0xad   : > { %6184 = vmatprep.subr.bf16.mxu1 %v7488_v62  ;;  %v5694_v62 = vcombine.high %v5680_v60, %v5680_v60 }
  0xb0   : > { %6185 = vmatpush3.bf16.msra.mxu1 %v7498_v0 }
  0xb1   : > { %6186 = vmatprep.subr.bf16.mxu1 %v7504_v1  ;;  %v7178_v1 = vmov 0  }
  0xb2   : > { %2014 = vrot.lane.b32.xlu0 %v7178_v1, %s9670_s26  ;;  %v7630_v13 = vrot.slane %v7178_v1, 1 }
  0xb3   : > { %1087 = vmatmul.mubr.bf16.gmra.mrb[40].mxu1 %v6688_v41 }
  0xb4   : > { %1094 = vmatprep.mubr.bf16.mxu1 %v6692_v42  ;;  %6187 = vmatpush3.bf16.msra.mxu1 %v7512_v2  ;;  %v7617_v2 = vrot.slane %v7178_v1, 7 }
  0xb5   : > { %6188 = vmatprep.subr.bf16.mxu1 %v7518_v3 }
  0xb6   : > { %2002 = vrot.lane.b32.xlu1 %v7617_v2, %s9668_s17  ;;  %2030 = vrot.lane.b32.xlu0 %v7630_v13, %s9666_s19  ;;  %s9678_s17 = smov 32   ;;  %s9681_s19 = sadd.s32 4294967295, %s7176_s24  }
  0xb7   : > { %s5994_s28 = sshll.u32 %s9681_s19, 4  ;;  %s7120_s19 = scalar_lea.vmem %s7119_s2, 32 }
  0xb8   : > { %6189 = vmatpush3.bf16.msra.mxu1 %v7527_v5  ;;  %s9608_s18 = scalar_lea.hbm %s9664_s12, %s5994_s28 }
  0xbb   : > { %1095 = vmatmul.mubr.bf16.gmra.mrb[44].mxu1 %v6694_v43 }
  0xbc   : > { %1102 = vmatprep.mubr.bf16.mxu1 %v6698_v44 }
  0xc3   : > { %1103 = vmatmul.mubr.bf16.gmra.mrb[48].mxu1 %v6700_v46 }
  0xc4   : > { %1110 = vmatprep.mubr.bf16.mxu1 %v5640_v47 }
  0xcb   : > { %1111 = vmatmul.mubr.bf16.gmra.mrb[52].mxu1 %v5639_v49 }
  0xcc   : > { %1426 = vmatprep.mubr.bf16.mxu1 %v6710_v48 }
  0xd3   : > { %1427 = vmatmul.mubr.bf16.vlgmr.msra.gmra.mrb[56].mxu1 %v6708_v50 }
  0xd4   : > { %1434 = vmatprep.mubr.bf16.mxu1 %v6711_v51 }
  0xdb   : > { %1435 = vmatmul.mubr.bf16.gmra.mrb[60].mxu1 %v6713_v52 }
  0xdc   : > { %1442 = vmatprep.mubr.bf16.mxu1 %v6714_v53 }
  0xe3   : > { %1443 = vmatmul.mubr.bf16.gmra.mrb[64].mxu1 %v6716_v54 }
  0xe4   : > { %1450 = vmatprep.mubr.bf16.mxu1 %v6717_v55 }
  0xeb   : > { %1451 = vmatmul.mubr.bf16.gmra.mrb[68].mxu1 %v6719_v56 }
  0xec   : > { %1458 = vmatprep.mubr.bf16.mxu1 %v6720_v57 }
  0xf3   : > { %1459 = vmatmul.mubr.bf16.gmra.mrb[72].mxu1 %v6722_v58 }
  0xf4   : > { %1466 = vmatprep.mubr.bf16.mxu1 %v6723_v59 }
  0xfb   : > { %1467 = vmatmul.mubr.bf16.gmra.mrb[76].mxu1 %v6725_v61 }
  0xfc   : > { %1474 = vmatprep.mubr.bf16.mxu1 %v5694_v62 }
 0x103   : > { %1475 = vmatmul.mubr.bf16.gmra.mrb[80].mxu1 %v5693_v63 }
 0x136   : > { %v6016_v0 = vpop.f32.mrb[0].mxu1  ;;  %v6132_v6 = vpop.f32.mrb[0].mxu0 }
 0x137   : > { %v6017_v3 = vpop.f32.mrb[1].mxu1  ;;  %v6133_v8 = vpop.f32.mrb[1].mxu0 }
 0x138   : > { %v7619_v4 = vadd.f32 %v6017_v3, %v6016_v0  ;;  %v6019_v5 = vpop.f32.mrb[2].mxu1  ;;  %v7627_v10 = vadd.f32 %v6133_v8, %v6132_v6  ;;  %v6135_v11 = vpop.f32.mrb[2].mxu0 }
 0x139   : > { %v6020_v7 = vpop.f32.mrb[3].mxu1  ;;  %v6136_v12 = vpop.f32.mrb[3].mxu0 }
 0x13a   : > { %v7625_v9 = vadd.f32 %v6020_v7, %v6019_v5  ;;  %v7632_v14 = vadd.f32 %v6136_v12, %v6135_v11 }
 0x13e   : > { %v6022_v15 = vpop.f32.mrb[4].mxu1  ;;  %v6138_v19 = vpop.f32.mrb[4].mxu0 }
 0x13f   : > { %v6023_v16 = vpop.f32.mrb[5].mxu1  ;;  %v6139_v21 = vpop.f32.mrb[5].mxu0 }
 0x140   : > { %v7636_v17 = vadd.f32 %v6023_v16, %v6022_v15  ;;  %v6025_v18 = vpop.f32.mrb[6].mxu1  ;;  %v7640_v23 = vadd.f32 %v6139_v21, %v6138_v19  ;;  %v6141_v24 = vpop.f32.mrb[6].mxu0 }
 0x141   : > { %v6026_v20 = vpop.f32.mrb[7].mxu1  ;;  %v6142_v25 = vpop.f32.mrb[7].mxu0 }
 0x142   : > { %v7638_v22 = vadd.f32 %v6026_v20, %v6025_v18  ;;  %v7642_v26 = vadd.f32 %v6142_v25, %v6141_v24 }
 0x146   : > { %v6028_v27 = vpop.f32.mrb[8].mxu1  ;;  %v6144_v31 = vpop.f32.mrb[8].mxu0 }
 0x147   : > { %v6029_v28 = vpop.f32.mrb[9].mxu1  ;;  %v6145_v33 = vpop.f32.mrb[9].mxu0 }
 0x148   : > { %v7644_v29 = vadd.f32 %v6029_v28, %v6028_v27  ;;  %v6031_v30 = vpop.f32.mrb[10].mxu1  ;;  %v7648_v35 = vadd.f32 %v6145_v33, %v6144_v31  ;;  %v6147_v36 = vpop.f32.mrb[10].mxu0 }
 0x149   : > { %v6032_v32 = vpop.f32.mrb[11].mxu1  ;;  %v6148_v37 = vpop.f32.mrb[11].mxu0 }
 0x14a   : > { %v7646_v34 = vadd.f32 %v6032_v32, %v6031_v30  ;;  %v7650_v38 = vadd.f32 %v6148_v37, %v6147_v36 }
 0x14e   : > { %v6034_v39 = vpop.f32.mrb[12].mxu1  ;;  %v6150_v43 = vpop.f32.mrb[12].mxu0 }
 0x14f   : > { %v6035_v40 = vpop.f32.mrb[13].mxu1  ;;  %v6151_v45 = vpop.f32.mrb[13].mxu0 }
 0x150   : > { %v7652_v41 = vadd.f32 %v6035_v40, %v6034_v39  ;;  %v6037_v42 = vpop.f32.mrb[14].mxu1  ;;  %v7656_v47 = vadd.f32 %v6151_v45, %v6150_v43  ;;  %v6153_v48 = vpop.f32.mrb[14].mxu0 }
 0x151   : > { %v6038_v44 = vpop.f32.mrb[15].mxu1  ;;  %v6154_v49 = vpop.f32.mrb[15].mxu0 }
 0x152   : > { %v7654_v46 = vadd.f32 %v6038_v44, %v6037_v42  ;;  %v7658_v50 = vadd.f32 %v6154_v49, %v6153_v48 }
 0x156   : > { %v6040_v51 = vpop.f32.mrb[16].mxu1  ;;  %v6156_v55 = vpop.f32.mrb[16].mxu0 }
 0x157   : > { %v6041_v52 = vpop.f32.mrb[17].mxu1  ;;  %v6157_v57 = vpop.f32.mrb[17].mxu0 }
 0x158   : > { %v7660_v53 = vadd.f32 %v6041_v52, %v6040_v51  ;;  %v6043_v54 = vpop.f32.mrb[18].mxu1  ;;  %v7664_v59 = vadd.f32 %v6157_v57, %v6156_v55  ;;  %v6159_v60 = vpop.f32.mrb[18].mxu0 }
 0x159   : > { %v6044_v56 = vpop.f32.mrb[19].mxu1  ;;  %v6160_v61 = vpop.f32.mrb[19].mxu0 }
 0x15a   : > { %v7662_v58 = vadd.f32 %v6044_v56, %v6043_v54  ;;  %v7666_v62 = vadd.f32 %v6160_v61, %v6159_v60 }
 0x15e   : > { %v6046_v63 = vpop.f32.mrb[20].mxu1  ;;  %v6162_v6 = vpop.f32.mrb[20].mxu0 }
 0x15f   : > { %v6047_v0 = vpop.f32.mrb[21].mxu1  ;;  %v6163_v8 = vpop.f32.mrb[21].mxu0 }
 0x160   : > { %v7668_v3 = vadd.f32 %v6047_v0, %v6046_v63  ;;  %v6049_v5 = vpop.f32.mrb[22].mxu1  ;;  %v7672_v12 = vadd.f32 %v6163_v8, %v6162_v6  ;;  %v6165_v15 = vpop.f32.mrb[22].mxu0 }
 0x161   : > { %v6050_v7 = vpop.f32.mrb[23].mxu1  ;;  %v6166_v16 = vpop.f32.mrb[23].mxu0 }
 0x162   : > { %v7670_v11 = vadd.f32 %v6050_v7, %v6049_v5  ;;  %v7674_v18 = vadd.f32 %v6166_v16, %v6165_v15 }
 0x166   : > { %v6052_v19 = vpop.f32.mrb[24].mxu1  ;;  %v6168_v25 = vpop.f32.mrb[24].mxu0 }
 0x167   : > { %v6053_v20 = vpop.f32.mrb[25].mxu1  ;;  %v6169_v28 = vpop.f32.mrb[25].mxu0 }
 0x168   : > { %v7676_v21 = vadd.f32 %v6053_v20, %v6052_v19  ;;  %v6055_v24 = vpop.f32.mrb[26].mxu1  ;;  %v7678_v30 = vadd.f32 %v6169_v28, %v6168_v25  ;;  %v6171_v31 = vpop.f32.mrb[26].mxu0 }
 0x169   : > { %v6056_v27 = vpop.f32.mrb[27].mxu1  ;;  %v6172_v32 = vpop.f32.mrb[27].mxu0 }
 0x16e   : > { %v6074_v33 = vpop.f32.mrb[28].mxu1 }
 0x16f   : > { %v6075_v36 = vpop.f32.mrb[29].mxu1 }
 0x170   : > { %v6076_v37 = vadd.f32 %v6075_v36, %v6074_v33  ;;  %v6077_v39 = vpop.f32.mrb[30].mxu1 }
 0x171   : > { %v6078_v40 = vpop.f32.mrb[31].mxu1 }
 0x172   : > { %v1118_v42 = vmax.f32 %v7619_v4, %v6076_v37  ;;  %v6079_v43 = vadd.f32 %v6078_v40, %v6077_v39 }
 0x174   : > { %v1119_v44 = vmax.f32 %v7625_v9, %v6079_v43  ;;  %v7683_v45 = vmax.f32 %v1118_v42, %v7627_v10 }
 0x176   : > { %v7686_v48 = vmax.f32 %v1119_v44, %v7632_v14  ;;  %v6080_v49 = vpop.f32.mrb[32].mxu1 }
 0x177   : > { %v6081_v51 = vpop.f32.mrb[33].mxu1 }
 0x178   : > { %v6082_v52 = vadd.f32 %v6081_v51, %v6080_v49  ;;  %v6083_v54 = vpop.f32.mrb[34].mxu1 }
 0x179   : > { %v6084_v55 = vpop.f32.mrb[35].mxu1 }
 0x17a   : > { %v1120_v56 = vmax.f32 %v7636_v17, %v6082_v52  ;;  %v6085_v57 = vadd.f32 %v6084_v55, %v6083_v54  ;;  %v6731_v54 = vld [vmem:[%s9656_s4 + $0x8] sm:$0xff]  }
 0x17c   : > { %v1121_v60 = vmax.f32 %v7638_v22, %v6085_v57  ;;  %v7691_v4 = vmax.f32 %v1120_v56, %v7640_v23 }
 0x17e   : > { %v7694_v9 = vmax.f32 %v1121_v60, %v7642_v26  ;;  %v6086_v10 = vpop.f32.mrb[36].mxu1 }
 0x17f   : > { %v6087_v61 = vpop.f32.mrb[37].mxu1 }
 0x180   : > { %v6088_v14 = vadd.f32 %v6087_v61, %v6086_v10  ;;  %v6089_v63 = vpop.f32.mrb[38].mxu1  ;;  %v7750_v10 = vld [vmem:[%s9655_s3] ss:$0 sm:$0xff]  ;;  %v6733_v61 = vld [vmem:[%s9656_s4 + $0x10] sm:$0xff]  }
 0x181   : > { %v6090_v0 = vpop.f32.mrb[39].mxu1 }
 0x182   : > { %v1122_v5 = vmax.f32 %v7644_v29, %v6088_v14  ;;  %v6091_v6 = vadd.f32 %v6090_v0, %v6089_v63  ;;  %v6734_v0 = vld [vmem:[%s9656_s4 + $0x58] sm:$0xff]  }
 0x184   : > { %v1123_v7 = vmax.f32 %v7646_v34, %v6091_v6  ;;  %v7699_v17 = vmax.f32 %v1122_v5, %v7648_v35 }
 0x186   : > { %v7702_v22 = vmax.f32 %v1123_v7, %v7650_v38  ;;  %v6092_v23 = vpop.f32.mrb[40].mxu1  ;;  %v6735_v7 = vld [vmem:[%s9656_s4 + $0x18] sm:$0xff]  }
 0x187   : > { %v6093_v8 = vpop.f32.mrb[41].mxu1 }
 0x188   : > { %v6094_v26 = vadd.f32 %v6093_v8, %v6092_v23  ;;  %v6095_v15 = vpop.f32.mrb[42].mxu1 }
 0x189   : > { %v6096_v16 = vpop.f32.mrb[43].mxu1 }
 0x18a   : > { %v1124_v19 = vmax.f32 %v7652_v41, %v6094_v26  ;;  %v6097_v20 = vadd.f32 %v6096_v16, %v6095_v15 }
 0x18c   : > { %v1125_v24 = vmax.f32 %v7654_v46, %v6097_v20  ;;  %v7707_v29 = vmax.f32 %v1124_v19, %v7656_v47 }
 0x18e   : > { %v7710_v34 = vmax.f32 %v1125_v24, %v7658_v50  ;;  %v6098_v35 = vpop.f32.mrb[44].mxu1 }
 0x18f   : > { %v6099_v25 = vpop.f32.mrb[45].mxu1 }
 0x190   : > { %v6100_v38 = vadd.f32 %v6099_v25, %v6098_v35  ;;  %v6101_v27 = vpop.f32.mrb[46].mxu1 }
 0x191   : > { %v6102_v28 = vpop.f32.mrb[47].mxu1 }
 0x192   : > { %v1126_v31 = vmax.f32 %v7660_v53, %v6100_v38  ;;  %v6103_v32 = vadd.f32 %v6102_v28, %v6101_v27 }
 0x194   : > { %v1127_v33 = vmax.f32 %v7662_v58, %v6103_v32  ;;  %v7715_v41 = vmax.f32 %v1126_v31, %v7664_v59  ;;  %v6738_v31 = vld [vmem:[%s9656_s4 + $0x68] sm:$0xff]  }
 0x196   : > { %v7718_v46 = vmax.f32 %v1127_v33, %v7666_v62  ;;  %v6104_v47 = vpop.f32.mrb[48].mxu1  ;;  %v6728_v62 = vld [vmem:[%s9656_s4 + $0x40] sm:$0xff]  }
 0x197   : > { %v6105_v36 = vpop.f32.mrb[49].mxu1  ;;  %6232 = vmatprep.subr.bf16.mxu0 %v6728_v62 }
 0x198   : > { %v6106_v50 = vadd.f32 %v6105_v36, %v6104_v47  ;;  %v6107_v37 = vpop.f32.mrb[50].mxu1 }
 0x199   : > { %v6108_v39 = vpop.f32.mrb[51].mxu1 }
 0x19a   : > { %v1128_v40 = vmax.f32 %v7668_v3, %v6106_v50  ;;  %v6109_v42 = vadd.f32 %v6108_v39, %v6107_v37  ;;  %v6729_v3 = vld [vmem:[%s9656_s4] sm:$0xff]  }
 0x19b   : > { %6233 = vmatpush3.bf16.msra.mxu0 %v6729_v3 }
 0x19c   : > { %v1129_v43 = vmax.f32 %v7670_v11, %v6109_v42  ;;  %v7723_v53 = vmax.f32 %v1128_v40, %v7672_v12  ;;  %v6730_v12 = vld [vmem:[%s9656_s4 + $0x48] sm:$0xff]   ;;  %v6740_v40 = vld [vmem:[%s9656_s4 + $0x70] sm:$0xff]  }
 0x19d   : > { %6234 = vmatprep.subr.bf16.mxu0 %v6730_v12 }
 0x19e   : > { %v7726_v58 = vmax.f32 %v1129_v43, %v7674_v18  ;;  %v6110_v59 = vpop.f32.mrb[52].mxu1 }
 0x19f   : > { %v6111_v44 = vpop.f32.mrb[53].mxu1  ;;  %6235 = vmatpush3.bf16.msra.mxu0 %v6731_v54 }
 0x1a0   : > { %v6112_v49 = vadd.f32 %v6111_v44, %v6110_v59  ;;  %v6113_v51 = vpop.f32.mrb[54].mxu1  ;;  %v6741_v44 = vld [vmem:[%s9656_s4 + $0x30] sm:$0xff]  }
 0x1a1   : > { %v6114_v52 = vpop.f32.mrb[55].mxu1 }
 0x1a2   : > { %v1130_v11 = vmax.f32 %v7676_v21, %v6112_v49  ;;  %v6732_v21 = vld [vmem:[%s9656_s4 + $0x50] sm:$0xff]  }
 0x1a3   : > { %6236 = vmatprep.subr.bf16.mxu0 %v6732_v21 }
 0x1a4   : > { %v7739_v18 = vmax.f32 %v1130_v11, %v7678_v30  ;;  %6237 = vmatpush3.bf16.msra.mxu0 %v6733_v61  ;;  %v6742_v11 = vld [vmem:[%s9656_s4 + $0x78] sm:$0xff]  }
 0x1a5   : > { %6238 = vmatprep.subr.bf16.mxu0 %v6734_v0 }
 0x1a6   : > { %v6190_v55 = vpop.f32.mrb[56].mxu1 }
 0x1a7   : > { %v6191_v56 = vpop.f32.mrb[57].mxu1 }
 0x1a8   : > { %v6192_v57 = vadd.f32 %v6191_v56, %v6190_v55  ;;  %v6193_v60 = vpop.f32.mrb[58].mxu1  ;;  %6239 = vmatpush3.bf16.msra.mxu0 %v6735_v7 }
 0x1a9   : > { %v6194_v30 = vpop.f32.mrb[59].mxu1 }
 0x1aa   : > { %v1482_v14 = vmax.f32 %v7683_v45, %v6192_v57  ;;  %v6195_v63 = vadd.f32 %v6194_v30, %v6193_v60  ;;  %v6736_v45 = vld [vmem:[%s9656_s4 + $0x60] sm:$0xff]  }
 0x1ab   : > { %6240 = vmatprep.subr.bf16.mxu0 %v6736_v45 }
 0x1ac   : > { %v1502_v5 = vadd.f32 %v7750_v10, %v1482_v14  ;;  %v1483_v6 = vmax.f32 %v7686_v48, %v6195_v63  ;;  %v6737_v48 = vld [vmem:[%s9656_s4 + $0x20] sm:$0xff]  }
 0x1ad   : > { %6241 = vmatpush3.bf16.msra.mxu0 %v6737_v48 }
 0x1ae   : > { %v1503_v23 = vadd.f32 %v7750_v10, %v1483_v6  ;;  %v6196_v8 = vpop.f32.mrb[60].mxu1  ;;  %v1515_v15 = vmax.f32 %v1502_v5, 0.0  ;;  %6242 = vmatprep.subr.bf16.mxu0 %v6738_v31 }
 0x1af   : > { %v6197_v26 = vpop.f32.mrb[61].mxu1 }
 0x1b0   : > { %v1516_v16 = vmax.f32 %v1503_v23, 0.0  ;;  %v6198_v19 = vadd.f32 %v6197_v26, %v6196_v8  ;;  %v6199_v20 = vpop.f32.mrb[62].mxu1 }
 0x1b1   : > { %v6200_v24 = vpop.f32.mrb[63].mxu1 }
 0x1b2   : > { %v7771_v35 = vpack.c.bf16 %v1516_v16, %v1515_v15  ;;  %v1484_v25 = vmax.f32 %v7691_v4, %v6198_v19  ;;  %v6201_v38 = vadd.f32 %v6200_v24, %v6199_v20  ;;  %v6739_v4 = vld [vmem:[%s9656_s4 + $0x28] sm:$0xff]  }
 0x1b3   : > { %6243 = vmatpush3.bf16.msra.mxu0 %v6739_v4  ;;  %v6745_v4 = vld [vmem:[%s9656_s4 + $0x80] sm:$0xff]  }
 0x1b4   : > { %v1504_v27 = vadd.f32 %v7750_v10, %v1484_v25  ;;  %v1485_v28 = vmax.f32 %v7694_v9, %v6201_v38  ;;  %v7780_v32 = vshll.u32 %v7771_v35, 16  ;;  %v7790_v43 = vshrl.u32 %v7771_v35, 16  ;;  %6244 = vmatprep.subr.bf16.mxu0 %v6740_v40 }
 0x1b5   : > { %v1753_v52 = vrot.slane %v7771_v35, 6  ;;  %v1616_v3 = vrot.slane %v7771_v35, 1 }
 0x1b6   : > { %v1505_v33 = vadd.f32 %v7750_v10, %v1485_v28  ;;  %v6202_v47 = vpop.f32.mrb[64].mxu1  ;;  %v1517_v50 = vmax.f32 %v1504_v27, 0.0  ;;  %v1545_v59 = vrot.slane %v7780_v32, 1  ;;  %v1703_v57 = vrot.slane %v7790_v43, 5 }
 0x1b7   : > { %v6203_v36 = vpop.f32.mrb[65].mxu1  ;;  %6245 = vmatpush3.bf16.msra.mxu0 %v6741_v44  ;;  %v1704_v60 = vrot.slane %v7780_v32, 6  ;;  %v1783_v25 = vrot.slane %v7790_v43, 6  ;;  %v1784_v38 = vrot.slane %v7780_v32, 7  ;;  %v1644_v44 = vrot.slane %v7790_v43, 1 }
 0x1b8   : > { %v1518_v37 = vmax.f32 %v1505_v33, 0.0  ;;  %v6204_v39 = vadd.f32 %v6203_v36, %v6202_v47  ;;  %v6205_v9 = vpop.f32.mrb[66].mxu1  ;;  %v1546_v56 = vor.u32 %v1545_v59, %v7790_v43  ;;  %6246 = vmatprep.subr.bf16.mxu0 %v6742_v11  ;;  %v6744_v47 = vld [vmem:[%s9656_s4 + $0xc0] sm:$0xff]   ;;  %v6746_v43 = vld [vmem:[%s9656_s4 + $0xc8] sm:$0xff]  }
 0x1b9   : > { %v6206_v42 = vpop.f32.mrb[67].mxu1  ;;  %v1705_v24 = vor.u32 %v1704_v60, %v1703_v57  ;;  %6290 = vmatprep.subr.bf16.mxu1 %v6744_v47  ;;  %v1785_v11 = vor.u32 %v1784_v38, %v1783_v25  ;;  %v6751_v47 = vld [vmem:[%s9656_s4 + $0x98] sm:$0xff]  }
 0x1ba   : > { %v7796_v62 = vpack.c.bf16 %v1518_v37, %v1517_v50  ;;  %v1486_v49 = vmax.f32 %v7699_v17, %v6204_v39  ;;  %v6207_v51 = vadd.f32 %v6206_v42, %v6205_v9  ;;  %6291 = vmatpush3.bf16.msra.mxu1 %v6745_v4 }
 0x1bb   : > { %6292 = vmatprep.subr.bf16.mxu1 %v6746_v43 }
 0x1bc   : > { %v1506_v12 = vadd.f32 %v7750_v10, %v1486_v49  ;;  %v1487_v54 = vmax.f32 %v7702_v22, %v6207_v51  ;;  %v1754_v55 = vrot.slane %v7796_v62, 6  ;;  %v7808_v17 = vshll.u32 %v7796_v62, 16  ;;  %v6743_v22 = vld [vmem:[%s9656_s4 + $0x38] sm:$0xff]  }
 0x1bd   : > { %v7812_v21 = vshrl.u32 %v7796_v62, 16  ;;  %v1617_v0 = vrot.slane %v7796_v62, 1  ;;  %6247 = vmatpush3.bf16.msra.mxu0 %v6743_v22  ;;  %v1885_v36 = vrot.slane %v7796_v62, 3  ;;  %v1645_v49 = vrot.slane %v7780_v32, 2  ;;  %v6747_v32 = vld [vmem:[%s9656_s4 + $0x88] sm:$0xff]  }
 0x1be   : > { %v1507_v30 = vadd.f32 %v7750_v10, %v1487_v54  ;;  %v6208_v61 = vpop.f32.mrb[68].mxu1  ;;  %v1755_v14 = vsel %vm1752_vm0, %v1753_v52, %v1754_v55  ;;  %v1550_v63 = vrot.slane %v7808_v17, 1  ;;  %v1519_v5 = vmax.f32 %v1506_v12, 0.0  ;;  %6293 = vmatpush3.bf16.msra.mxu1 %v6747_v32 }
 0x1bf   : > { %v6209_v6 = vpop.f32.mrb[69].mxu1  ;;  %1768 = vrot.lane.b32.xlu1 %v1755_v14, %s9670_s26  ;;  %v1706_v7 = vrot.slane %v7812_v21, 5  ;;  %v1707_v23 = vrot.slane %v7808_v17, 6  ;;  %v1786_v8 = vrot.slane %v7812_v21, 6  ;;  %v1787_v19 = vrot.slane %v7808_v17, 7 }
 0x1c0   : > { %v1520_v26 = vmax.f32 %v1507_v30, 0.0  ;;  %v6210_v45 = vadd.f32 %v6209_v6, %v6208_v61  ;;  %v6211_v15 = vpop.f32.mrb[70].mxu1  ;;  %v1551_v16 = vsel %vm1539_vm2, %v1546_v56, %v1550_v63  ;;  %v1618_v33 = vsel %vm1615_vm1, %v1616_v3, %v1617_v0 }
 0x1c1   : > { %v6212_v20 = vpop.f32.mrb[71].mxu1  ;;  %1594 = vrot.lane.b32.xlu0 %v1551_v16, %s9678_s17  ;;  %v7834_v48 = vor.u32 %v1707_v23, %v1706_v7  ;;  %v7850_v50 = vor.u32 %v1787_v19, %v1786_v8  ;;  %v1647_v37 = vrot.slane %v7812_v21, 1  ;;  %v1646_v6 = vor.u32 %v1645_v49, %v1644_v44 }
 0x1c2   : > { %v7838_v27 = vpack.c.bf16 %v1520_v26, %v1519_v5  ;;  %v1488_v28 = vmax.f32 %v7707_v29, %v6210_v45  ;;  %v6213_v31 = vadd.f32 %v6212_v20, %v6211_v15  ;;  %v1648_v29 = vrot.slane %v7808_v17, 2  ;;  %v6748_v15 = vld [vmem:[%s9656_s4 + $0xd0] sm:$0xff]  }
 0x1c3   : > { %1629 = vrot.lane.b32.xlu1 %v1618_v33, %s9670_s26  ;;  %v1709_v40 = vsel %vm1702_vm3, %v1705_v24, %v7834_v48  ;;  %v1789_v61 = vsel %vm1782_vm5, %v1785_v11, %v7850_v50  ;;  %v1554_v20 = vor.u32 %v7812_v21, %v1550_v63  ;;  %6294 = vmatprep.subr.bf16.mxu1 %v6748_v15  ;;  %v6750_v33 = vld [vmem:[%s9656_s4 + $0xd8] sm:$0xff]   ;;  %v1913_v43 = vrot.slane %v7812_v21, 3 }
 0x1c4   : > { %v1508_v39 = vadd.f32 %v7750_v10, %v1488_v28  ;;  %v1489_v9 = vmax.f32 %v7710_v34, %v6213_v31  ;;  %v1886_v42 = vrot.slane %v7838_v27, 3  ;;  %v1619_v59 = vrot.slane %v7838_v27, 1 }
 0x1c5   : > { %1738 = vrot.lane.b32.xlu0 %v1709_v40, %s9678_s17  ;;  %v7864_v51 = vshrl.u32 %v7838_v27, 16  ;;  %v7871_v12 = vshll.u32 %v7838_v27, 16  ;;  %v7880_v56 = vor.u32 %v1648_v29, %v1647_v37  ;;  %v1970_v31 = vrot.slane %v7812_v21, 7 }
 0x1c6   : > { %v1509_v34 = vadd.f32 %v7750_v10, %v1489_v9  ;;  %v6214_v52 = vpop.f32.mrb[72].mxu1  ;;  %v1887_v3 = vsel %vm1884_vm4, %v1885_v36, %v1886_v42  ;;  %v1521_v57 = vmax.f32 %v1508_v39, 0.0  ;;  %v1620_v5 = vsel %vm1615_vm1, %v1617_v0, %v1619_v59  ;;  %v6749_v0 = vld [vmem:[%s9656_s4 + $0x90] sm:$0xff]  }
 0x1c7   : > { %v6215_v54 = vpop.f32.mrb[73].mxu1  ;;  %1898 = vrot.lane.b32.xlu1 %v1887_v3, %s9670_s26  ;;  %v1971_v7 = vrot.slane %v7864_v51, 7  ;;  %v1558_v45 = vrot.slane %v7871_v12, 1  ;;  %v1846_v25 = vrot.slane %v7864_v51, 2  ;;  %v1847_v38 = vrot.slane %v7871_v12, 3  ;;  %6295 = vmatpush3.bf16.msra.mxu1 %v6749_v0  ;;  %v6755_v0 = vld [vmem:[%s9656_s4 + $0xa8] sm:$0xff]  }
 0x1c8   : > { %v1522_v60 = vmax.f32 %v1509_v34, 0.0  ;;  %v6216_v22 = vadd.f32 %v6215_v54, %v6214_v52  ;;  %v6217_v30 = vpop.f32.mrb[74].mxu1  ;;  %v1756_v36 = vrot.slane %v7838_v27, 6  ;;  %v1843_v37 = vrot.slane %v7812_v21, 2  ;;  %6296 = vmatprep.subr.bf16.mxu1 %v6750_v33  ;;  %v6752_v54 = vld [vmem:[%s9656_s4 + $0xe0] sm:$0xff]  }
 0x1c9   : > { %v6218_v14 = vpop.f32.mrb[75].mxu1  ;;  %1814 = vrot.lane.b32.xlu0 %v1789_v61, %s9679_s25  ;;  %v1972_v24 = vor.u32 %v1971_v7, %v7871_v12  ;;  %v1559_v63 = vsel %vm1539_vm2, %v1554_v20, %v1558_v45  ;;  %v1710_v29 = vrot.slane %v7864_v51, 5  ;;  %v1711_v39 = vrot.slane %v7871_v12, 6 }
 0x1ca   : > { %v7889_v23 = vpack.c.bf16 %v1522_v60, %v1521_v57  ;;  %v1490_v8 = vmax.f32 %v7715_v41, %v6216_v22  ;;  %v6219_v26 = vadd.f32 %v6218_v14, %v6217_v30  ;;  %v1650_v41 = vsel %vm1643_vm6, %v1646_v6, %v7880_v56  ;;  %v6753_v57 = vld [vmem:[%s9656_s4 + $0xa0] sm:$0xff]  }
 0x1cb   : > { %1631 = vrot.lane.b32.xlu1 %v1620_v5, %s9670_s26  ;;  %v1844_v34 = vrot.slane %v7808_v17, 3  ;;  %v1973_v3 = vsel %vm1969_vm7, %v1970_v31, %v1972_v24  ;;  %v7933_v11 = vor.u32 %v1847_v38, %v1846_v25  ;;  %v1916_v32 = vrot.slane %v7864_v51, 3  ;;  %6297 = vmatpush3.bf16.msra.mxu1 %v6751_v47 }
 0x1cc   : > { %v1510_v16 = vadd.f32 %v7750_v10, %v1490_v8  ;;  %v1491_v19 = vmax.f32 %v7718_v46, %v6219_v26  ;;  %v1917_v61 = vrot.slane %v7871_v12, 4  ;;  %v7948_v21 = vor.u32 %v1711_v39, %v1710_v29  ;;  %6298 = vmatprep.subr.bf16.mxu1 %v6752_v54  ;;  %v6756_v39 = vld [vmem:[%s9656_s4 + $0xf0] sm:$0xff]  }
 0x1cd   : > { %1671 = vrot.lane.b32.xlu0 %v1650_v41, %s9679_s25  ;;  %v1914_v14 = vrot.slane %v7808_v17, 4  ;;  %v1790_v5 = vrot.slane %v7864_v51, 6  ;;  %v1791_v6 = vrot.slane %v7871_v12, 7  ;;  %v1845_v15 = vor.u32 %v1844_v34, %v1843_v37  ;;  %v6754_v17 = vld [vmem:[%s9656_s4 + $0xe8] sm:$0xff]  }
 0x1ce   : > { %v1511_v46 = vadd.f32 %v7750_v10, %v1491_v19  ;;  %v6220_v28 = vpop.f32.mrb[76].mxu1  ;;  %v1523_v9 = vmax.f32 %v1510_v16, 0.0  ;;  %v1713_v20 = vsel %vm1702_vm3, %v7834_v48, %v7948_v21  ;;  %v1651_v38 = vrot.slane %v7864_v51, 1 }
 0x1cf   : > { %v6221_v4 = vpop.f32.mrb[77].mxu1  ;;  %1596 = vrot.lane.b32.xlu1 %v1559_v63, %s9678_s17  ;;  %6299 = vmatpush3.bf16.msra.mxu1 %v6753_v57  ;;  %v1849_v19 = vsel %vm1842_vm8, %v1845_v15, %v7933_v11  ;;  %v1915_v24 = vor.u32 %v1914_v14, %v1913_v43  ;;  %v7976_v25 = vor.u32 %v1791_v6, %v1790_v5  ;;  %v1652_v31 = vrot.slane %v7871_v12, 2 }
 0x1d0   : > { %v1524_v40 = vmax.f32 %v1511_v46, 0.0  ;;  %v6222_v44 = vadd.f32 %v6221_v4, %v6220_v28  ;;  %v6223_v49 = vpop.f32.mrb[78].mxu1  ;;  %6300 = vmatprep.subr.bf16.mxu1 %v6754_v17  ;;  %v1888_v29 = vrot.slane %v7889_v23, 3  ;;  %v1621_v34 = vrot.slane %v7889_v23, 1 }
 0x1d1   : > { %v6224_v52 = vpop.f32.mrb[79].mxu1  ;;  %2004 = vrot.lane.b32.xlu0 %v7838_v27, %s9670_s26  ;;  %v1562_v57 = vor.u32 %v7864_v51, %v1558_v45 }
 0x1d2   : > { %v7943_v60 = vpack.c.bf16 %v1524_v40, %v1523_v9  ;;  %v1492_v22 = vmax.f32 %v7723_v53, %v6222_v44  ;;  %v6225_v30 = vadd.f32 %v6224_v52, %v6223_v49  ;;  %v1757_v53 = vsel %vm1752_vm0, %v1754_v55, %v1756_v36  ;;  %v6757_v9 = vld [vmem:[%s9656_s4 + $0xb0] sm:$0xff]  }
 0x1d3   : > { %1990 = vrot.lane.b32.xlu1 %v1973_v3, %s9678_s17  ;;  %v7970_v55 = vor.u32 %v1917_v61, %v1916_v32  ;;  %6301 = vmatpush3.bf16.msra.mxu1 %v6755_v0  ;;  %v1653_v44 = vor.u32 %v1652_v31, %v1651_v38  ;;  %v1889_v49 = vsel %vm1884_vm4, %v1886_v42, %v1888_v29  ;;  %v1564_v52 = vshll.u32 %v7889_v23, 16  ;;  %v6759_v3 = vld [vmem:[%s9656_s4 + $0xb8] sm:$0xff]  }
 0x1d4   : > { %v1512_v8 = vadd.f32 %v7750_v10, %v1492_v22  ;;  %v1493_v26 = vmax.f32 %v7726_v58, %v6225_v30  ;;  %6302 = vmatprep.subr.bf16.mxu1 %v6756_v39  ;;  %v1622_v43 = vsel %vm1615_vm1, %v1619_v59, %v1621_v34  ;;  %v1758_v22 = vrot.slane %v7889_v23, 6 }
 0x1d5   : > { %1770 = vrot.lane.b32.xlu0 %v1757_v53, %s9670_s26  ;;  %v1919_v37 = vsel %vm1912_vm9, %v1915_v24, %v7970_v55  ;;  %v1654_v42 = vsel %vm1643_vm6, %v7880_v56, %v1653_v44  ;;  %v1566_v32 = vrot.slane %v1564_v52, 1  ;;  %v1851_v59 = vrot.slane %v1564_v52, 3 }
 0x1d6   : > { %v1513_v58 = vadd.f32 %v7750_v10, %v1493_v26  ;;  %v6226_v16 = vpop.f32.mrb[80].mxu1  ;;  %v1525_v46 = vmax.f32 %v1512_v8, 0.0  ;;  %v1759_v14 = vsel %vm1752_vm0, %v1756_v36, %v1758_v22  ;;  %v1715_v45 = vrot.slane %v1564_v52, 6 }
 0x1d7   : > { %v6227_v41 = vpop.f32.mrb[81].mxu1  ;;  %1870 = vrot.lane.b32.xlu1 %v1849_v19, %s9678_s17  ;;  %6303 = vmatpush3.bf16.msra.mxu1 %v6757_v9  ;;  %v1567_v56 = vsel %vm1539_vm2, %v1562_v57, %v1566_v32  ;;  %v1921_v26 = vrot.slane %v1564_v52, 4  ;;  %v1795_v17 = vrot.slane %v1564_v52, 7  ;;  %v1623_v24 = vrot.slane %v7943_v60, 1 }
 0x1d8   : > { %v1526_v28 = vmax.f32 %v1513_v58, 0.0  ;;  %v6228_v63 = vadd.f32 %v6227_v41, %v6226_v16  ;;  %v6229_v33 = vpop.f32.mrb[82].mxu1  ;;  %v1656_v16 = vrot.slane %v1564_v52, 2  ;;  %v1890_v41 = vrot.slane %v7943_v60, 3 }
 0x1d9   : > { %1740 = vrot.lane.b32.xlu0 %v1713_v20, %s9678_s17  ;;  %v6230_v47 = vpop.f32.mrb[83].mxu1  ;;  %v1572_v38 = vshll.u32 %v7943_v60, 16  ;;  %v1760_v33 = vrot.slane %v7943_v60, 6 }
 0x1da   : > { %v7981_v4 = vpack.c.bf16 %v1526_v28, %v1525_v46  ;;  %v1494_v48 = vmax.f32 %v7739_v18, %v6228_v63  ;;  %v1793_v18 = vsel %vm1782_vm5, %v7850_v50, %v7976_v25  ;;  %v6758_v50 = vld [vmem:[%s9656_s4 + $0xf8] sm:$0xff]   ;;  %v8063_v46 = vshrl.u32 %v7943_v60, 16 }
 0x1db   : > { %1940 = vrot.lane.b32.xlu1 %v1919_v37, %s9679_s25  ;;  %6304 = vmatprep.subr.bf16.mxu1 %v6758_v50  ;;  %v1574_v28 = vrot.slane %v1572_v38, 1  ;;  %v1761_v39 = vsel %vm1752_vm0, %v1758_v22, %v1760_v33  ;;  %v1660_v22 = vrot.slane %v1572_v38, 2 }
 0x1dc   : > { %v7995_v40 = vadd.f32 %v7750_v10, %v1494_v48  ;;  %v8007_v10 = vshrl.u32 %v7889_v23, 16  ;;  %6305 = vmatpush3.bf16.msra.mxu1 %v6759_v3  ;;  %v1977_v63 = vrot.slane %v8063_v46, 7  ;;  %v1854_v37 = vrot.slane %v8063_v46, 2 }
 0x1dd   : > { %1816 = vrot.lane.b32.xlu0 %v1793_v18, %s9679_s25  ;;  %v1718_v9 = vrot.slane %v8063_v46, 5  ;;  %v1719_v18 = vrot.slane %v1572_v38, 6  ;;  %v1798_v50 = vrot.slane %v8063_v46, 6  ;;  %v1799_v3 = vrot.slane %v1572_v38, 7 }
 0x1de   : > { %v1974_v54 = vrot.slane %v8007_v10, 7  ;;  %v1850_v61 = vrot.slane %v8007_v10, 2  ;;  %v1714_v12 = vrot.slane %v8007_v10, 5  ;;  %v1920_v8 = vrot.slane %v8007_v10, 3 }
 0x1df   : > { %1900 = vrot.lane.b32.xlu1 %v1889_v49, %s9670_s26  ;;  %v1794_v15 = vrot.slane %v8007_v10, 6  ;;  %v1655_v58 = vrot.slane %v8007_v10, 1  ;;  %v1570_v31 = vor.u32 %v8007_v10, %v1566_v32  ;;  %v1978_v48 = vor.u32 %v1977_v63, %v1572_v38 }
 0x1e0   : > { %v1975_v30 = vor.u32 %v1974_v54, %v1564_v52  ;;  %v1852_v6 = vor.u32 %v1851_v59, %v1850_v61  ;;  %v1716_v53 = vor.u32 %v1715_v45, %v1714_v12  ;;  %v1922_v0 = vor.u32 %v1921_v26, %v1920_v8 }
 0x1e1   : > { %1673 = vrot.lane.b32.xlu0 %v1654_v42, %s9679_s25  ;;  %v1657_v20 = vor.u32 %v1656_v16, %v1655_v58  ;;  %v1575_v47 = vsel %vm1539_vm2, %v1570_v31, %v1574_v28  ;;  %v1925_v52 = vrot.slane %v1572_v38, 4  ;;  %v1720_v10 = vor.u32 %v1719_v18, %v1718_v9 }
 0x1e2   : > { %v1976_v5 = vsel %vm1969_vm7, %v1971_v7, %v1975_v30  ;;  %v1853_v36 = vsel %vm1842_vm8, %v7933_v11, %v1852_v6  ;;  %v1717_v51 = vsel %vm1702_vm3, %v7948_v21, %v1716_v53  ;;  %v1796_v7 = vor.u32 %v1795_v17, %v1794_v15 }
 0x1e3   : > { %1633 = vrot.lane.b32.xlu1 %v1622_v43, %s9670_s26  ;;  %v1923_v19 = vsel %vm1912_vm9, %v7970_v55, %v1922_v0  ;;  %v1891_v21 = vsel %vm1884_vm4, %v1888_v29, %v1890_v41  ;;  %v1658_v55 = vsel %vm1643_vm6, %v1653_v44, %v1657_v20  ;;  %v1855_v29 = vrot.slane %v1572_v38, 3 }
 0x1e4   : > { %v1797_v11 = vsel %vm1782_vm5, %v7976_v25, %v1796_v7  ;;  %v1624_v25 = vsel %vm1615_vm1, %v1621_v34, %v1623_v24  ;;  %v1979_v44 = vsel %vm1969_vm7, %v1974_v54, %v1978_v48  ;;  %v1924_v34 = vrot.slane %v8063_v46, 3 }
 0x1e5   : > { %2006 = vrot.lane.b32.xlu0 %v7889_v23, %s9670_s26  ;;  %v1856_v49 = vor.u32 %v1855_v29, %v1854_v37  ;;  %v1721_v32 = vsel %vm1702_vm3, %v1716_v53, %v1720_v10  ;;  %v1800_v54 = vor.u32 %v1799_v3, %v1798_v50  ;;  %v1659_v57 = vrot.slane %v8063_v46, 1 }
 0x1e6   : > { %v1926_v43 = vor.u32 %v1925_v52, %v1924_v34  ;;  %v1892_v30 = vrot.slane %v7981_v4, 3  ;;  %v1625_v12 = vrot.slane %v7981_v4, 1  ;;  %v8099_v45 = vshll.u32 %v7981_v4, 16 }
 0x1e7   : > { %1598 = vrot.lane.b32.xlu1 %v1567_v56, %s9678_s17  ;;  %v1857_v42 = vsel %vm1842_vm8, %v1852_v6, %v1856_v49  ;;  %v1801_v61 = vsel %vm1782_vm5, %v1796_v7, %v1800_v54  ;;  %v1661_v59 = vor.u32 %v1660_v22, %v1659_v57  ;;  %v1578_v15 = vor.u32 %v8063_v46, %v1574_v28 }
 0x1e8   : > { %v1626_v8 = vsel %vm1615_vm1, %v1623_v24, %v1625_v12  ;;  %v1582_v26 = vrot.slane %v8099_v45, 1  ;;  %v1762_v17 = vrot.slane %v7981_v4, 6  ;;  %v1859_v7 = vrot.slane %v8099_v45, 3 }
 0x1e9   : > { %1772 = vrot.lane.b32.xlu0 %v1759_v14, %s9670_s26  ;;  %v1893_v14 = vsel %vm1884_vm4, %v1890_v41, %v1892_v30  ;;  %v1662_v6 = vsel %vm1643_vm6, %v1657_v20, %v1661_v59  ;;  %v1527_v41 = vmax.f32 %v7995_v40, 0.0  ;;  %v1929_v24 = vrot.slane %v8099_v45, 4 }
 0x1ea   : > { %v1763_v58 = vsel %vm1752_vm0, %v1760_v33, %v1762_v17 }
 0x1eb   : > { %1992 = vrot.lane.b32.xlu1 %v1976_v5, %s9678_s17  ;;  %v8102_v5 = vshrl.u32 %v7981_v4, 16  ;;  %v1534_v40 = vpack.c.bf16 %v1527_v41, %v1527_v41 }
 0x1ed   : > { %2020 = vrot.lane.b32.xlu0 %v1567_v56, %s9679_s25  ;;  %v1927_v56 = vsel %vm1912_vm9, %v1922_v0, %v1926_v43  ;;  %v1980_v53 = vrot.slane %v8102_v5, 7  ;;  %v1722_v16 = vrot.slane %v8102_v5, 5  ;;  %v1802_v46 = vrot.slane %v8102_v5, 6 }
 0x1ee   : > { %v1663_v33 = vrot.slane %v8102_v5, 1  ;;  %v8153_v48 = vsel %vm1535_vm10, %v1534_v40, 0 }
 0x1ef   : > { %1872 = vrot.lane.b32.xlu1 %v1853_v36, %s9678_s17  ;;  %v1583_v36 = vsel %vm1539_vm2, %v1578_v15, %v1582_v26  ;;  %v1981_v0 = vor.u32 %v1980_v53, %v8099_v45  ;;  %v1627_v9 = vrot.slane %v8153_v48, 1  ;;  %v1894_v18 = vrot.slane %v8153_v48, 3 }
 0x1f0   : > { %v1764_v52 = vrot.slane %v8153_v48, 6 }
 0x1f1   : > { %1742 = vrot.lane.b32.xlu0 %v1717_v51, %s9678_s17  ;;  %v1858_v51 = vrot.slane %v8102_v5, 2  ;;  %v1895_v34 = vsel %vm1884_vm4, %v1892_v30, %v1894_v18  ;;  %v1628_v3 = vsel %vm1615_vm1, %v1625_v12, %v1627_v9  ;;  %v1591_v30 = vshrl.u32 %v8153_v48, 16 }
 0x1f2   : > { %v1586_v12 = vor.u32 %v8102_v5, %v1582_v26 }
 0x1f3   : > { %1942 = vrot.lane.b32.xlu1 %v1923_v19, %s9679_s25  ;;  %v1723_v19 = vrot.slane %v8099_v45, 6  ;;  %v8130_v20 = vor.u32 %v1859_v7, %v1858_v51 }
 0x1f5   : > { %1818 = vrot.lane.b32.xlu0 %v1797_v11, %s9679_s25  ;;  %v1982_v11 = vsel %vm1969_vm7, %v1977_v63, %v1981_v0  ;;  %v8135_v38 = vor.u32 %v1723_v19, %v1722_v16 }
 0x1f7   : > { %1902 = vrot.lane.b32.xlu1 %v1891_v21, %s9670_s26  ;;  %v1928_v21 = vrot.slane %v8102_v5, 3  ;;  %v1725_v63 = vsel %vm1702_vm3, %v1720_v10, %v8135_v38  ;;  %v8174_v10 = vpop.permute.xlu1 %2002 }
 0x1f9   : > { %1675 = vrot.lane.b32.xlu0 %v1658_v55, %s9679_s25  ;;  %v1803_v55 = vrot.slane %v8099_v45, 7  ;;  %v8142_v28 = vor.u32 %v1929_v24, %v1928_v21 }
 0x1fb   : > { %1635 = vrot.lane.b32.xlu1 %v1624_v25, %s9670_s26  ;;  %v1861_v25 = vsel %vm1842_vm8, %v1856_v49, %v8130_v20  ;;  %v8147_v31 = vor.u32 %v1803_v55, %v1802_v46  ;;  %v1931_v37 = vsel %vm1912_vm9, %v1926_v43, %v8142_v28  ;;  %v8185_v43 = vshll.u32 %v8153_v48, 16 }
 0x1fc   : > { %v1726_v46 = vrot.slane %v1591_v30, 5 }
 0x1fd   : > { %2008 = vrot.lane.b32.xlu0 %v7943_v60, %s9670_s26  ;;  %v1805_v29 = vsel %vm1782_vm5, %v1800_v54, %v8147_v31  ;;  %v8190_v54 = vrot.slane %v7178_v1, 6  ;;  %v1668_v26 = vrot.slane %v8185_v43, 2  ;;  %v1727_v55 = vrot.slane %v8185_v43, 6 }
 0x1ff   : > { %1600 = vrot.lane.b32.xlu1 %v1575_v47, %s9678_s17 }
 0x201   : > { %1774 = vrot.lane.b32.xlu0 %v1761_v39, %s9670_s26 }
 0x203   : > { %1994 = vrot.lane.b32.xlu1 %v1979_v44, %s9678_s17  ;;  %v8166_v44 = vpop.permute.xlu0 %2014 }
 0x205   : > { %2022 = vrot.lane.b32.xlu0 %v1575_v47, %s9679_s25  ;;  %v1664_v47 = vrot.slane %v8099_v45, 2  ;;  %v1667_v45 = vrot.slane %v1591_v30, 1 }
 0x207   : > { %1874 = vrot.lane.b32.xlu1 %v1857_v42, %s9678_s17  ;;  %v8160_v39 = vor.u32 %v1664_v47, %v1663_v33  ;;  %v8178_v50 = vpop.permute.xlu0 %2030  ;;  %v8182_v42 = vrot.slane %v7178_v1, 3  ;;  %v1669_v19 = vor.u32 %v1668_v26, %v1667_v45  ;;  %v1863_v33 = vrot.slane %v8185_v43, 3 }
 0x209   : > { %1744 = vrot.lane.b32.xlu0 %v1721_v32, %s9678_s17  ;;  %v1666_v49 = vsel %vm1643_vm6, %v1661_v59, %v8160_v39  ;;  %v1765_v32 = vsel %vm1752_vm0, %v1762_v17, %v1764_v52  ;;  %v1897_v22 = vsel %vm1884_vm4, %v1894_v18, %v8182_v42  ;;  %v1688_v59 = vrot.slane %v7796_v62, 5 }
 0x20a   : > { %v1983_v17 = vrot.slane %v1591_v30, 7  ;;  %v1806_v18 = vrot.slane %v1591_v30, 6 }
 0x20b   : > { %1944 = vrot.lane.b32.xlu1 %v1927_v56, %s9679_s25  ;;  %v1589_v56 = vrot.slane %v8185_v43, 1 }
 0x20d   : > { %1820 = vrot.lane.b32.xlu0 %v1801_v61, %s9679_s25  ;;  %v1590_v15 = vsel %vm1539_vm2, %v1586_v12, %v1589_v56 }
 0x20f   : > { %1904 = vrot.lane.b32.xlu1 %v1893_v14, %s9670_s26  ;;  %v1767_v14 = vsel %vm1752_vm0, %v1764_v52, %v8190_v54 }
 0x211   : > { %1677 = vrot.lane.b32.xlu0 %v1662_v6, %s9679_s25 }
 0x213   : > { %1637 = vrot.lane.b32.xlu1 %v1626_v8, %s9670_s26  ;;  %v1687_v8 = vrot.slane %v7771_v35, 5 }
 0x215   : > { %2010 = vrot.lane.b32.xlu0 %v7981_v4, %s9670_s26 }
 0x217   : > { %1602 = vrot.lane.b32.xlu1 %v1583_v36, %s9678_s17 }
 0x219   : > { %1776 = vrot.lane.b32.xlu0 %v1763_v58, %s9670_s26  ;;  %v1988_v58 = vsel %vm1969_vm7, %v1983_v17, %v7617_v2 }
 0x21b   : > { %1996 = vrot.lane.b32.xlu1 %v1982_v11, %s9678_s17  ;;  %v1593_v11 = vor.u32 %v1591_v30, %v1589_v56 }
 0x21d   : > { %2024 = vrot.lane.b32.xlu0 %v1583_v36, %s9679_s25  ;;  %v1689_v36 = vsel %vm1686_vm11, %v1687_v8, %v1688_v59 }
 0x21f   : > { %1876 = vrot.lane.b32.xlu1 %v1861_v25, %s9678_s17  ;;  %v1984_v25 = vor.u32 %v1983_v17, %v8185_v43 }
 0x221   : > { %1746 = vrot.lane.b32.xlu0 %v1725_v63, %s9678_s17  ;;  %v1862_v63 = vrot.slane %v1591_v30, 2  ;;  %v1985_v52 = vsel %vm1969_vm7, %v1980_v53, %v1984_v25  ;;  %v1812_v25 = vor.u32 %v7617_v2, %v8190_v54 }
 0x223   : > { %1946 = vrot.lane.b32.xlu1 %v1931_v37, %s9679_s25 }
 0x225   : > { %1822 = vrot.lane.b32.xlu0 %v1805_v29, %s9679_s25 }
 0x227   : > { %1641 = vrot.lane.b32.xlu1 %v1627_v9, %s9670_s26  ;;  %v1728_v9 = vor.u32 %v1727_v55, %v1726_v46 }
 0x229   : > { %1679 = vrot.lane.b32.xlu0 %v1666_v49, %s9679_s25  ;;  %v1807_v49 = vrot.slane %v8185_v43, 7  ;;  %v1729_v56 = vsel %vm1702_vm3, %v8135_v38, %v1728_v9 }
 0x22b   : > { %1906 = vrot.lane.b32.xlu1 %v1895_v34, %s9670_s26 }
 0x22d   : > { %2012 = vrot.lane.b32.xlu0 %v8153_v48, %s9670_s26 }
 0x22f   : > { %1639 = vrot.lane.b32.xlu1 %v1628_v3, %s9670_s26  ;;  %v1864_v3 = vor.u32 %v1863_v33, %v1862_v63  ;;  %v1956_v33 = vrot.slane %v7838_v27, 7 }
 0x231   : > { %v1769_v57 = vpop.permute.xlu1 %1768  ;;  %1778 = vrot.lane.b32.xlu0 %v1765_v32, %s9670_s26  ;;  %v1932_v32 = vrot.slane %v1591_v30, 3  ;;  %v1865_v5 = vsel %vm1842_vm8, %v8130_v20, %v1864_v3 }
 0x233   : > { %1908 = vrot.lane.b32.xlu1 %v1897_v22, %s9670_s26  ;;  %v1595_v61 = vpop.permute.xlu0 %1594 }
 0x234   : > { %v2036_v21 = vsel %vm2034_vm12, %v7771_v35, %v1595_v61  ;;  %v2017_v35 = vsel %vm1539_vm2, %v1593_v11, %v7630_v13  ;;  %v1808_v61 = vor.u32 %v1807_v49, %v1806_v18 }
 0x235   : > { %v1630_v6 = vpop.permute.xlu1 %1629  ;;  %1780 = vrot.lane.b32.xlu0 %v1767_v14, %s9670_s26 }
 0x236   : > { %v2051_v47 = vsel %vm2049_vm14, %v2036_v21, %v1630_v6  ;;  %v1809_v30 = vsel %vm1782_vm5, %v8147_v31, %v1808_v61  ;;  %v8251_v6 = vrot.slane %v7178_v1, 2 }
 0x237   : > { %1604 = vrot.lane.b32.xlu1 %v1590_v15, %s9678_s17  ;;  %v1739_v0 = vpop.permute.xlu0 %1738 }
 0x238   : > { %v2088_v51 = vsel %vm2034_vm12, %v1689_v36, %v1739_v0  ;;  %v8258_v20 = vor.u32 %v8182_v42, %v8251_v6 }
 0x239   : > { %v8213_v7 = vpop.permute.xlu1 %1898  ;;  %2026 = vrot.lane.b32.xlu0 %v1590_v15, %s9679_s25  ;;  %v2108_v41 = vsel %vm2049_vm14, %v2088_v51, %v1769_v57  ;;  %v1933_v57 = vrot.slane %v8185_v43, 4  ;;  %v1690_v43 = vrot.slane %v7838_v27, 5  ;;  %v1937_v15 = vrot.slane %v7178_v1, 4 }
 0x23a   : > { %v1869_v45 = vsel %vm1842_vm8, %v1864_v3, %v8258_v20  ;;  %v8275_v51 = vrot.slane %v7178_v1, 5 }
 0x23b   : > { %2000 = vrot.lane.b32.xlu1 %v1988_v58, %s9678_s17  ;;  %v1815_v16 = vpop.permute.xlu0 %1814  ;;  %v1934_v12 = vor.u32 %v1933_v57, %v1932_v32  ;;  %v1691_v31 = vsel %vm1686_vm11, %v1688_v59, %v1690_v43  ;;  %v1938_v26 = vor.u32 %v1937_v15, %v8182_v42 }
 0x23c   : > { %v2122_v24 = vsel %vm2064_vm13, %v2108_v41, %v1815_v16 }
 0x23d   : > { %v1632_v40 = vpop.permute.xlu1 %1631  ;;  %1683 = vrot.lane.b32.xlu0 %v1669_v19, %s9679_s25  ;;  %2548 = vmatprep.mubr.bf16.mxu0 %v2122_v24  ;;  %v1935_v8 = vsel %vm1912_vm9, %v8142_v28, %v1934_v12  ;;  %v1670_v28 = vsel %vm1643_vm6, %v8160_v39, %v1669_v19  ;;  %v8284_v19 = vor.u32 %v8190_v54, %v8275_v51  ;;  %vm1828_vm6 = vcmask 1045504  }
 0x23f   : > { %1606 = vrot.lane.b32.xlu1 %v1593_v11, %s9678_s17  ;;  %v1672_v37 = vpop.permute.xlu0 %1671  ;;  %v1939_v11 = vsel %vm1912_vm9, %v1934_v12, %v1938_v26  ;;  %v1737_v46 = vsel %vm1702_vm3, %v1728_v9, %v8284_v19  ;;  %v1829_v9 = vrot.slane %v7796_v62, 2 }
 0x240   : > { %v2066_v29 = vsel %vm2064_vm13, %v2051_v47, %v1672_v37  ;;  %v1813_v37 = vsel %vm1782_vm5, %v1808_v61, %v1812_v25 }
 0x241   : > { %v1597_v34 = vpop.permute.xlu1 %1596  ;;  %2028 = vrot.lane.b32.xlu0 %v2017_v35, %s9679_s25  ;;  %2549 = vmatmul.mubr.bf16.vlgmr.msra.gmra.mrb[28].mxu0 %v2066_v29  ;;  %v1955_v35 = vrot.slane %v7796_v62, 7 }
 0x242   : > { %v2038_v16 = vsel %vm2034_vm12, %v7796_v62, %v1597_v34  ;;  %v1692_v62 = vrot.slane %v7889_v23, 5 }
 0x243   : > { %1998 = vrot.lane.b32.xlu1 %v1985_v52, %s9678_s17  ;;  %v8239_v22 = vpop.permute.xlu0 %2004  ;;  %v2053_v24 = vsel %vm2049_vm14, %v2038_v16, %v1632_v40  ;;  %v1830_v40 = vrot.slane %v7838_v27, 2  ;;  %v1957_v18 = vsel %vm1954_vm15, %v1955_v35, %v1956_v33 }
 0x244   : > { %v1693_v12 = vsel %vm1686_vm11, %v1690_v43, %v1692_v62 }
 0x245   : > { %v1991_v14 = vpop.permute.xlu1 %1990  ;;  %1748 = vrot.lane.b32.xlu0 %v1729_v56, %s9678_s17  ;;  %v1831_v52 = vsel %vm1828_vm6, %v1829_v9, %v1830_v40 }
 0x246   : > { %v2200_v34 = vsel %vm2034_vm12, %v1957_v18, %v1991_v14 }
 0x247   : > { %1878 = vrot.lane.b32.xlu1 %v1865_v5, %s9678_s17  ;;  %v1771_v53 = vpop.permute.xlu0 %1770  ;;  %v2220_v56 = vsel %vm2049_vm14, %v2200_v34, %v8239_v22 }
 0x249   : > { %v1871_v38 = vpop.permute.xlu1 %1870  ;;  %1824 = vrot.lane.b32.xlu0 %v1809_v30, %s9679_s25 }
 0x24a   : > { %v2144_v3 = vsel %vm2034_vm12, %v1831_v52, %v1871_v38 }
 0x24b   : > { %1948 = vrot.lane.b32.xlu1 %v1935_v8, %s9679_s25  ;;  %v1741_v17 = vpop.permute.xlu0 %1740  ;;  %v2164_v61 = vsel %vm2049_vm14, %v2144_v3, %v8213_v7 }
 0x24c   : > { %v2091_v36 = vsel %vm2034_vm12, %v1691_v31, %v1741_v17 }
 0x24d   : > { %v1941_v0 = vpop.permute.xlu1 %1940  ;;  %1681 = vrot.lane.b32.xlu0 %v1670_v28, %s9679_s25  ;;  %v2110_v58 = vsel %vm2049_vm14, %v2091_v36, %v1771_v53 }
 0x24e   : > { %v2178_v14 = vsel %vm2064_vm13, %v2164_v61, %v1941_v0  ;;  %v1958_v0 = vrot.slane %v7889_v23, 7  ;;  %v1834_v61 = vrot.slane %v7943_v60, 2 }
 0x24f   : > { %1880 = vrot.lane.b32.xlu1 %v1869_v45, %s9678_s17  ;;  %v1817_v59 = vpop.permute.xlu0 %1816 }
 0x250   : > { %v2125_v39 = vsel %vm2064_vm13, %v2110_v58, %v1817_v59  ;;  %v1959_v58 = vsel %vm1954_vm15, %v1956_v33, %v1958_v0 }
 0x251   : > { %v8286_v41 = vpop.permute.xlu1 %1900  ;;  %1910 = vrot.lane.b32.xlu0 %v8182_v42, %s9670_s26  ;;  %2556 = vmatprep.mubr.bf16.mxu0 %v2125_v39  ;;  %s9680_s26 = smov 64  }
 0x253   : > { %1950 = vrot.lane.b32.xlu1 %v1939_v11, %s9679_s25  ;;  %v1674_v21 = vpop.permute.xlu0 %1673 }
 0x254   : > { %v2069_v55 = vsel %vm2064_vm13, %v2053_v24, %v1674_v21 }
 0x255   : > { %v1634_v63 = vpop.permute.xlu1 %1633  ;;  %1750 = vrot.lane.b32.xlu0 %v1737_v46, %s9678_s17  ;;  %2557 = vmatmul.mubr.bf16.gmra.mrb[32].mxu0 %v2069_v55  ;;  %v1694_v55 = vrot.slane %v7943_v60, 5 }
 0x257   : > { %1882 = vrot.lane.b32.xlu1 %v8258_v20, %s9678_s17  ;;  %v2007_v47 = vpop.permute.xlu0 %2006  ;;  %s5517_s17 = sshll.u32 %s650_s29, 4  ;;  %s9610_s17 = int_to_ptr.vmem [resolvable:$true] %s5517_s17 }
 0x258   : > { %p7121_p2 = scmp.lt.s32.totalorder %s9610_s17, %s7119_s2 }
 0x259   : > { %v1599_v29 = vpop.permute.xlu1 %1598  ;;  %1826 = vrot.lane.b32.xlu0 %v1813_v37, %s9679_s25 }
 0x25a   : > { %v2040_v7 = vsel %vm2034_vm12, %v7838_v27, %v1599_v29 }
 0x25b   : > { %2032 = vrot.lane.b32.xlu1 %v7630_v13, %s9679_s25  ;;  %v1773_v49 = vpop.permute.xlu0 %1772  ;;  %v2055_v36 = vsel %vm2049_vm14, %v2040_v7, %v1634_v63 }
 0x25d   : > { %v1993_v32 = vpop.permute.xlu1 %1992  ;;  %1952 = vrot.lane.b32.xlu0 %v1938_v26, %s9679_s25  ;;  %v1832_v26 = vrot.slane %v7889_v23, 2 }
 0x25e   : > { %v2203_v16 = vsel %vm2034_vm12, %v1959_v58, %v1993_v32 }
 0x25f   : > { %v2021_v57 = vpop.permute.xlu0 %2020  ;;  %v1833_v39 = vsel %vm1828_vm6, %v1830_v40, %v1832_v26  ;;  %v2222_v46 = vsel %vm2049_vm14, %v2203_v16, %v2007_v47  ;;  %v1695_v40 = vsel %vm1686_vm11, %v1692_v62, %v1694_v55 }
 0x260   : > { %v2233_v13 = vsel %vm2064_vm13, %v2220_v56, %v2021_v57  ;;  %v1960_v56 = vrot.slane %v7943_v60, 7 }
 0x261   : > { %v1873_v5 = vpop.permute.xlu1 %1872  ;;  %2636 = vmatprep.mubr.bf16.mxu1 %v2233_v13 }
 0x262   : > { %2637 = vmatmul.mubr.bf16.vlgmr.msra.gmra.mrb[84].mxu1 %v2178_v14  ;;  %v2147_v11 = vsel %vm2034_vm12, %v1833_v39, %v1873_v5  ;;  %v1961_v14 = vsel %vm1954_vm15, %v1958_v0, %v1960_v56 }
 0x263   : > { %v1743_v53 = vpop.permute.xlu0 %1742  ;;  %v2166_v63 = vsel %vm2049_vm14, %v2147_v11, %v8286_v41 }
 0x264   : > { %v2094_v30 = vsel %vm2034_vm12, %v1693_v12, %v1743_v53  ;;  %v1835_v12 = vsel %vm1828_vm6, %v1832_v26, %v1834_v61 }
 0x265   : > { %v1943_v22 = vpop.permute.xlu1 %1942  ;;  %v2112_v8 = vsel %vm2049_vm14, %v2094_v30, %v1773_v49 }
 0x266   : > { %v2181_v33 = vsel %vm2064_vm13, %v2166_v63, %v1943_v22  ;;  %v1836_v63 = vrot.slane %v7981_v4, 2 }
 0x267   : > { %v1819_v38 = vpop.permute.xlu0 %1818 }
 0x268   : > { %v2128_v15 = vsel %vm2064_vm13, %v2112_v8, %v1819_v38  ;;  %v1696_v8 = vrot.slane %v7981_v4, 5 }
 0x269   : > { %v1903_v31 = vpop.permute.xlu1 %1902  ;;  %2564 = vmatprep.mubr.bf16.mxu0 %v2128_v15 }
 0x26b   : > { %v1676_v17 = vpop.permute.xlu0 %1675 }
 0x26c   : > { %v2072_v28 = vsel %vm2064_vm13, %v2055_v36, %v1676_v17 }
 0x26d   : > { %v1636_v43 = vpop.permute.xlu1 %1635  ;;  %2565 = vmatmul.mubr.bf16.gmra.mrb[36].mxu0 %v2072_v28  ;;  %v1697_v28 = vsel %vm1686_vm11, %v1694_v55, %v1696_v8  ;;  %v1962_v55 = vrot.slane %v7981_v4, 7 }
 0x26f   : > { %v2009_v45 = vpop.permute.xlu0 %2008 }
 0x271   : > { %v1601_v59 = vpop.permute.xlu1 %1600 }
 0x272   : > { %v2042_v49 = vsel %vm2034_vm12, %v7889_v23, %v1601_v59 }
 0x273   : > { %v1775_v27 = vpop.permute.xlu0 %1774  ;;  %v2057_v3 = vsel %vm2049_vm14, %v2042_v49, %v1636_v43 }
 0x275   : > { %v1995_v21 = vpop.permute.xlu1 %1994 }
 0x276   : > { %v2206_v5 = vsel %vm2034_vm12, %v1961_v14, %v1995_v21 }
 0x277   : > { %v2023_v24 = vpop.permute.xlu0 %2022  ;;  %v2224_v38 = vsel %vm2049_vm14, %v2206_v5, %v2009_v45 }
 0x278   : > { %v2236_v25 = vsel %vm2064_vm13, %v2222_v46, %v2023_v24 }
 0x279   : > { %v1875_v37 = vpop.permute.xlu1 %1874  ;;  %2644 = vmatprep.mubr.bf16.mxu1 %v2236_v25 }
 0x27a   : > { %2645 = vmatmul.mubr.bf16.gmra.mrb[88].mxu1 %v2181_v33  ;;  %v2150_v53 = vsel %vm2034_vm12, %v1835_v12, %v1875_v37  ;;  %v1963_v37 = vsel %vm1954_vm15, %v1960_v56, %v1962_v55 }
 0x27b   : > { %v1745_v35 = vpop.permute.xlu0 %1744  ;;  %v2168_v15 = vsel %vm2049_vm14, %v2150_v53, %v1903_v31 }
 0x27c   : > { %v2097_v29 = vsel %vm2034_vm12, %v1695_v40, %v1745_v35  ;;  %v1837_v35 = vsel %vm1828_vm6, %v1834_v61, %v1836_v63 }
 0x27d   : > { %v1945_v9 = vpop.permute.xlu1 %1944  ;;  %v2114_v47 = vsel %vm2049_vm14, %v2097_v29, %v1775_v27 }
 0x27e   : > { %v2184_v36 = vsel %vm2064_vm13, %v2168_v15, %v1945_v9 }
 0x27f   : > { %v1821_v18 = vpop.permute.xlu0 %1820 }
 0x280   : > { %v2131_v34 = vsel %vm2064_vm13, %v2114_v47, %v1821_v18 }
 0x281   : > { %v1905_v41 = vpop.permute.xlu1 %1904  ;;  %2572 = vmatprep.mubr.bf16.mxu0 %v2131_v34 }
 0x283   : > { %v1678_v52 = vpop.permute.xlu0 %1677 }
 0x284   : > { %v2075_v32 = vsel %vm2064_vm13, %v2057_v3, %v1678_v52 }
 0x285   : > { %v1638_v57 = vpop.permute.xlu1 %1637  ;;  %2573 = vmatmul.mubr.bf16.gmra.mrb[40].mxu0 %v2075_v32 }
 0x287   : > { %v2011_v62 = vpop.permute.xlu0 %2010 }
 0x289   : > { %v1603_v13 = vpop.permute.xlu1 %1602 }
 0x28a   : > { %v2044_v58 = vsel %vm2034_vm12, %v7943_v60, %v1603_v13  ;;  %v1698_v13 = vrot.slane %v8153_v48, 5 }
 0x28b   : > { %v1777_v23 = vpop.permute.xlu0 %1776  ;;  %v2059_v39 = vsel %vm2049_vm14, %v2044_v58, %v1638_v57  ;;  %v1964_v57 = vrot.slane %v8153_v48, 7 }
 0x28d   : > { %v1997_v30 = vpop.permute.xlu1 %1996  ;;  %v1965_v14 = vsel %vm1954_vm15, %v1962_v55, %v1964_v57 }
 0x28e   : > { %v2209_v40 = vsel %vm2034_vm12, %v1963_v37, %v1997_v30  ;;  %v1967_v30 = vsel %vm1954_vm15, %v1964_v57, %v7617_v2 }
 0x28f   : > { %v2025_v22 = vpop.permute.xlu0 %2024  ;;  %v2226_v47 = vsel %vm2049_vm14, %v2209_v40, %v2011_v62  ;;  %v1838_v62 = vrot.slane %v8153_v48, 2 }
 0x290   : > { %v2239_v7 = vsel %vm2064_vm13, %v2224_v38, %v2025_v22 }
 0x291   : > { %v1877_v17 = vpop.permute.xlu1 %1876  ;;  %2652 = vmatprep.mubr.bf16.mxu1 %v2239_v7  ;;  %v1839_v15 = vsel %vm1828_vm6, %v1836_v63, %v1838_v62 }
 0x292   : > { %2653 = vmatmul.mubr.bf16.gmra.mrb[92].mxu1 %v2184_v36  ;;  %v2153_v29 = vsel %vm2034_vm12, %v1837_v35, %v1877_v17 }
 0x293   : > { %v1747_v43 = vpop.permute.xlu0 %1746  ;;  %v2170_v34 = vsel %vm2049_vm14, %v2153_v29, %v1905_v41  ;;  %v1699_v41 = vsel %vm1686_vm11, %v1696_v8, %v1698_v13 }
 0x294   : > { %v2100_v0 = vsel %vm2034_vm12, %v1697_v28, %v1747_v43 }
 0x295   : > { %v1947_v26 = vpop.permute.xlu1 %1946  ;;  %v2116_v45 = vsel %vm2049_vm14, %v2100_v0, %v1777_v23 }
 0x296   : > { %v2187_v3 = vsel %vm2064_vm13, %v2170_v34, %v1947_v26 }
 0x297   : > { %v1823_v59 = vpop.permute.xlu0 %1822 }
 0x298   : > { %v2134_v27 = vsel %vm2064_vm13, %v2116_v45, %v1823_v59 }
 0x299   : > { %v8368_v31 = vpop.permute.xlu1 %1641  ;;  %2580 = vmatprep.mubr.bf16.mxu0 %v2134_v27 }
 0x29b   : > { %v1680_v16 = vpop.permute.xlu0 %1679 }
 0x29c   : > { %v2078_v11 = vsel %vm2064_vm13, %v2059_v39, %v1680_v16 }
 0x29d   : > { %v1907_v21 = vpop.permute.xlu1 %1906  ;;  %2581 = vmatmul.mubr.bf16.gmra.mrb[44].mxu0 %v2078_v11  ;;  %v1841_v11 = vsel %vm1828_vm6, %v1838_v62, %v8251_v6 }
 0x29f   : > { %v2013_v24 = vpop.permute.xlu0 %2012 }
 0x2a1   : > { %v1640_v46 = vpop.permute.xlu1 %1639 }
 0x2a3   : > { %v1779_v25 = vpop.permute.xlu0 %1778 }
 0x2a5   : > { %v1909_v60 = vpop.permute.xlu1 %1908 }
 0x2a7   : > { %v8375_v33 = vpop.permute.xlu0 %1780 }
 0x2a9   : > { %v1605_v9 = vpop.permute.xlu1 %1604 }
 0x2aa   : > { %v2046_v43 = vsel %vm2034_vm12, %v7981_v4, %v1605_v9  ;;  %v2218_v9 = vsel %vm2034_vm12, %v7617_v2, %v8174_v10 }
 0x2ab   : > { %v2027_v18 = vpop.permute.xlu0 %2026  ;;  %v2061_v39 = vsel %vm2049_vm14, %v2046_v43, %v1640_v46  ;;  %v1701_v46 = vsel %vm1686_vm11, %v1698_v13, %v8275_v51  ;;  %v2231_v34 = vsel %vm2049_vm14, %v2218_v9, %v8166_v44 }
 0x2ac   : > { %v2242_v49 = vsel %vm2064_vm13, %v2226_v47, %v2027_v18 }
 0x2ad   : > { %v2001_v52 = vpop.permute.xlu1 %2000  ;;  %2660 = vmatprep.mubr.bf16.mxu1 %v2242_v49 }
 0x2ae   : > { %2661 = vmatmul.mubr.bf16.gmra.mrb[96].mxu1 %v2187_v3  ;;  %v2215_v7 = vsel %vm2034_vm12, %v1967_v30, %v2001_v52  ;;  %v6761_v30 = vld [vmem:[%s9658_s6] sm:$0xff]  }
 0x2af   : > { %v1684_v32 = vpop.permute.xlu0 %1683  ;;  %v2230_v26 = vsel %vm2049_vm14, %v2215_v7, %v8166_v44 }
 0x2b0   : > { %v2248_v16 = vsel %vm2064_vm13, %v2230_v26, %v8178_v50 }
 0x2b1   : > { %v1607_v56 = vpop.permute.xlu1 %1606 }
 0x2b2   : > { %v2048_v50 = vsel %vm2034_vm12, %v8153_v48, %v1607_v56 }
 0x2b3   : > { %v2029_v61 = vpop.permute.xlu0 %2028 }
 0x2b5   : > { %v1999_v23 = vpop.permute.xlu1 %1998 }
 0x2b6   : > { %v2212_v5 = vsel %vm2034_vm12, %v1965_v14, %v1999_v23 }
 0x2b7   : > { %v1749_v12 = vpop.permute.xlu0 %1748  ;;  %v2228_v53 = vsel %vm2049_vm14, %v2212_v5, %v2013_v24 }
 0x2b8   : > { %v2103_v22 = vsel %vm2034_vm12, %v1699_v41, %v1749_v12  ;;  %v2245_v38 = vsel %vm2064_vm13, %v2228_v53, %v2029_v61  ;;  %v6760_v53 = vld [vmem:[%s9658_s6 + $0x40] sm:$0xff]  }
 0x2b9   : > { %v1879_v17 = vpop.permute.xlu1 %1878  ;;  %2668 = vmatprep.mubr.bf16.mxu1 %v2245_v38  ;;  %v2118_v8 = vsel %vm2049_vm14, %v2103_v22, %v1779_v25  ;;  %6348 = vmatprep.subr.bf16.mxu0 %v6760_v53  ;;  %v8447_v22 = vld [vmem:[%s9657_s5] ss:$0 sm:$0xff]  ;;  %v6762_v38 = vld [vmem:[%s9658_s6 + $0x48] sm:$0xff]  }
 0x2ba   : > { %v2156_v36 = vsel %vm2034_vm12, %v1839_v15, %v1879_v17  ;;  %6349 = vmatpush3.bf16.msra.mxu0 %v6761_v30  ;;  %v6763_v17 = vld [vmem:[%s9658_s6 + $0x8] sm:$0xff]  }
 0x2bb   : > { %v1825_v28 = vpop.permute.xlu0 %1824  ;;  %v2172_v45 = vsel %vm2049_vm14, %v2156_v36, %v1907_v21  ;;  %6350 = vmatprep.subr.bf16.mxu0 %v6762_v38 }
 0x2bc   : > { %v2137_v0 = vsel %vm2064_vm13, %v2118_v8, %v1825_v28 }
 0x2bd   : > { %v1949_v59 = vpop.permute.xlu1 %1948  ;;  %2588 = vmatprep.mubr.bf16.mxu0 %v2137_v0  ;;  %v6764_v0 = vld [vmem:[%s9658_s6 + $0x50] sm:$0xff]  }
 0x2be   : > { %v2190_v58 = vsel %vm2064_vm13, %v2172_v45, %v1949_v59  ;;  %6351 = vmatpush3.bf16.msra.mxu0 %v6763_v17 }
 0x2bf   : > { %2669 = vmatmul.mubr.bf16.gmra.mrb[100].mxu1 %v2190_v58  ;;  %v1682_v27 = vpop.permute.xlu0 %1681  ;;  %6352 = vmatprep.subr.bf16.mxu0 %v6764_v0  ;;  %v6765_v58 = vld [vmem:[%s9658_s6 + $0x10] sm:$0xff]  }
 0x2c0   : > { %2676 = vmatprep.mubr.bf16.mxu1 %v2248_v16  ;;  %v2081_v4 = vsel %vm2064_vm13, %v2061_v39, %v1682_v27  ;;  %v6766_v16 = vld [vmem:[%s9658_s6 + $0x58] sm:$0xff]  }
 0x2c1   : > { %v1881_v24 = vpop.permute.xlu1 %1880  ;;  %2589 = vmatmul.mubr.bf16.gmra.mrb[48].mxu0 %v2081_v4 }
 0x2c2   : > { %v2159_v55 = vsel %vm2034_vm12, %v1841_v11, %v1881_v24  ;;  %6353 = vmatpush3.bf16.msra.mxu0 %v6765_v58  ;;  %v6767_v11 = vld [vmem:[%s9658_s6 + $0x18] sm:$0xff]  }
 0x2c3   : > { %v1911_v21 = vpop.permute.xlu0 %1910  ;;  %v2174_v63 = vsel %vm2049_vm14, %v2159_v55, %v1909_v60  ;;  %v2063_v60 = vsel %vm2049_vm14, %v2048_v50, %v8368_v31  ;;  %6354 = vmatprep.subr.bf16.mxu0 %v6766_v16 }
 0x2c4   : > { %v2084_v3 = vsel %vm2064_vm13, %v2063_v60, %v1684_v32 }
 0x2c5   : > { %v1951_v25 = vpop.permute.xlu1 %1950 }
 0x2c6   : > { %v2193_v37 = vsel %vm2064_vm13, %v2174_v63, %v1951_v25  ;;  %6355 = vmatpush3.bf16.msra.mxu0 %v6767_v11 }
 0x2c7   : > { %2677 = vmatmul.mubr.bf16.gmra.mrb[104].mxu1 %v2193_v37  ;;  %v1751_v40 = vpop.permute.xlu0 %1750 }
 0x2c8   : > { %v2106_v35 = vsel %vm2034_vm12, %v1701_v46, %v1751_v40  ;;  %v6769_v40 = vld [vmem:[%s9658_s6 + $0x20] sm:$0xff]  }
 0x2c9   : > { %v1883_v29 = vpop.permute.xlu1 %1882  ;;  %v2120_v47 = vsel %vm2049_vm14, %v2106_v35, %v8375_v33 }
 0x2ca   : > { %v2162_v48 = vsel %vm2034_vm12, %v8251_v6, %v1883_v29 }
 0x2cb   : > { %v1827_v18 = vpop.permute.xlu0 %1826  ;;  %v2176_v31 = vsel %vm2049_vm14, %v2162_v48, %v1911_v21  ;;  %v6768_v21 = vld [vmem:[%s9658_s6 + $0x60] sm:$0xff]   ;;  %v6771_v48 = vld [vmem:[%s9658_s6 + $0x28] sm:$0xff]  }
 0x2cc   : > { %v2140_v49 = vsel %vm2064_vm13, %v2120_v47, %v1827_v18  ;;  %6356 = vmatprep.subr.bf16.mxu0 %v6768_v21  ;;  %v6770_v18 = vld [vmem:[%s9658_s6 + $0x68] sm:$0xff]  }
 0x2cd   : > { %v2033_v52 = vpop.permute.xlu1 %2032  ;;  %2596 = vmatprep.mubr.bf16.mxu0 %v2140_v49  ;;  %6357 = vmatpush3.bf16.msra.mxu0 %v6769_v40  ;;  %v6772_v49 = vld [vmem:[%s9658_s6 + $0x70] sm:$0xff]  }
 0x2ce   : > { %2597 = vmatmul.mubr.bf16.gmra.mrb[52].mxu0 %v2084_v3  ;;  %v2251_v2 = vsel %vm2064_vm13, %v2231_v34, %v2033_v52  ;;  %6358 = vmatprep.subr.bf16.mxu0 %v6770_v18  ;;  %v6773_v34 = vld [vmem:[%s9658_s6 + $0x30] sm:$0xff]   ;;  %v6774_v52 = vld [vmem:[%s9658_s6 + $0x78] sm:$0xff]  }
 0x2cf   : > { %2684 = vmatprep.mubr.bf16.mxu1 %v2251_v2  ;;  %v1953_v10 = vpop.permute.xlu0 %1952 }
 0x2d0   : > { %v2196_v33 = vsel %vm2064_vm13, %v2176_v31, %v1953_v10  ;;  %v6775_v10 = vld [vmem:[%s9658_s6 + $0x38] sm:$0xff]  }
 0x2d1   : > { %2685 = vmatmul.mubr.bf16.gmra.mrb[108].mxu1 %v2196_v33  ;;  %6359 = vmatpush3.bf16.msra.mxu0 %v6771_v48 }
 0x2d2   : > { %6360 = vmatprep.subr.bf16.mxu0 %v6772_v49 }
 0x2d5   : > { %6361 = vmatpush3.bf16.msra.mxu0 %v6773_v34 }
 0x2d6   : > { %6362 = vmatprep.subr.bf16.mxu0 %v6774_v52 }
 0x2d9   : > { %6363 = vmatpush3.bf16.msra.mxu0 %v6775_v10 }
 0x314   : > { %v6248_v57 = vpop.f32.mrb[28].mxu0 }
 0x315   : > { %v6249_v56 = vpop.f32.mrb[29].mxu0 }
 0x316   : > { %v6250_v61 = vadd.f32 %v6249_v56, %v6248_v57  ;;  %v6251_v13 = vpop.f32.mrb[30].mxu0 }
 0x317   : > { %v6252_v14 = vpop.f32.mrb[31].mxu0 }
 0x318   : > { %v6253_v44 = vadd.f32 %v6252_v14, %v6251_v13  ;;  %v2551_v36 = vadd.f32 %v6250_v61, %v8447_v22 }
 0x31a   : > { %v2554_v26 = vadd.f32 %v6253_v44, %v8447_v22 }
 0x328   : > { %v6254_v23 = vpop.f32.mrb[32].mxu0 }
 0x329   : > { %v6255_v62 = vpop.f32.mrb[33].mxu0 }
 0x32a   : > { %v6256_v5 = vadd.f32 %v6255_v62, %v6254_v23  ;;  %v6257_v32 = vpop.f32.mrb[34].mxu0 }
 0x32b   : > { %v6258_v41 = vpop.f32.mrb[35].mxu0 }
 0x32c   : > { %v8436_v12 = vadd.f32 %v6258_v41, %v6257_v32  ;;  %v2559_v31 = vadd.f32 %v6256_v5, %v8447_v22 }
 0x32e   : > { %v2562_v61 = vadd.f32 %v8436_v12, %v8447_v22 }
 0x335   : > { %v6306_v7 = vpop.f32.mrb[84].mxu1 }
 0x336   : > { %v6307_v15 = vpop.f32.mrb[85].mxu1 }
 0x337   : > { %v6308_v28 = vadd.f32 %v6307_v15, %v6306_v7  ;;  %v6309_v8 = vpop.f32.mrb[86].mxu1 }
 0x338   : > { %v6310_v43 = vpop.f32.mrb[87].mxu1 }
 0x339   : > { %v2639_v59 = vadd.f32 %v6308_v28, %v2551_v36  ;;  %v6311_v45 = vadd.f32 %v6310_v43, %v6309_v8 }
 0x33b   : > { %v2642_v27 = vadd.f32 %v6311_v45, %v2554_v26  ;;  %v2692_v39 = vmax.f32 %v2639_v59, 0.0 }
 0x33d   : > { %v2693_v4 = vmax.f32 %v2642_v27, 0.0 }
 0x33f   : > { %v8469_v24 = vpack.c.bf16 %v2693_v4, %v2692_v39 }
 0x340   : > { %v6260_v55 = vpop.f32.mrb[36].mxu0 }
 0x341   : > { %v6261_v25 = vpop.f32.mrb[37].mxu0  ;;  %v2715_v63 = vshrl.u32 %v8469_v24, 16  ;;  %v2717_v37 = vshll.u32 %v8469_v24, 16  ;;  %v2802_v38 = vrot.slane %v8469_v24, 5 }
 0x342   : > { %v6262_v50 = vadd.f32 %v6261_v25, %v6260_v55  ;;  %v6263_v46 = vpop.f32.mrb[38].mxu0 }
 0x343   : > { %v6264_v35 = vpop.f32.mrb[39].mxu0  ;;  %v2830_v29 = vrot.slane %v2715_v63, 5  ;;  %v2831_v9 = vrot.slane %v2717_v37, 6  ;;  %v2719_v32 = vrot.slane %v2717_v37, 1 }
 0x344   : > { %v6265_v60 = vadd.f32 %v6264_v35, %v6263_v46  ;;  %v2567_v21 = vadd.f32 %v6262_v50, %v8447_v22 }
 0x345   : > { %v2832_v47 = vor.u32 %v2831_v9, %v2830_v29  ;;  %v2720_v36 = vor.u32 %v2719_v32, %v2715_v63  ;;  %v6776_v29 = vld [vmem:[%s9658_s6 + $0xc0] sm:$0xff]  }
 0x346   : > { %v2570_v46 = vadd.f32 %v6265_v60, %v8447_v22  ;;  %v6777_v9 = vld [vmem:[%s9658_s6 + $0x80] sm:$0xff]   ;;  %6406 = vmatprep.subr.bf16.mxu1 %v6776_v29 }
 0x347   : > { %6407 = vmatpush3.bf16.msra.mxu1 %v6777_v9 }
 0x34d   : > { %v6312_v3 = vpop.f32.mrb[88].mxu1 }
 0x34e   : > { %v6313_v2 = vpop.f32.mrb[89].mxu1 }
 0x34f   : > { %v6314_v33 = vadd.f32 %v6313_v2, %v6312_v3  ;;  %v6315_v57 = vpop.f32.mrb[90].mxu1 }
 0x350   : > { %v6316_v56 = vpop.f32.mrb[91].mxu1 }
 0x351   : > { %v2647_v13 = vadd.f32 %v6314_v33, %v2559_v31  ;;  %v6317_v14 = vadd.f32 %v6316_v56, %v6315_v57 }
 0x353   : > { %v2650_v44 = vadd.f32 %v6317_v14, %v2562_v61  ;;  %v2694_v23 = vmax.f32 %v2647_v13, 0.0 }
 0x355   : > { %v2695_v62 = vmax.f32 %v2650_v44, 0.0 }
 0x357   : > { %v8500_v41 = vpack.c.bf16 %v2695_v62, %v2694_v23 }
 0x358   : > { %v6266_v53 = vpop.f32.mrb[40].mxu0 }
 0x359   : > { %v6267_v30 = vpop.f32.mrb[41].mxu0  ;;  %v2803_v5 = vrot.slane %v8500_v41, 5  ;;  %v2722_v7 = vshll.u32 %v8500_v41, 16  ;;  %v2726_v15 = vshrl.u32 %v8500_v41, 16 }
 0x35a   : > { %v6268_v17 = vadd.f32 %v6267_v30, %v6266_v53  ;;  %v6269_v12 = vpop.f32.mrb[42].mxu0 }
 0x35b   : > { %v6270_v28 = vpop.f32.mrb[43].mxu0  ;;  %v2804_v8 = vsel %vm1686_vm11, %v2802_v38, %v2803_v5  ;;  %v2724_v43 = vrot.slane %v2722_v7, 1  ;;  %v2898_v0 = vrot.slane %v2726_v15, 2  ;;  %v2899_v26 = vrot.slane %v2722_v7, 3 }
 0x35c   : > { %v6271_v59 = vadd.f32 %v6270_v28, %v6269_v12  ;;  %2816 = vrot.lane.b32.xlu1 %v2804_v8, %s9680_s26  ;;  %v2833_v27 = vrot.slane %v2726_v15, 5  ;;  %v2834_v16 = vrot.slane %v2722_v7, 6 }
 0x35d   : > { %v2725_v45 = vsel %vm1539_vm2, %v2720_v36, %v2724_v43  ;;  %v2900_v58 = vor.u32 %v2899_v26, %v2898_v0  ;;  %v2728_v31 = vor.u32 %v2726_v15, %v2724_v43  ;;  %v2575_v15 = vadd.f32 %v6268_v17, %v8447_v22  ;;  %v6779_v26 = vld [vmem:[%s9658_s6 + $0xc8] sm:$0xff]   ;;  %v6781_v17 = vld [vmem:[%s9658_s6 + $0xd0] sm:$0xff]  }
 0x35e   : > { %2768 = vrot.lane.b32.xlu0 %v2725_v45, %s9680_s26  ;;  %v2835_v39 = vor.u32 %v2834_v16, %v2833_v27  ;;  %v2578_v8 = vadd.f32 %v6271_v59, %v8447_v22  ;;  %v6780_v45 = vld [vmem:[%s9658_s6 + $0x88] sm:$0xff]   ;;  %v7182_v27 = vmov 0.0   ;;  %6408 = vmatprep.subr.bf16.mxu1 %v6779_v26  ;;  %v6787_v26 = vld [vmem:[%s9658_s6 + $0xa0] sm:$0xff]  }
 0x35f   : > { %6506 = vmatprep.subr.bf16.mxu0 %v7182_v27  ;;  %6409 = vmatpush3.bf16.msra.mxu1 %v6780_v45 }
 0x360   : > { %v8511_v4 = vsel %vm1702_vm3, %v2832_v47, %v2835_v39  ;;  %6410 = vmatprep.subr.bf16.mxu1 %v6781_v17 }
 0x365   : > { %v6318_v11 = vpop.f32.mrb[92].mxu1 }
 0x366   : > { %v6319_v55 = vpop.f32.mrb[93].mxu1 }
 0x367   : > { %v6320_v25 = vadd.f32 %v6319_v55, %v6318_v11  ;;  %v6321_v63 = vpop.f32.mrb[94].mxu1 }
 0x368   : > { %v6322_v37 = vpop.f32.mrb[95].mxu1 }
 0x369   : > { %v2655_v40 = vadd.f32 %v6320_v25, %v2567_v21  ;;  %v6323_v35 = vadd.f32 %v6322_v37, %v6321_v63 }
 0x36b   : > { %v2658_v18 = vadd.f32 %v6323_v35, %v2570_v46  ;;  %v2696_v47 = vmax.f32 %v2655_v40, 0.0 }
 0x36d   : > { %v2697_v48 = vmax.f32 %v2658_v18, 0.0 }
 0x36f   : > { %v8521_v50 = vpack.c.bf16 %v2697_v48, %v2696_v47 }
 0x370   : > { %v6272_v49 = vpop.f32.mrb[44].mxu0 }
 0x371   : > { %v6273_v34 = vpop.f32.mrb[45].mxu0  ;;  %v2805_v60 = vrot.slane %v8521_v50, 5  ;;  %v2730_v52 = vshll.u32 %v8521_v50, 16  ;;  %v2734_v3 = vshrl.u32 %v8521_v50, 16 }
 0x372   : > { %v6274_v2 = vadd.f32 %v6273_v34, %v6272_v49  ;;  %v6275_v10 = vpop.f32.mrb[46].mxu0 }
 0x373   : > { %v6276_v33 = vpop.f32.mrb[47].mxu0  ;;  %v2806_v57 = vsel %vm1686_vm11, %v2803_v5, %v2805_v60  ;;  %v2732_v56 = vrot.slane %v2730_v52, 1  ;;  %v2901_v61 = vrot.slane %v2734_v3, 2  ;;  %v2902_v13 = vrot.slane %v2730_v52, 3 }
 0x374   : > { %v6277_v14 = vadd.f32 %v6276_v33, %v6275_v10  ;;  %2818 = vrot.lane.b32.xlu1 %v2806_v57, %s9680_s26  ;;  %v2837_v62 = vrot.slane %v2734_v3, 5  ;;  %v2838_v32 = vrot.slane %v2730_v52, 6  ;;  %v2583_v48 = vadd.f32 %v6274_v2, %v8447_v22  ;;  %v6784_v10 = vld [vmem:[%s9658_s6 + $0xd8] sm:$0xff]  }
 0x375   : > { %v2733_v44 = vsel %vm1539_vm2, %v2728_v31, %v2732_v56  ;;  %v8529_v23 = vor.u32 %v2902_v13, %v2901_v61  ;;  %v2736_v37 = vor.u32 %v2734_v3, %v2732_v56 }
 0x376   : > { %2770 = vrot.lane.b32.xlu0 %v2733_v44, %s9680_s26  ;;  %v2839_v30 = vor.u32 %v2838_v32, %v2837_v62  ;;  %v2586_v33 = vadd.f32 %v6277_v14, %v8447_v22  ;;  %v6785_v44 = vld [vmem:[%s9658_s6 + $0x98] sm:$0xff]  }
 0x377   : > { %v8534_v53 = vsel %vm1842_vm8, %v2900_v58, %v8529_v23 }
 0x378   : > { %v8537_v38 = vsel %vm1702_vm3, %v2835_v39, %v2839_v30  ;;  %v6782_v39 = vld [vmem:[%s9658_s6 + $0x90] sm:$0xff]  }
 0x379   : > { %6411 = vmatpush3.bf16.msra.mxu1 %v6782_v39  ;;  %v6789_v39 = vld [vmem:[%s9658_s6 + $0xe8] sm:$0xff]  }
 0x37a   : > { %6412 = vmatprep.subr.bf16.mxu1 %v6784_v10 }
 0x37d   : > { %6413 = vmatpush3.bf16.msra.mxu1 %v6785_v44 }
 0x381   : > { %v6324_v5 = vpop.f32.mrb[96].mxu1 }
 0x382   : > { %v6325_v7 = vpop.f32.mrb[97].mxu1 }
 0x383   : > { %v6326_v12 = vadd.f32 %v6325_v7, %v6324_v5  ;;  %v6327_v36 = vpop.f32.mrb[98].mxu1 }
 0x384   : > { %v6328_v28 = vpop.f32.mrb[99].mxu1 }
 0x385   : > { %v2663_v43 = vadd.f32 %v6326_v12, %v2575_v15  ;;  %v6329_v0 = vadd.f32 %v6328_v28, %v6327_v36 }
 0x387   : > { %v2666_v58 = vadd.f32 %v6329_v0, %v2578_v8  ;;  %v2698_v59 = vmax.f32 %v2663_v43, 0.0  ;;  %v6786_v0 = vld [vmem:[%s9658_s6 + $0xe0] sm:$0xff]  }
 0x388   : > { %6414 = vmatprep.subr.bf16.mxu1 %v6786_v0 }
 0x389   : > { %v2699_v16 = vmax.f32 %v2666_v58, 0.0  ;;  %6415 = vmatpush3.bf16.msra.mxu1 %v6787_v26 }
 0x38a   : > { %6416 = vmatprep.subr.bf16.mxu1 %v6789_v39 }
 0x38b   : > { %v8554_v11 = vpack.c.bf16 %v2699_v16, %v2698_v59 }
 0x38d   : > { %v2807_v55 = vrot.slane %v8554_v11, 5  ;;  %v8558_v21 = vshll.u32 %v8554_v11, 16  ;;  %v8561_v25 = vshrl.u32 %v8554_v11, 16 }
 0x38f   : > { %v2808_v63 = vsel %vm1686_vm11, %v2805_v60, %v2807_v55  ;;  %v2740_v46 = vrot.slane %v8558_v21, 1  ;;  %v2841_v40 = vrot.slane %v8561_v25, 5  ;;  %v2842_v29 = vrot.slane %v8558_v21, 6 }
 0x390   : > { %2820 = vrot.lane.b32.xlu1 %v2808_v63, %s9680_s26 }
 0x391   : > { %v2741_v35 = vsel %vm1539_vm2, %v2736_v37, %v2740_v46  ;;  %v8570_v47 = vor.u32 %v2842_v29, %v2841_v40  ;;  %v2744_v40 = vor.u32 %v8561_v25, %v2740_v46 }
 0x392   : > { %2772 = vrot.lane.b32.xlu0 %v2741_v35, %s9680_s26  ;;  %v6330_v9 = vpop.f32.mrb[100].mxu1 }
 0x393   : > { %v6331_v18 = vpop.f32.mrb[101].mxu1  ;;  %v8578_v31 = vsel %vm1702_vm3, %v2839_v30, %v8570_v47 }
 0x394   : > { %v6332_v49 = vadd.f32 %v6331_v18, %v6330_v9  ;;  %v6278_v34 = vpop.f32.mrb[48].mxu0  ;;  %v6333_v60 = vpop.f32.mrb[102].mxu1 }
 0x395   : > { %v6279_v52 = vpop.f32.mrb[49].mxu0  ;;  %v6334_v3 = vpop.f32.mrb[103].mxu1 }
 0x396   : > { %v2671_v57 = vadd.f32 %v6332_v49, %v2583_v48  ;;  %v6280_v56 = vadd.f32 %v6279_v52, %v6278_v34  ;;  %v6335_v61 = vadd.f32 %v6334_v3, %v6333_v60  ;;  %v6281_v13 = vpop.f32.mrb[50].mxu0 }
 0x397   : > { %v6282_v2 = vpop.f32.mrb[51].mxu0 }
 0x398   : > { %v2674_v62 = vadd.f32 %v6335_v61, %v2586_v33  ;;  %v6283_v32 = vadd.f32 %v6282_v2, %v6281_v13  ;;  %v2700_v5 = vmax.f32 %v2671_v57, 0.0  ;;  %v2591_v12 = vadd.f32 %v6280_v56, %v8447_v22  ;;  %v6790_v33 = vld [vmem:[%s9658_s6 + $0xa8] sm:$0xff]  }
 0x399   : > { %6417 = vmatpush3.bf16.msra.mxu1 %v6790_v33  ;;  %v2859_v33 = vrot.slane %v8500_v41, 6 }
 0x39a   : > { %v2701_v7 = vmax.f32 %v2674_v62, 0.0  ;;  %v6336_v15 = vpop.f32.mrb[104].mxu1  ;;  %v2594_v8 = vadd.f32 %v6283_v32, %v8447_v22  ;;  %v6791_v32 = vld [vmem:[%s9658_s6 + $0xf0] sm:$0xff]  }
 0x39b   : > { %v6337_v30 = vpop.f32.mrb[105].mxu1  ;;  %6418 = vmatprep.subr.bf16.mxu1 %v6791_v32 }
 0x39c   : > { %v8585_v14 = vpack.c.bf16 %v2701_v7, %v2700_v5  ;;  %v6338_v36 = vadd.f32 %v6337_v30, %v6336_v15  ;;  %v6339_v28 = vpop.f32.mrb[106].mxu1 }
 0x39d   : > { %v6340_v43 = vpop.f32.mrb[107].mxu1 }
 0x39e   : > { %v2679_v45 = vadd.f32 %v6338_v36, %v2591_v12  ;;  %v6341_v58 = vadd.f32 %v6340_v43, %v6339_v28  ;;  %v2809_v17 = vrot.slane %v8585_v14, 5  ;;  %v8596_v59 = vshll.u32 %v8585_v14, 16  ;;  %v6792_v28 = vld [vmem:[%s9658_s6 + $0xb0] sm:$0xff]  }
 0x39f   : > { %v8599_v16 = vshrl.u32 %v8585_v14, 16  ;;  %6419 = vmatpush3.bf16.msra.mxu1 %v6792_v28 }
 0x3a0   : > { %v2682_v63 = vadd.f32 %v6341_v58, %v2594_v8  ;;  %v2810_v37 = vsel %vm1686_vm11, %v2807_v55, %v2809_v17  ;;  %v2748_v35 = vrot.slane %v8596_v59, 1  ;;  %v2702_v9 = vmax.f32 %v2679_v45, 0.0  ;;  %v6794_v58 = vld [vmem:[%s9658_s6 + $0xb8] sm:$0xff]  }
 0x3a1   : > { %2822 = vrot.lane.b32.xlu1 %v2810_v37, %s9680_s26  ;;  %v6284_v29 = vpop.f32.mrb[52].mxu0  ;;  %v2845_v55 = vrot.slane %v8599_v16, 5  ;;  %v2846_v46 = vrot.slane %v8596_v59, 6 }
 0x3a2   : > { %v2703_v18 = vmax.f32 %v2682_v63, 0.0  ;;  %v6285_v48 = vpop.f32.mrb[53].mxu0  ;;  %v2749_v49 = vsel %vm1539_vm2, %v2744_v40, %v2748_v35  ;;  %v2752_v12 = vor.u32 %v8599_v16, %v2748_v35 }
 0x3a3   : > { %v6286_v34 = vadd.f32 %v6285_v48, %v6284_v29  ;;  %2774 = vrot.lane.b32.xlu0 %v2749_v49, %s9680_s26  ;;  %v6287_v60 = vpop.f32.mrb[54].mxu0  ;;  %v2847_v61 = vor.u32 %v2846_v46, %v2845_v55  ;;  %v2905_v55 = vrot.slane %v8561_v25, 2  ;;  %v2906_v46 = vrot.slane %v8558_v21, 3 }
 0x3a4   : > { %v8612_v52 = vpack.c.bf16 %v2703_v18, %v2702_v9  ;;  %v6288_v3 = vpop.f32.mrb[55].mxu0  ;;  %v6342_v10 = vpop.f32.mrb[108].mxu1  ;;  %v2909_v25 = vrot.slane %v8599_v16, 2  ;;  %v2910_v21 = vrot.slane %v8596_v59, 3  ;;  %v2863_v16 = vrot.slane %v8554_v11, 6 }
 0x3a5   : > { %v2599_v57 = vadd.f32 %v6286_v34, %v8447_v22  ;;  %v6343_v56 = vpop.f32.mrb[109].mxu1  ;;  %v8628_v22 = vsel %vm1702_vm3, %v8570_v47, %v2847_v61  ;;  %v6793_v47 = vld [vmem:[%s9658_s6 + $0xf8] sm:$0xff]  }
 0x3a6   : > { %v6344_v13 = vadd.f32 %v6343_v56, %v6342_v10  ;;  %v6345_v2 = vpop.f32.mrb[110].mxu1  ;;  %v2811_v44 = vrot.slane %v8612_v52, 5  ;;  %v8620_v62 = vshll.u32 %v8612_v52, 16  ;;  %v2758_v7 = vshrl.u32 %v8612_v52, 16  ;;  %6420 = vmatprep.subr.bf16.mxu1 %v6793_v47 }
 0x3a7   : > { %v6346_v5 = vpop.f32.mrb[111].mxu1  ;;  %6421 = vmatpush3.bf16.msra.mxu1 %v6794_v58  ;;  %v2858_v56 = vrot.slane %v8469_v24, 6  ;;  %v2790_v47 = vrot.slane %v8500_v41, 1 }
 0x3a8   : > { %v2687_v15 = vadd.f32 %v6344_v13, %v2599_v57  ;;  %v2812_v30 = vsel %vm1686_vm11, %v2809_v17, %v2811_v44  ;;  %v2756_v36 = vrot.slane %v8620_v62, 1  ;;  %v2849_v0 = vrot.slane %v2758_v7, 5 }
 0x3a9   : > { %2824 = vrot.lane.b32.xlu1 %v2812_v30, %s9680_s26  ;;  %v2850_v26 = vrot.slane %v8620_v62, 6  ;;  %v2861_v13 = vrot.slane %v8521_v50, 6  ;;  %v2913_v32 = vrot.slane %v2758_v7, 2  ;;  %v2914_v5 = vrot.slane %v8620_v62, 3 }
 0x3aa   : > { %v2704_v8 = vmax.f32 %v2687_v15, 0.0  ;;  %v2757_v43 = vsel %vm1539_vm2, %v2752_v12, %v2756_v36  ;;  %v2760_v9 = vor.u32 %v2758_v7, %v2756_v36  ;;  %v2865_v7 = vrot.slane %v8585_v14, 6 }
 0x3ab   : > { %2776 = vrot.lane.b32.xlu0 %v2757_v43, %s9680_s26  ;;  %v2851_v17 = vor.u32 %v2850_v26, %v2849_v0  ;;  %v2862_v59 = vsel %vm1752_vm0, %v2859_v33, %v2861_v13  ;;  %v2915_v15 = vor.u32 %v2914_v5, %v2913_v32 }
 0x3ac   : > { %v2711_v45 = vpack.c.bf16 %v2704_v8, %v2704_v8  ;;  %v2866_v28 = vsel %vm1752_vm0, %v2863_v16, %v2865_v7  ;;  %v2867_v8 = vrot.slane %v8612_v52, 6 }
 0x3ad   : > { %v8653_v35 = vsel %vm1702_vm3, %v2847_v61, %v2851_v17  ;;  %v2860_v61 = vsel %vm1752_vm0, %v2858_v56, %v2859_v33  ;;  %v2794_v33 = vrot.slane %v8554_v11, 1 }
 0x3ae   : > { %v8647_v39 = vsel %vm1535_vm10, %v2711_v45, 0  ;;  %v2868_v0 = vsel %vm1752_vm0, %v2865_v7, %v2867_v8  ;;  %v2789_v45 = vrot.slane %v8469_v24, 1 }
 0x3af   : > { %v2813_v63 = vrot.slane %v8647_v39, 5  ;;  %v2761_v37 = vshll.u32 %v8647_v39, 16  ;;  %v2765_v40 = vshrl.u32 %v8647_v39, 16  ;;  %v2869_v26 = vrot.slane %v8647_v39, 6 }
 0x3b0   : > { %v2800_v7 = vrot.slane %v8647_v39, 1 }
 0x3b1   : > { %v2814_v29 = vsel %vm1686_vm11, %v2811_v44, %v2813_v63  ;;  %v2763_v18 = vrot.slane %v2761_v37, 1  ;;  %v2853_v49 = vrot.slane %v2765_v40, 5  ;;  %v2854_v34 = vrot.slane %v2761_v37, 6 }
 0x3b2   : > { %2826 = vrot.lane.b32.xlu1 %v2814_v29, %s9680_s26  ;;  %v2815_v60 = vsel %vm1686_vm11, %v2813_v63, %v8275_v51  ;;  %v2907_v51 = vor.u32 %v2906_v46, %v2905_v55  ;;  %v2911_v44 = vor.u32 %v2910_v21, %v2909_v25  ;;  %v2917_v30 = vrot.slane %v2765_v40, 2  ;;  %v6778_v29 = vld [vmem:[%s9658_s6 + $0x100] sm:$0xff]  }
 0x3b3   : > { %v2764_v48 = vsel %vm1539_vm2, %v2760_v9, %v2763_v18  ;;  %v2767_v3 = vor.u32 %v2765_v40, %v2763_v18  ;;  %v8664_v10 = vor.u32 %v2854_v34, %v2853_v49  ;;  %v2918_v12 = vrot.slane %v2761_v37, 3  ;;  %v6783_v49 = vld [vmem:[%s9658_s6 + $0x108] sm:$0xff]  }
 0x3b4   : > { %2778 = vrot.lane.b32.xlu0 %v2764_v48, %s9680_s26  ;;  %v2908_v2 = vsel %vm1842_vm8, %v8529_v23, %v2907_v51  ;;  %v2864_v23 = vsel %vm1752_vm0, %v2861_v13, %v2863_v16  ;;  %v2916_v62 = vsel %vm1842_vm8, %v2911_v44, %v2915_v15  ;;  %v2791_v63 = vsel %vm1615_vm1, %v2789_v45, %v2790_v47 }
 0x3b5   : > { %v8670_v57 = vsel %vm1702_vm3, %v2851_v17, %v8664_v10  ;;  %v2919_v36 = vor.u32 %v2918_v12, %v2917_v30  ;;  %v2870_v40 = vsel %vm1752_vm0, %v2867_v8, %v2869_v26  ;;  %v2871_v48 = vsel %vm1752_vm0, %v2869_v26, %v8190_v54  ;;  %v6795_v54 = vld [vmem:[%s9658_s6 + $0x118] sm:$0xff]  }
 0x3b6   : > { %2828 = vrot.lane.b32.xlu1 %v2815_v60, %s9680_s26  ;;  %v2796_v13 = vrot.slane %v8585_v14, 1  ;;  %v2798_v16 = vrot.slane %v8612_v52, 1  ;;  %vm7183_vm0 = vmmov 0   ;;  %vm5502_vm2 = vcmask 8192  }
 0x3b7   : > { %v2920_v43 = vsel %vm1842_vm8, %v2915_v15, %v2919_v36  ;;  %v2921_v58 = vsel %vm1842_vm8, %v2919_v36, %v8258_v20 }
 0x3b8   : > { %2780 = vrot.lane.b32.xlu0 %v2767_v3, %s9680_s26  ;;  %v2799_v15 = vsel %vm1615_vm1, %v2796_v13, %v2798_v16  ;;  %v2801_v36 = vsel %vm1615_vm1, %v2798_v16, %v2800_v7 }
 0x3ba   : > { %2922 = vrot.lane.b32.xlu1 %v8534_v53, %s9680_s26  ;;  %v2912_v53 = vsel %vm1842_vm8, %v2907_v51, %v2911_v44  ;;  %v2797_v44 = vsel %vm1615_vm1, %v2794_v33, %v2796_v13  ;;  %v2895_v13 = vrot.slane %v8647_v39, 2 }
 0x3bc   : > { %2872 = vrot.lane.b32.xlu0 %v2860_v61, %s9680_s26 }
 0x3be   : > { %2924 = vrot.lane.b32.xlu1 %v2908_v2, %s9680_s26 }
 0x3c0   : > { %2874 = vrot.lane.b32.xlu0 %v2862_v59, %s9680_s26 }
 0x3c2   : > { %2926 = vrot.lane.b32.xlu1 %v2912_v53, %s9680_s26 }
 0x3c4   : > { %2876 = vrot.lane.b32.xlu0 %v2864_v23, %s9680_s26 }
 0x3c6   : > { %2928 = vrot.lane.b32.xlu1 %v2916_v62, %s9680_s26 }
 0x3c8   : > { %2878 = vrot.lane.b32.xlu0 %v2866_v28, %s9680_s26 }
 0x3ca   : > { %2930 = vrot.lane.b32.xlu1 %v2920_v43, %s9680_s26 }
 0x3cc   : > { %2880 = vrot.lane.b32.xlu0 %v2868_v0, %s9680_s26  ;;  %v2887_v0 = vrot.slane %v8521_v50, 2 }
 0x3ce   : > { %v2817_v17 = vpop.permute.xlu1 %2816  ;;  %2932 = vrot.lane.b32.xlu1 %v2921_v58, %s9680_s26  ;;  %v2886_v58 = vrot.slane %v8500_v41, 2 }
 0x3cf   : > { %v2971_v37 = vsel %vm2049_vm14, %v2791_v63, %v2817_v17 }
 0x3d0   : > { %3400 = vmatprep.mubr.bf16.mxu0 %v2971_v37  ;;  %2882 = vrot.lane.b32.xlu0 %v2870_v40, %s9680_s26  ;;  %v2769_v9 = vpop.permute.xlu0 %2768  ;;  %v2888_v63 = vsel %vm1828_vm6, %v2886_v58, %v2887_v0  ;;  %v2889_v37 = vrot.slane %v8554_v11, 2 }
 0x3d1   : > { %v2949_v18 = vsel %vm2049_vm14, %v8469_v24, %v2769_v9  ;;  %v6788_v24 = vld [vmem:[%s9658_s6 + $0x110] sm:$0xff]  }
 0x3d2   : > { %3401 = vmatmul.mubr.bf16.vlgmr.msra.gmra.mrb[56].mxu0 %v2949_v18  ;;  %2934 = vrot.lane.b32.xlu1 %v8258_v20, %s9680_s26  ;;  %v2792_v20 = vrot.slane %v8521_v50, 1 }
 0x3d3   : > { %6507 = vmatpush3.bf16.msra.mxu0 %v6778_v29 }
 0x3d4   : > { %2884 = vrot.lane.b32.xlu0 %v2871_v48, %s9680_s26  ;;  %6508 = vmatprep.subr.bf16.mxu0 %v7182_v27  ;;  %v2793_v60 = vsel %vm1615_vm1, %v2790_v47, %v2792_v20  ;;  %v2795_v51 = vsel %vm1615_vm1, %v2792_v20, %v2794_v33  ;;  %v2891_v20 = vrot.slane %v8585_v14, 2  ;;  %vm3666_vm1 = vcmask 850944  }
 0x3d7   : > { %6509 = vmatpush3.bf16.msra.mxu0 %v6783_v49  ;;  %v2890_v49 = vsel %vm1828_vm6, %v2887_v0, %v2889_v37 }
 0x3d8   : > { %6510 = vmatprep.subr.bf16.mxu0 %v7182_v27 }
 0x3db   : > { %6511 = vmatpush3.bf16.msra.mxu0 %v6788_v24 }
 0x3dc   : > { %6512 = vmatprep.subr.bf16.mxu0 %v7182_v27 }
 0x3df   : > { %6513 = vmatpush3.bf16.msra.mxu0 %v6795_v54  ;;  %v2937_v54 = vrot.slane %v8521_v50, 3 }
 0x3e6   : > { %v2819_v34 = vpop.permute.xlu1 %2818 }
 0x3e7   : > { %v2975_v55 = vsel %vm2049_vm14, %v2793_v60, %v2819_v34  ;;  %v2936_v60 = vrot.slane %v8500_v41, 3 }
 0x3e8   : > { %3408 = vmatprep.mubr.bf16.mxu0 %v2975_v55  ;;  %v2771_v46 = vpop.permute.xlu0 %2770 }
 0x3e9   : > { %v2952_v3 = vsel %vm2049_vm14, %v8500_v41, %v2771_v46  ;;  %v2938_v46 = vsel %vm1884_vm4, %v2936_v60, %v2937_v54  ;;  %v2893_v41 = vrot.slane %v8612_v52, 2 }
 0x3ea   : > { %3409 = vmatmul.mubr.bf16.gmra.mrb[60].mxu0 %v2952_v3  ;;  %v2892_v3 = vsel %vm1828_vm6, %v2889_v37, %v2891_v20 }
 0x402   : > { %v2821_v56 = vpop.permute.xlu1 %2820 }
 0x403   : > { %v2979_v25 = vsel %vm2049_vm14, %v2795_v51, %v2821_v56 }
 0x404   : > { %3416 = vmatprep.mubr.bf16.mxu0 %v2979_v25  ;;  %v2773_v21 = vpop.permute.xlu0 %2772 }
 0x405   : > { %v2955_v61 = vsel %vm2049_vm14, %v8521_v50, %v2773_v21  ;;  %v2939_v50 = vrot.slane %v8554_v11, 3  ;;  %v2894_v21 = vsel %vm1828_vm6, %v2891_v20, %v2893_v41 }
 0x406   : > { %3417 = vmatmul.mubr.bf16.gmra.mrb[64].mxu0 %v2955_v61 }
 0x407   : > { %v2940_v25 = vsel %vm1884_vm4, %v2937_v54, %v2939_v50 }
 0x413   : > { %v2823_v2 = vpop.permute.xlu1 %2822 }
 0x414   : > { %v2983_v32 = vsel %vm2049_vm14, %v2797_v44, %v2823_v2 }
 0x415   : > { %3424 = vmatprep.mubr.bf16.mxu0 %v2983_v32  ;;  %v2775_v5 = vpop.permute.xlu0 %2774 }
 0x416   : > { %v2958_v59 = vsel %vm2049_vm14, %v8554_v11, %v2775_v5  ;;  %v2941_v11 = vrot.slane %v8585_v14, 3  ;;  %v2896_v5 = vsel %vm1828_vm6, %v2893_v41, %v2895_v13 }
 0x417   : > { %3425 = vmatmul.mubr.bf16.gmra.mrb[68].mxu0 %v2958_v59 }
 0x418   : > { %v2942_v32 = vsel %vm1884_vm4, %v2939_v50, %v2941_v11 }
 0x41b   : > { %v2825_v53 = vpop.permute.xlu1 %2824 }
 0x41c   : > { %v2987_v30 = vsel %vm2049_vm14, %v2799_v15, %v2825_v53 }
 0x41d   : > { %3432 = vmatprep.mubr.bf16.mxu0 %v2987_v30  ;;  %v2777_v12 = vpop.permute.xlu0 %2776  ;;  %v2897_v30 = vsel %vm1828_vm6, %v2895_v13, %v8251_v6 }
 0x41e   : > { %v2961_v23 = vsel %vm2049_vm14, %v8585_v14, %v2777_v12  ;;  %v2943_v14 = vrot.slane %v8612_v52, 3 }
 0x41f   : > { %3433 = vmatmul.mubr.bf16.gmra.mrb[72].mxu0 %v2961_v23 }
 0x420   : > { %v2944_v15 = vsel %vm1884_vm4, %v2941_v11, %v2943_v14 }
 0x424   : > { %v2827_v62 = vpop.permute.xlu1 %2826 }
 0x425   : > { %v2991_v28 = vsel %vm2049_vm14, %v2801_v36, %v2827_v62 }
 0x426   : > { %3440 = vmatprep.mubr.bf16.mxu0 %v2991_v28  ;;  %v2779_v8 = vpop.permute.xlu0 %2778 }
 0x427   : > { %v2964_v43 = vsel %vm2049_vm14, %v8612_v52, %v2779_v8  ;;  %v2945_v52 = vrot.slane %v8647_v39, 3 }
 0x428   : > { %v2829_v47 = vpop.permute.xlu1 %2828  ;;  %3441 = vmatmul.mubr.bf16.gmra.mrb[76].mxu0 %v2964_v43 }
 0x429   : > { %v2995_v26 = vsel %vm2049_vm14, %v2800_v7, %v2829_v47  ;;  %v2946_v36 = vsel %vm1884_vm4, %v2943_v14, %v2945_v52 }
 0x42a   : > { %3448 = vmatprep.mubr.bf16.mxu0 %v2995_v26  ;;  %v2781_v45 = vpop.permute.xlu0 %2780 }
 0x42b   : > { %v2967_v18 = vsel %vm2049_vm14, %v8647_v39, %v2781_v45  ;;  %v2857_v39 = vsel %vm1702_vm3, %v8664_v10, %v8284_v19 }
 0x42c   : > { %v2923_v17 = vpop.permute.xlu1 %2922 }
 0x42d   : > { %v3027_v40 = vsel %vm2049_vm14, %v2888_v63, %v2923_v17 }
 0x42e   : > { %3488 = vmatprep.mubr.bf16.mxu1 %v3027_v40  ;;  %v2873_v29 = vpop.permute.xlu0 %2872  ;;  %v6796_v40 = vld [vmem:[%s9653_s1] sm:$0xff]  }
 0x42f   : > { %v2999_v9 = vsel %vm2049_vm14, %v8511_v4, %v2873_v29 }
 0x430   : > { %v2925_v48 = vpop.permute.xlu1 %2924  ;;  %3449 = vmatmul.mubr.bf16.gmra.mrb[80].mxu0 %v2967_v18  ;;  %3489 = vmatmul.mubr.bf16.vlgmr.msra.gmra.mrb[112].mxu1 %v2999_v9 }
 0x431   : > { %v3031_v24 = vsel %vm2049_vm14, %v2890_v49, %v2925_v48  ;;  %6514 = vmatprep.mubr.msk.bf16.mxu0 %vm7183_vm0, %v7182_v27 }
 0x432   : > { %3496 = vmatprep.mubr.bf16.mxu1 %v3031_v24  ;;  %v2875_v4 = vpop.permute.xlu0 %2874 }
 0x433   : > { %v3003_v55 = vsel %vm2049_vm14, %v8537_v38, %v2875_v4 }
 0x434   : > { %v2927_v34 = vpop.permute.xlu1 %2926 }
 0x435   : > { %v3035_v33 = vsel %vm2049_vm14, %v2892_v3, %v2927_v34 }
 0x436   : > { %v2877_v56 = vpop.permute.xlu0 %2876 }
 0x437   : > { %v3007_v38 = vsel %vm2049_vm14, %v8578_v31, %v2877_v56 }
 0x438   : > { %3497 = vmatmul.mubr.bf16.gmra.mrb[116].mxu1 %v3003_v55  ;;  %6515 = vmatmul.mubr.msk.bf16.vlgmr.msra.gmra.mrb[84].mxu0 %vm2049_vm14, %v2938_v46  ;;  %v2929_v51 = vpop.permute.xlu1 %2928 }
 0x439   : > { %3504 = vmatprep.mubr.bf16.mxu1 %v3035_v33  ;;  %6518 = vmatprep.mubr.msk.bf16.mxu0 %vm7183_vm0, %v7182_v27  ;;  %v3039_v61 = vsel %vm2049_vm14, %v2894_v21, %v2929_v51 }
 0x43a   : > { %v2879_v2 = vpop.permute.xlu0 %2878 }
 0x43b   : > { %v3011_v31 = vsel %vm2049_vm14, %v8628_v22, %v2879_v2 }
 0x43c   : > { %v2931_v44 = vpop.permute.xlu1 %2930 }
 0x43d   : > { %v3043_v59 = vsel %vm2049_vm14, %v2896_v5, %v2931_v44 }
 0x43e   : > { %v2881_v16 = vpop.permute.xlu0 %2880 }
 0x43f   : > { %v3015_v22 = vsel %vm2049_vm14, %v8653_v35, %v2881_v16 }
 0x440   : > { %3505 = vmatmul.mubr.bf16.gmra.mrb[120].mxu1 %v3007_v38  ;;  %6519 = vmatmul.mubr.msk.bf16.gmra.mrb[88].mxu0 %vm2049_vm14, %v2940_v25  ;;  %v2933_v53 = vpop.permute.xlu1 %2932 }
 0x441   : > { %3512 = vmatprep.mubr.bf16.mxu1 %v3039_v61  ;;  %6522 = vmatprep.mubr.msk.bf16.mxu0 %vm7183_vm0, %v7182_v27  ;;  %v3047_v12 = vsel %vm2049_vm14, %v2897_v30, %v2933_v53  ;;  %v8856_v61 = vld [vmem:[%s9659_s7] ss:$0 sm:$0xff] }
 0x442   : > { %v2883_v7 = vpop.permute.xlu0 %2882 }
 0x443   : > { %v3019_v62 = vsel %vm2049_vm14, %v8670_v57, %v2883_v7 }
 0x444   : > { %v2935_v23 = vpop.permute.xlu1 %2934 }
 0x445   : > { %v3050_v35 = vsel %vm2049_vm14, %v8251_v6, %v2935_v23  ;;  %v2947_v6 = vsel %vm1884_vm4, %v2945_v52, %v8182_v42 }
 0x446   : > { %v2885_v28 = vpop.permute.xlu0 %2884 }
 0x447   : > { %v3023_v8 = vsel %vm2049_vm14, %v2857_v39, %v2885_v28 }
 0x448   : > { %3513 = vmatmul.mubr.bf16.gmra.mrb[124].mxu1 %v3011_v31  ;;  %6523 = vmatmul.mubr.msk.bf16.gmra.mrb[92].mxu0 %vm2049_vm14, %v2942_v32 }
 0x449   : > { %3520 = vmatprep.mubr.bf16.mxu1 %v3043_v59  ;;  %6526 = vmatprep.mubr.msk.bf16.mxu0 %vm7183_vm0, %v7182_v27 }
 0x450   : > { %3521 = vmatmul.mubr.bf16.gmra.mrb[128].mxu1 %v3015_v22  ;;  %6527 = vmatmul.mubr.msk.bf16.gmra.mrb[96].mxu0 %vm2049_vm14, %v2944_v15 }
 0x451   : > { %3528 = vmatprep.mubr.bf16.mxu1 %v3047_v12  ;;  %6530 = vmatprep.mubr.msk.bf16.mxu0 %vm7183_vm0, %v7182_v27 }
 0x458   : > { %3529 = vmatmul.mubr.bf16.gmra.mrb[132].mxu1 %v3019_v62  ;;  %6531 = vmatmul.mubr.msk.bf16.gmra.mrb[100].mxu0 %vm2049_vm14, %v2946_v36 }
 0x459   : > { %3536 = vmatprep.mubr.bf16.mxu1 %v3050_v35  ;;  %6534 = vmatprep.mubr.msk.bf16.mxu0 %vm7183_vm0, %v7182_v27 }
 0x460   : > { %3537 = vmatmul.mubr.bf16.gmra.mrb[136].mxu1 %v3023_v8  ;;  %6535 = vmatmul.mubr.msk.bf16.gmra.mrb[104].mxu0 %vm2049_vm14, %v2947_v6 }
 0x461   : > { %6538 = vmatprep.mubr.msk.bf16.mxu0 %vm7183_vm0, %v7182_v27  ;;  %6556 = vmatprep.mubr.msk.bf16.mxu1 %vm3666_vm1, %v6796_v40 }
 0x468   : > { %6539 = vmatmul.mubr.msk.bf16.gmra.mrb[108].mxu0 %vm2049_vm14, %v8182_v42 }
 0x4a5   : > { %v6364_v57 = vpop.f32.mrb[56].mxu0 }
 0x4a6   : > { %v6365_v43 = vpop.f32.mrb[57].mxu0 }
 0x4a7   : > { %v6366_v47 = vadd.f32 %v6365_v43, %v6364_v57  ;;  %v6367_v0 = vpop.f32.mrb[58].mxu0 }
 0x4a8   : > { %v6368_v26 = vpop.f32.mrb[59].mxu0 }
 0x4a9   : > { %v6369_v19 = vadd.f32 %v6368_v26, %v6367_v0  ;;  %v3403_v31 = vadd.f32 %v6366_v47, %v8856_v61 }
 0x4ab   : > { %v3406_v22 = vadd.f32 %v6369_v19, %v8856_v61 }
 0x4bd   : > { %v6370_v10 = vpop.f32.mrb[60].mxu0 }
 0x4be   : > { %v6371_v45 = vpop.f32.mrb[61].mxu0 }
 0x4bf   : > { %v6372_v58 = vadd.f32 %v6371_v45, %v6370_v10  ;;  %v6373_v17 = vpop.f32.mrb[62].mxu0 }
 0x4c0   : > { %v6374_v63 = vpop.f32.mrb[63].mxu0 }
 0x4c1   : > { %v6375_v37 = vadd.f32 %v6374_v63, %v6373_v17  ;;  %v3411_v36 = vadd.f32 %v6372_v58, %v8856_v61 }
 0x4c3   : > { %v3414_v47 = vadd.f32 %v6375_v37, %v8856_v61 }
 0x4d9   : > { %v6376_v42 = vpop.f32.mrb[64].mxu0 }
 0x4da   : > { %v6377_v27 = vpop.f32.mrb[65].mxu0 }
 0x4db   : > { %v8837_v29 = vadd.f32 %v6377_v27, %v6376_v42  ;;  %v6379_v9 = vpop.f32.mrb[66].mxu0 }
 0x4dc   : > { %v6380_v18 = vpop.f32.mrb[67].mxu0 }
 0x4dd   : > { %v8839_v48 = vadd.f32 %v6380_v18, %v6379_v9  ;;  %v3419_v58 = vadd.f32 %v8837_v29, %v8856_v61 }
 0x4ea   : > { %v6382_v49 = vpop.f32.mrb[68].mxu0 }
 0x4eb   : > { %v6383_v24 = vpop.f32.mrb[69].mxu0 }
 0x4ec   : > { %v8841_v54 = vadd.f32 %v6383_v24, %v6382_v49  ;;  %v6385_v20 = vpop.f32.mrb[70].mxu0 }
 0x4ed   : > { %v6386_v4 = vpop.f32.mrb[71].mxu0 }
 0x4ee   : > { %v8843_v34 = vadd.f32 %v6386_v4, %v6385_v20 }
 0x4f2   : > { %v6388_v60 = vpop.f32.mrb[72].mxu0 }
 0x4f3   : > { %v6389_v55 = vpop.f32.mrb[73].mxu0 }
 0x4f4   : > { %v8845_v46 = vadd.f32 %v6389_v55, %v6388_v60  ;;  %v6391_v3 = vpop.f32.mrb[74].mxu0  ;;  %v3422_v60 = vadd.f32 %v8839_v48, %v8856_v61 }
 0x4f5   : > { %v6392_v33 = vpop.f32.mrb[75].mxu0 }
 0x4f6   : > { %v8847_v50 = vadd.f32 %v6392_v33, %v6391_v3 }
 0x4fb   : > { %v6394_v41 = vpop.f32.mrb[76].mxu0 }
 0x4fc   : > { %v6395_v56 = vpop.f32.mrb[77].mxu0 }
 0x4fd   : > { %v8849_v51 = vadd.f32 %v6395_v56, %v6394_v41  ;;  %v6397_v38 = vpop.f32.mrb[78].mxu0 }
 0x4fe   : > { %v6398_v25 = vpop.f32.mrb[79].mxu0 }
 0x4ff   : > { %v8851_v21 = vadd.f32 %v6398_v25, %v6397_v38 }
 0x503   : > { %v6400_v11 = vpop.f32.mrb[80].mxu0  ;;  %v6422_v13 = vpop.f32.mrb[112].mxu1 }
 0x504   : > { %v6401_v2 = vpop.f32.mrb[81].mxu0  ;;  %v6423_v44 = vpop.f32.mrb[113].mxu1 }
 0x505   : > { %v8859_v32 = vadd.f32 %v6401_v2, %v6400_v11  ;;  %v6424_v5 = vadd.f32 %v6423_v44, %v6422_v13  ;;  %v6403_v59 = vpop.f32.mrb[82].mxu0  ;;  %v6425_v14 = vpop.f32.mrb[114].mxu1  ;;  %v3427_v44 = vadd.f32 %v8841_v54, %v8856_v61 }
 0x506   : > { %v6404_v16 = vpop.f32.mrb[83].mxu0  ;;  %v6426_v53 = vpop.f32.mrb[115].mxu1 }
 0x507   : > { %v6427_v15 = vadd.f32 %v6426_v53, %v6425_v14  ;;  %v3491_v30 = vadd.f32 %v6424_v5, %v3403_v31  ;;  %v3430_v53 = vadd.f32 %v8843_v34, %v8856_v61 }
 0x509   : > { %v3494_v12 = vadd.f32 %v6427_v15, %v3406_v22 }
 0x50b   : > { %v6428_v52 = vpop.f32.mrb[116].mxu1  ;;  %v3578_v23 = vpop.f32.mrb[84].mxu0 }
 0x50c   : > { %v3579_v7 = vadd.f32 %v3578_v23, %v3491_v30  ;;  %v6429_v35 = vpop.f32.mrb[117].mxu1  ;;  %v6516_v62 = vpop.f32.mrb[85].mxu0 }
 0x50d   : > { %v6430_v28 = vadd.f32 %v6429_v35, %v6428_v52  ;;  %v6431_v39 = vpop.f32.mrb[118].mxu1  ;;  %v3581_v8 = vpop.f32.mrb[86].mxu0 }
 0x50e   : > { %v3582_v6 = vadd.f32 %v3581_v8, %v3494_v12  ;;  %v6432_v57 = vpop.f32.mrb[119].mxu1  ;;  %v6517_v43 = vpop.f32.mrb[87].mxu0  ;;  %v3632_v19 = vmax.f32 %v3579_v7, 0.0 }
 0x50f   : > { %v6433_v0 = vadd.f32 %v6432_v57, %v6431_v39  ;;  %v3499_v26 = vadd.f32 %v6430_v28, %v3411_v36  ;;  %v3435_v28 = vadd.f32 %v8845_v46, %v8856_v61 }
 0x510   : > { %v3633_v10 = vmax.f32 %v3582_v6, 0.0 }
 0x511   : > { %v3502_v45 = vadd.f32 %v6433_v0, %v3414_v47  ;;  %v3438_v47 = vadd.f32 %v8847_v50, %v8856_v61 }
 0x512   : > { %v3645_v17 = vpack.c.bf16 %v3633_v10, %v3632_v19 }
 0x513   : > { %v6434_v63 = vpop.f32.mrb[120].mxu1  ;;  %v3586_v40 = vpop.f32.mrb[88].mxu0 }
 0x514   : > { %v3587_v42 = vadd.f32 %v3586_v40, %v3499_v26  ;;  %v6435_v27 = vpop.f32.mrb[121].mxu1  ;;  %v6520_v9 = vpop.f32.mrb[89].mxu0  ;;  %6542 = vmatprep.subr.bf16.mxu1 %v3645_v17 }
 0x515   : > { %v6436_v18 = vadd.f32 %v6435_v27, %v6434_v63  ;;  %v6437_v49 = vpop.f32.mrb[122].mxu1  ;;  %v3589_v24 = vpop.f32.mrb[90].mxu0  ;;  %6543 = vmatpush3.bf16.msra.mxu1 %v3645_v17  ;;  %v3443_v9 = vadd.f32 %v8849_v51, %v8856_v61 }
 0x516   : > { %v3590_v37 = vadd.f32 %v3589_v24, %v3502_v45  ;;  %v6438_v20 = vpop.f32.mrb[123].mxu1  ;;  %v6521_v4 = vpop.f32.mrb[91].mxu0  ;;  %v3634_v33 = vmax.f32 %v3587_v42, 0.0 }
 0x517   : > { %v6439_v55 = vadd.f32 %v6438_v20, %v6437_v49  ;;  %v3507_v3 = vadd.f32 %v6436_v18, %v3419_v58  ;;  %v3446_v20 = vadd.f32 %v8851_v21, %v8856_v61 }
 0x518   : > { %v3635_v41 = vmax.f32 %v3590_v37, 0.0 }
 0x519   : > { %v3510_v56 = vadd.f32 %v6439_v55, %v3422_v60 }
 0x51a   : > { %v3646_v38 = vpack.c.bf16 %v3635_v41, %v3634_v33 }
 0x51b   : > { %v6440_v25 = vpop.f32.mrb[124].mxu1  ;;  %v3594_v11 = vpop.f32.mrb[92].mxu0 }
 0x51c   : > { %v3595_v13 = vadd.f32 %v3594_v11, %v3507_v3  ;;  %v6441_v29 = vpop.f32.mrb[125].mxu1  ;;  %v6524_v2 = vpop.f32.mrb[93].mxu0  ;;  %6544 = vmatprep.subr.bf16.mxu1 %v3646_v38 }
 0x51d   : > { %v6442_v31 = vadd.f32 %v6441_v29, %v6440_v25  ;;  %v6443_v5 = vpop.f32.mrb[126].mxu1  ;;  %v3597_v59 = vpop.f32.mrb[94].mxu0  ;;  %6545 = vmatpush3.bf16.msra.mxu1 %v3646_v38 }
 0x51e   : > { %v3598_v48 = vadd.f32 %v3597_v59, %v3510_v56  ;;  %v6444_v14 = vpop.f32.mrb[127].mxu1  ;;  %v6525_v16 = vpop.f32.mrb[95].mxu0  ;;  %v3636_v30 = vmax.f32 %v3595_v13, 0.0  ;;  %v3451_v13 = vadd.f32 %v8859_v32, %v8856_v61 }
 0x51f   : > { %v6445_v22 = vadd.f32 %v6444_v14, %v6443_v5  ;;  %v3515_v15 = vadd.f32 %v6442_v31, %v3427_v44 }
 0x520   : > { %v3637_v12 = vmax.f32 %v3598_v48, 0.0 }
 0x521   : > { %v3518_v52 = vadd.f32 %v6445_v22, %v3430_v53 }
 0x522   : > { %v3647_v23 = vpack.c.bf16 %v3637_v12, %v3636_v30 }
 0x523   : > { %v6446_v7 = vpop.f32.mrb[128].mxu1  ;;  %v3602_v35 = vpop.f32.mrb[96].mxu0 }
 0x524   : > { %v3603_v62 = vadd.f32 %v3602_v35, %v3515_v15  ;;  %v6447_v54 = vpop.f32.mrb[129].mxu1  ;;  %v6528_v36 = vpop.f32.mrb[97].mxu0  ;;  %6546 = vmatprep.subr.bf16.mxu1 %v3647_v23  ;;  %v6800_v35 = vld [vmem:[%s9660_s8 + $0x204] ss:$8 sps:$4 sm:$0xff]  }
 0x525   : > { %v6448_v39 = vadd.f32 %v6447_v54, %v6446_v7  ;;  %v6449_v8 = vpop.f32.mrb[130].mxu1  ;;  %v3605_v6 = vpop.f32.mrb[98].mxu0  ;;  %6547 = vmatpush3.bf16.msra.mxu1 %v3647_v23  ;;  %v6797_v23 = vld [vmem:[%s9653_s1 + $0x8] sm:$0x1f]   ;;  %5123 = vmatprep.subr.bf16.mxu0 %v6800_v35 }
 0x526   : > { %v3606_v34 = vadd.f32 %v3605_v6, %v3518_v52  ;;  %v6450_v57 = vpop.f32.mrb[131].mxu1  ;;  %v6529_v43 = vpop.f32.mrb[99].mxu0  ;;  %v3638_v19 = vmax.f32 %v3603_v62, 0.0  ;;  %v6798_v7 = vld [vmem:[%s9660_s8 + $0x200] ss:$8 sps:$4 sm:$0xff]  }
 0x527   : > { %v6451_v0 = vadd.f32 %v6450_v57, %v6449_v8  ;;  %v3523_v26 = vadd.f32 %v6448_v39, %v3435_v28  ;;  %v6803_v62 = vld [vmem:[%s9660_s8 + $0x214] ss:$8 sps:$4 sm:$0xff]   ;;  %v6807_v54 = vld [vmem:[%s9660_s8] ss:$8 sps:$4 sm:$0xff]   ;;  %v6809_v36 = vld [vmem:[%s9660_s8 + $0x4] ss:$8 sps:$4 sm:$0xff]   ;;  %5124 = vmatpush1.bf16.msra.mxu0 %v6798_v7 }
 0x528   : > { %v3639_v10 = vmax.f32 %v3606_v34, 0.0  ;;  %v6801_v28 = vld [vmem:[%s9660_s8 + $0x210] ss:$8 sps:$4 sm:$0xff]   ;;  %v6815_v39 = vld [vmem:[%s9660_s8 + $0x14] ss:$8 sps:$4 sm:$0xff]   ;;  %5125 = vmatprep.subr.bf16.mxu0 %v6803_v62 }
 0x529   : > { %v3526_v45 = vadd.f32 %v6451_v0, %v3438_v47  ;;  %v6806_v8 = vld [vmem:[%s9660_s8 + $0x224] ss:$8 sps:$4 sm:$0xff]   ;;  %v6813_v6 = vld [vmem:[%s9660_s8 + $0x10] ss:$8 sps:$4 sm:$0xff]   ;;  %v6804_v57 = vld [vmem:[%s9660_s8 + $0x220] ss:$8 sps:$4 sm:$0xff]  }
 0x52a   : > { %v3648_v17 = vpack.c.bf16 %v3639_v10, %v3638_v19  ;;  %v6821_v34 = vld [vmem:[%s9660_s8 + $0x24] ss:$8 sps:$4 sm:$0xff]   ;;  %v6812_v43 = vld [vmem:[%s9660_s8 + $0x234] ss:$8 sps:$4 sm:$0xff]   ;;  %v6819_v47 = vld [vmem:[%s9660_s8 + $0x20] ss:$8 sps:$4 sm:$0xff]  }
 0x52b   : > { %v6452_v63 = vpop.f32.mrb[132].mxu1  ;;  %v3610_v40 = vpop.f32.mrb[100].mxu0  ;;  %5126 = vmatpush1.bf16.msra.mxu0 %v6801_v28  ;;  %v6827_v0 = vld [vmem:[%s9660_s8 + $0x34] ss:$8 sps:$4 sm:$0xff]   ;;  %v6818_v19 = vld [vmem:[%s9660_s8 + $0x244] ss:$8 sps:$4 sm:$0xff]  }
 0x52c   : > { %v3611_v42 = vadd.f32 %v3610_v40, %v3523_v26  ;;  %v6453_v46 = vpop.f32.mrb[133].mxu1  ;;  %v6532_v27 = vpop.f32.mrb[101].mxu0  ;;  %6548 = vmatprep.subr.bf16.mxu1 %v3648_v17  ;;  %5127 = vmatprep.subr.bf16.mxu0 %v6806_v8  ;;  %v6810_v26 = vld [vmem:[%s9660_s8 + $0x230] ss:$8 sps:$4 sm:$0xff]   ;;  %v6831_v40 = vld [vmem:[%s9660_s8 + $0x40] ss:$8 sps:$4 sm:$0xff]  }
 0x52d   : > { %v6454_v58 = vadd.f32 %v6453_v46, %v6452_v63  ;;  %v6455_v18 = vpop.f32.mrb[134].mxu1  ;;  %v3613_v49 = vpop.f32.mrb[102].mxu0  ;;  %6549 = vmatpush3.bf16.msra.mxu1 %v3648_v17  ;;  %v6825_v10 = vld [vmem:[%s9660_s8 + $0x30] ss:$8 sps:$4 sm:$0xff]   ;;  %v6816_v17 = vld [vmem:[%s9660_s8 + $0x240] ss:$8 sps:$4 sm:$0xff]  }
 0x52e   : > { %v3614_v50 = vadd.f32 %v3613_v49, %v3526_v45  ;;  %v6456_v24 = vpop.f32.mrb[135].mxu1  ;;  %v6533_v37 = vpop.f32.mrb[103].mxu0  ;;  %v3640_v55 = vmax.f32 %v3611_v42, 0.0  ;;  %v6833_v45 = vld [vmem:[%s9660_s8 + $0x44] ss:$8 sps:$4 sm:$0xff]  }
 0x52f   : > { %v6457_v4 = vadd.f32 %v6456_v24, %v6455_v18  ;;  %v3531_v60 = vadd.f32 %v6454_v58, %v3443_v9  ;;  %5128 = vmatpush1.bf16.msra.mxu0 %v6804_v57  ;;  %v6824_v63 = vld [vmem:[%s9660_s8 + $0x254] ss:$8 sps:$4 sm:$0xff]   ;;  %v6822_v46 = vld [vmem:[%s9660_s8 + $0x250] ss:$8 sps:$4 sm:$0xff]   ;;  %v6830_v27 = vld [vmem:[%s9660_s8 + $0x264] ss:$8 sps:$4 sm:$0xff]  }
 0x530   : > { %v3641_v3 = vmax.f32 %v3614_v50, 0.0  ;;  %5129 = vmatprep.subr.bf16.mxu0 %v6812_v43  ;;  %v6839_v42 = vld [vmem:[%s9660_s8 + $0x54] ss:$8 sps:$4 sm:$0xff]   ;;  %v6837_v9 = vld [vmem:[%s9660_s8 + $0x50] ss:$8 sps:$4 sm:$0xff]  }
 0x531   : > { %v3534_v33 = vadd.f32 %v6457_v4, %v3446_v20  ;;  %v6845_v58 = vld [vmem:[%s9660_s8 + $0x64] ss:$8 sps:$4 sm:$0xff]   ;;  %v6828_v18 = vld [vmem:[%s9660_s8 + $0x260] ss:$8 sps:$4 sm:$0xff]   ;;  %v6836_v49 = vld [vmem:[%s9660_s8 + $0x274] ss:$8 sps:$4 sm:$0xff]  }
 0x532   : > { %v3649_v41 = vpack.c.bf16 %v3641_v3, %v3640_v55  ;;  %v6843_v50 = vld [vmem:[%s9660_s8 + $0x60] ss:$8 sps:$4 sm:$0xff]   ;;  %v6851_v24 = vld [vmem:[%s9660_s8 + $0x74] ss:$8 sps:$4 sm:$0xff]   ;;  %v6834_v37 = vld [vmem:[%s9660_s8 + $0x270] ss:$8 sps:$4 sm:$0xff]  }
 0x533   : > { %v6458_v56 = vpop.f32.mrb[136].mxu1  ;;  %v3618_v38 = vpop.f32.mrb[104].mxu0  ;;  %5130 = vmatpush1.bf16.msra.mxu0 %v6810_v26  ;;  %v6842_v20 = vld [vmem:[%s9660_s8 + $0x284] ss:$8 sps:$4 sm:$0xff]   ;;  %v6849_v4 = vld [vmem:[%s9660_s8 + $0x70] ss:$8 sps:$4 sm:$0xff]  }
 0x534   : > { %v3619_v25 = vadd.f32 %v3618_v38, %v3531_v60  ;;  %v6459_v51 = vpop.f32.mrb[137].mxu1  ;;  %v6536_v11 = vpop.f32.mrb[105].mxu0  ;;  %6550 = vmatprep.subr.bf16.mxu1 %v3649_v41  ;;  %5131 = vmatprep.subr.bf16.mxu0 %v6818_v19  ;;  %v6857_v60 = vld [vmem:[%s9660_s8 + $0x84] ss:$8 sps:$4 sm:$0xff]   ;;  %v6840_v55 = vld [vmem:[%s9660_s8 + $0x280] ss:$8 sps:$4 sm:$0xff]  }
 0x535   : > { %v6460_v29 = vadd.f32 %v6459_v51, %v6458_v56  ;;  %v6461_v2 = vpop.f32.mrb[138].mxu1  ;;  %v3621_v44 = vpop.f32.mrb[106].mxu0  ;;  %6551 = vmatpush3.bf16.msra.mxu1 %v3649_v41  ;;  %v6848_v3 = vld [vmem:[%s9660_s8 + $0x294] ss:$8 sps:$4 sm:$0xff]   ;;  %v6846_v56 = vld [vmem:[%s9660_s8 + $0x290] ss:$8 sps:$4 sm:$0xff]  }
 0x536   : > { %v3622_v21 = vadd.f32 %v3621_v44, %v3534_v33  ;;  %v6462_v31 = vpop.f32.mrb[139].mxu1  ;;  %v6537_v5 = vpop.f32.mrb[107].mxu0  ;;  %v3642_v48 = vmax.f32 %v3619_v25, 0.0  ;;  %v6855_v33 = vld [vmem:[%s9660_s8 + $0x80] ss:$8 sps:$4 sm:$0xff]  }
 0x537   : > { %v3539_v59 = vadd.f32 %v6460_v29, %v3451_v13  ;;  %5132 = vmatpush1.bf16.msra.mxu0 %v6816_v17  ;;  %v6863_v41 = vld [vmem:[%s9660_s8 + $0x94] ss:$8 sps:$4 sm:$0xff]   ;;  %v6854_v38 = vld [vmem:[%s9660_s8 + $0x2a4] ss:$8 sps:$4 sm:$0xff]   ;;  %v6861_v25 = vld [vmem:[%s9660_s8 + $0x90] ss:$8 sps:$4 sm:$0xff]  }
 0x538   : > { %v3643_v14 = vmax.f32 %v3622_v21, 0.0  ;;  %5133 = vmatprep.subr.bf16.mxu0 %v6824_v63  ;;  %v6869_v51 = vld [vmem:[%s9660_s8 + $0xa4] ss:$8 sps:$4 sm:$0xff]   ;;  %v6852_v11 = vld [vmem:[%s9660_s8 + $0x2a0] ss:$8 sps:$4 sm:$0xff]  }
 0x539   : > { %v6860_v13 = vld [vmem:[%s9660_s8 + $0x2b4] ss:$8 sps:$4 sm:$0xff]   ;;  %v6867_v29 = vld [vmem:[%s9660_s8 + $0xa0] ss:$8 sps:$4 sm:$0xff]   ;;  %v6858_v44 = vld [vmem:[%s9660_s8 + $0x2b0] ss:$8 sps:$4 sm:$0xff]  }
 0x53a   : > { %v3650_v16 = vpack.c.bf16 %v3643_v14, %v3642_v48  ;;  %v6875_v2 = vld [vmem:[%s9660_s8 + $0xb4] ss:$8 sps:$4 sm:$0xff]   ;;  %v6866_v21 = vld [vmem:[%s9660_s8 + $0x2c4] ss:$8 sps:$4 sm:$0xff]   ;;  %v6873_v31 = vld [vmem:[%s9660_s8 + $0xb0] ss:$8 sps:$4 sm:$0xff]  }
 0x53b   : > { %v3626_v53 = vpop.f32.mrb[108].mxu0  ;;  %5134 = vmatpush1.bf16.msra.mxu0 %v6822_v46  ;;  %v6881_v5 = vld [vmem:[%s9660_s8 + $0xc4] ss:$8 sps:$4 sm:$0xff]   ;;  %v6872_v48 = vld [vmem:[%s9660_s8 + $0x2d4] ss:$8 sps:$4 sm:$0xff]  }
 0x53c   : > { %v3627_v22 = vadd.f32 %v3626_v53, %v3539_v59  ;;  %v6540_v15 = vpop.f32.mrb[109].mxu0  ;;  %6552 = vmatprep.subr.bf16.mxu1 %v3650_v16  ;;  %5135 = vmatprep.subr.bf16.mxu0 %v6830_v27  ;;  %v6864_v59 = vld [vmem:[%s9660_s8 + $0x2c0] ss:$8 sps:$4 sm:$0xff]   ;;  %v6878_v53 = vld [vmem:[%s9660_s8 + $0x2e4] ss:$8 sps:$4 sm:$0xff]  }
 0x53d   : > { %v3629_v30 = vpop.f32.mrb[110].mxu0  ;;  %6553 = vmatpush3.bf16.msra.mxu1 %v3650_v16  ;;  %v6879_v14 = vld [vmem:[%s9660_s8 + $0xc0] ss:$8 sps:$4 sm:$0xff]   ;;  %v6870_v16 = vld [vmem:[%s9660_s8 + $0x2d0] ss:$8 sps:$4 sm:$0xff]  }
 0x53e   : > { %v3644_v12 = vmax.f32 %v3627_v22, 0.0  ;;  %v6541_v52 = vpop.f32.mrb[111].mxu0  ;;  %v6876_v22 = vld [vmem:[%s9660_s8 + $0x2e0] ss:$8 sps:$4 sm:$0xff]   ;;  %v6884_v15 = vld [vmem:[%s9660_s8 + $0x2f4] ss:$8 sps:$4 sm:$0xff]  }
 0x53f   : > { %5136 = vmatpush1.bf16.msra.mxu0 %v6828_v18  ;;  %v6882_v30 = vld [vmem:[%s9660_s8 + $0x2f0] ss:$8 sps:$4 sm:$0xff]   ;;  %v6887_v52 = vld [vmem:[%s9660_s8 + $0xd4] ss:$8 sps:$4 sm:$0xff]   ;;  %v6891_v7 = vld [vmem:[%s9660_s8 + $0xe0] ss:$8 sps:$4 sm:$0xff]  }
 0x540   : > { %v3651_v61 = vpack.c.bf16 %v3644_v12, %v3644_v12  ;;  %5137 = vmatprep.subr.bf16.mxu0 %v6836_v49  ;;  %v6885_v12 = vld [vmem:[%s9660_s8 + $0xd0] ss:$8 sps:$4 sm:$0xff]   ;;  %v6893_v35 = vld [vmem:[%s9660_s8 + $0xe4] ss:$8 sps:$4 sm:$0xff]   ;;  %v6899_v8 = vld [vmem:[%s9660_s8 + $0xf4] ss:$8 sps:$4 sm:$0xff]  }
 0x541   : > { %v6905_v43 = vld [vmem:[%s9660_s8 + $0x104] ss:$8 sps:$4 sm:$0xff]  }
 0x542   : > { %6584 = vmatprep.subr.msk.bf16.mxu1 %vm1535_vm10, %v3651_v61  ;;  %v3674_v32 = vsel %vm1535_vm10, %v3651_v61, 0  ;;  %v6890_v61 = vld [vmem:[%s9660_s8 + $0x304] ss:$8 sps:$4 sm:$0xff]  }
 0x543   : > { %6555 = vmatpush3.bf16.msra.mxu1 %v3674_v32  ;;  %5138 = vmatpush1.bf16.msra.mxu0 %v6834_v37 }
 0x544   : > { %5041 = vmatprep.subr.bf16.mxu1 %v6809_v36  ;;  %5139 = vmatprep.subr.bf16.mxu0 %v6842_v20 }
 0x546   : > { %6557 = vmatmul.mubr.msk.bf16.vlgmr.msra.gmra.mrb[140].mxu1 %vm3666_vm1, %v6797_v23 }
 0x547   : > { %5042 = vmatpush1.bf16.msra.mxu1 %v6807_v54  ;;  %5140 = vmatpush1.bf16.msra.mxu0 %v6840_v55  ;;  %v6902_v55 = vld [vmem:[%s9660_s8 + $0x324] ss:$8 sps:$4 sm:$0xff]  }
 0x548   : > { %5043 = vmatprep.subr.bf16.mxu1 %v6815_v39  ;;  %5141 = vmatprep.subr.bf16.mxu0 %v6848_v3  ;;  %v6897_v39 = vld [vmem:[%s9660_s8 + $0xf0] ss:$8 sps:$4 sm:$0xff]  }
 0x54b   : > { %5044 = vmatpush1.bf16.msra.mxu1 %v6813_v6  ;;  %5142 = vmatpush1.bf16.msra.mxu0 %v6846_v56  ;;  %v6908_v56 = vld [vmem:[%s9660_s8 + $0x334] ss:$8 sps:$4 sm:$0xff]  }
 0x54c   : > { %5045 = vmatprep.subr.bf16.mxu1 %v6821_v34  ;;  %5143 = vmatprep.subr.bf16.mxu0 %v6854_v38 }
 0x54f   : > { %5046 = vmatpush1.bf16.msra.mxu1 %v6819_v47  ;;  %5144 = vmatpush1.bf16.msra.mxu0 %v6852_v11  ;;  %v6903_v11 = vld [vmem:[%s9660_s8 + $0x100] ss:$8 sps:$4 sm:$0xff]  }
 0x550   : > { %5047 = vmatprep.subr.bf16.mxu1 %v6827_v0  ;;  %5145 = vmatprep.subr.bf16.mxu0 %v6860_v13  ;;  %v6906_v13 = vld [vmem:[%s9660_s8 + $0x330] ss:$8 sps:$4 sm:$0xff]  }
 0x553   : > { %5048 = vmatpush1.bf16.msra.mxu1 %v6825_v10  ;;  %5146 = vmatpush1.bf16.msra.mxu0 %v6858_v44  ;;  %v6911_v44 = vld [vmem:[%s9660_s8 + $0x114] ss:$8 sps:$4 sm:$0xff]  }
 0x554   : > { %5049 = vmatprep.subr.bf16.mxu1 %v6833_v45  ;;  %5147 = vmatprep.subr.bf16.mxu0 %v6866_v21  ;;  %v6914_v21 = vld [vmem:[%s9660_s8 + $0x344] ss:$8 sps:$4 sm:$0xff]  }
 0x557   : > { %5050 = vmatpush1.bf16.msra.mxu1 %v6831_v40  ;;  %5148 = vmatpush1.bf16.msra.mxu0 %v6864_v59  ;;  %v6912_v59 = vld [vmem:[%s9660_s8 + $0x340] ss:$8 sps:$4 sm:$0xff]  }
 0x558   : > { %5051 = vmatprep.subr.bf16.mxu1 %v6839_v42  ;;  %5149 = vmatprep.subr.bf16.mxu0 %v6872_v48  ;;  %v6917_v48 = vld [vmem:[%s9660_s8 + $0x124] ss:$8 sps:$4 sm:$0xff]  }
 0x55b   : > { %5052 = vmatpush1.bf16.msra.mxu1 %v6837_v9  ;;  %5150 = vmatpush1.bf16.msra.mxu0 %v6870_v16 }
 0x55c   : > { %5053 = vmatprep.subr.bf16.mxu1 %v6845_v58  ;;  %5151 = vmatprep.subr.bf16.mxu0 %v6878_v53  ;;  %v6888_v58 = vld [vmem:[%s9660_s8 + $0x300] ss:$8 sps:$4 sm:$0xff]  }
 0x55f   : > { %5054 = vmatpush1.bf16.msra.mxu1 %v6843_v50  ;;  %5152 = vmatpush1.bf16.msra.mxu0 %v6876_v22  ;;  %v6896_v50 = vld [vmem:[%s9660_s8 + $0x314] ss:$8 sps:$4 sm:$0xff]   ;;  %v6915_v22 = vld [vmem:[%s9660_s8 + $0x120] ss:$8 sps:$4 sm:$0xff]  }
 0x560   : > { %5055 = vmatprep.subr.bf16.mxu1 %v6851_v24  ;;  %5153 = vmatprep.subr.bf16.mxu0 %v6884_v15  ;;  %v6918_v15 = vld [vmem:[%s9660_s8 + $0x350] ss:$8 sps:$4 sm:$0xff]  }
 0x563   : > { %5056 = vmatpush1.bf16.msra.mxu1 %v6849_v4  ;;  %5154 = vmatpush1.bf16.msra.mxu0 %v6882_v30  ;;  %v6894_v4 = vld [vmem:[%s9660_s8 + $0x310] ss:$8 sps:$4 sm:$0xff]  }
 0x564   : > { %5057 = vmatprep.subr.bf16.mxu1 %v6857_v60  ;;  %5164 = vmatprep.subr.bf16.mxu0 %v6890_v61  ;;  %v6921_v61 = vld [vmem:[%s9660_s8 + $0x130] ss:$8 sps:$4 sm:$0xff]  }
 0x567   : > { %5058 = vmatpush1.bf16.msra.mxu1 %v6855_v33 }
 0x568   : > { %5059 = vmatprep.subr.bf16.mxu1 %v6863_v41  ;;  %v6900_v41 = vld [vmem:[%s9660_s8 + $0x320] ss:$8 sps:$4 sm:$0xff]  }
 0x56b   : > { %5060 = vmatpush1.bf16.msra.mxu1 %v6861_v25 }
 0x56c   : > { %5061 = vmatprep.subr.bf16.mxu1 %v6869_v51 }
 0x56f   : > { %5062 = vmatpush1.bf16.msra.mxu1 %v6867_v29 }
 0x570   : > { %5063 = vmatprep.subr.bf16.mxu1 %v6875_v2 }
 0x573   : > { %5064 = vmatpush1.bf16.msra.mxu1 %v6873_v31 }
 0x574   : > { %5065 = vmatprep.subr.bf16.mxu1 %v6881_v5  ;;  %v6909_v5 = vld [vmem:[%s9660_s8 + $0x110] ss:$8 sps:$4 sm:$0xff]  }
 0x577   : > { %5066 = vmatpush1.bf16.msra.mxu1 %v6879_v14  ;;  %v6920_v14 = vld [vmem:[%s9660_s8 + $0x354] ss:$8 sps:$4 sm:$0xff]  }
 0x578   : > { %5067 = vmatprep.subr.bf16.mxu1 %v6887_v52  ;;  %v6926_v52 = vld [vmem:[%s9660_s8 + $0x364] ss:$8 sps:$4 sm:$0xff]  }
 0x57b   : > { %5068 = vmatpush1.bf16.msra.mxu1 %v6885_v12  ;;  %v6923_v12 = vld [vmem:[%s9660_s8 + $0x134] ss:$8 sps:$4 sm:$0xff]  }
 0x57c   : > { %5069 = vmatprep.subr.bf16.mxu1 %v6893_v35  ;;  %v6927_v35 = vld [vmem:[%s9660_s8 + $0x140] ss:$8 sps:$4 sm:$0xff]  }
 0x57f   : > { %5070 = vmatpush1.bf16.msra.mxu1 %v6891_v7  ;;  %v6932_v7 = vld [vmem:[%s9660_s8 + $0x374] ss:$8 sps:$4 sm:$0xff]  }
 0x580   : > { %5071 = vmatprep.subr.bf16.mxu1 %v6899_v8  ;;  %v6933_v8 = vld [vmem:[%s9660_s8 + $0x150] ss:$8 sps:$4 sm:$0xff]  }
 0x583   : > { %5072 = vmatpush1.bf16.msra.mxu1 %v6897_v39  ;;  %v6938_v39 = vld [vmem:[%s9660_s8 + $0x384] ss:$8 sps:$4 sm:$0xff]  }
 0x584   : > { %5082 = vmatprep.subr.bf16.mxu1 %v6905_v43  ;;  %v6939_v43 = vld [vmem:[%s9660_s8 + $0x160] ss:$8 sps:$4 sm:$0xff]  }
 0x619   : > { %v6558_v32 = vpop.f32.mrb[140].mxu1 }
 0x61a   : > { %v3710_v23 = vpop.f32.mrb[141].mxu1 }
 0x61b   : > { %v6559_v62 = vpop.f32.mrb[142].mxu1 }
 0x61c   : > { %v9077_v54 = vpack.c.bf16 %v6559_v62, %v6558_v32  ;;  %v3713_v36 = vpop.f32.mrb[143].mxu1  ;;  %v6924_v32 = vld [vmem:[%s9660_s8 + $0x360] ss:$8 sps:$4 sm:$0xff]   ;;  %v6930_v62 = vld [vmem:[%s9660_s8 + $0x370] ss:$8 sps:$4 sm:$0xff]  }
 0x61d   : > { %v9079_v28 = vpack.c.bf16 %v3713_v36, %v3710_v23  ;;  %v6929_v23 = vld [vmem:[%s9660_s8 + $0x144] ss:$8 sps:$4 sm:$0xff]   ;;  %v6935_v36 = vld [vmem:[%s9660_s8 + $0x154] ss:$8 sps:$4 sm:$0xff]  }
 0x61e   : > { %v3793_v26 = vshrl.u32 %v9077_v54, 16 }
 0x61f   : > { %v3728_v6 = vshrl.u32 %v9079_v28, 16  ;;  %v3745_v42 = vrot.slane %v9079_v28, 4  ;;  %v3749_v46 = vrot.slane %v9079_v28, 5  ;;  %v3757_v24 = vrot.slane %v9079_v28, 7 }
 0x620   : > { %v3799_v19 = vrot.slane %v3793_v26, 1  ;;  %v3803_v45 = vrot.slane %v3793_v26, 2  ;;  %v3807_v17 = vrot.slane %v3793_v26, 3  ;;  %v3733_v38 = vrot.slane %v9079_v28, 1 }
 0x621   : > { %v3750_v34 = vrot.slane %v3728_v6, 5  ;;  %v3746_v57 = vrot.slane %v3728_v6, 4  ;;  %v3758_v47 = vrot.slane %v3728_v6, 7  ;;  %v3754_v0 = vrot.slane %v3728_v6, 6 }
 0x622   : > { %v3734_v10 = vrot.slane %v3728_v6, 1  ;;  %v3738_v63 = vrot.slane %v3728_v6, 2  ;;  %v3742_v40 = vrot.slane %v3728_v6, 3  ;;  %v3741_v16 = vrot.slane %v9079_v28, 3 }
 0x623   : > { %3751 = vrot.lane.b32.xlu1 %v3750_v34, %s9680_s26  ;;  %3747 = vrot.lane.b32.xlu0 %v3746_v57, %s9680_s26  ;;  %v6941_v34 = vld [vmem:[%s9660_s8 + $0x164] ss:$8 sps:$4 sm:$0xff]   ;;  %v6944_v57 = vld [vmem:[%s9660_s8 + $0x394] ss:$8 sps:$4 sm:$0xff]  }
 0x627   : > { %3759 = vrot.lane.b32.xlu1 %v3758_v47, %s9680_s26  ;;  %3755 = vrot.lane.b32.xlu0 %v3754_v0, %s9680_s26  ;;  %v6942_v47 = vld [vmem:[%s9660_s8 + $0x390] ss:$8 sps:$4 sm:$0xff]   ;;  %v6947_v0 = vld [vmem:[%s9660_s8 + $0x174] ss:$8 sps:$4 sm:$0xff]  }
 0x62b   : > { %3800 = vrot.lane.b32.xlu1 %v3799_v19, %s9680_s26  ;;  %3795 = vrot.lane.b32.xlu0 %v3793_v26, %s9680_s26  ;;  %v6950_v26 = vld [vmem:[%s9660_s8 + $0x3a4] ss:$8 sps:$4 sm:$0xff]   ;;  %v6945_v19 = vld [vmem:[%s9660_s8 + $0x170] ss:$8 sps:$4 sm:$0xff]  }
 0x62f   : > { %3730 = vrot.lane.b32.xlu0 %v3728_v6, %s9680_s26  ;;  %3735 = vrot.lane.b32.xlu1 %v3734_v10, %s9680_s26  ;;  %v6936_v6 = vld [vmem:[%s9660_s8 + $0x380] ss:$8 sps:$4 sm:$0xff]  }
 0x630   : > { %v6948_v10 = vld [vmem:[%s9660_s8 + $0x3a0] ss:$8 sps:$4 sm:$0xff]  }
 0x633   : > { %3804 = vrot.lane.b32.xlu0 %v3803_v45, %s9680_s26  ;;  %3808 = vrot.lane.b32.xlu1 %v3807_v17, %s9680_s26  ;;  %v6953_v45 = vld [vmem:[%s9660_s8 + $0x184] ss:$8 sps:$4 sm:$0xff]   ;;  %v6956_v17 = vld [vmem:[%s9660_s8 + $0x3b4] ss:$8 sps:$4 sm:$0xff]  }
 0x637   : > { %3739 = vrot.lane.b32.xlu0 %v3738_v63, %s9680_s26  ;;  %3743 = vrot.lane.b32.xlu1 %v3742_v40, %s9680_s26  ;;  %v6951_v63 = vld [vmem:[%s9660_s8 + $0x180] ss:$8 sps:$4 sm:$0xff]   ;;  %v6954_v40 = vld [vmem:[%s9660_s8 + $0x3b0] ss:$8 sps:$4 sm:$0xff]   ;;  %s7114_s26 = scalar_lea.vmem %s9610_s17, 16 }
 0x638   : > { %p7115_p13 = scmp.ne.s32.totalorder %s9610_s17, %s7114_s26  ;;  %p7122_p3 = scmp.lt.s32.totalorder %s7120_s19, %s7114_s26 }
 0x63a   : > { %p7116_p0 = pnand %p7115_p13, %p7288_p6  ;;  %p7123_p4 = por %p7122_p3, %p7121_p2 }
 0x63c   : > { %p7117_p1 = pneg %p7116_p0 }
 0x63e   : > { %p7124_p5 = pnand %p7123_p4, %p7117_p1 }
 0x695   : > { %v3752_v27 = vpop.permute.xlu1 %3751  ;;  %v3748_v9 = vpop.permute.xlu0 %3747 }
 0x696   : > { %v3778_v18 = vsel %vm2049_vm14, %v3745_v42, %v3748_v9  ;;  %v3782_v49 = vsel %vm2049_vm14, %v3749_v46, %v3752_v27  ;;  %v6959_v42 = vld [vmem:[%s9660_s8 + $0x194] ss:$8 sps:$4 sm:$0xff]   ;;  %v6962_v46 = vld [vmem:[%s9660_s8 + $0x3c4] ss:$8 sps:$4 sm:$0xff]   ;;  %v6957_v27 = vld [vmem:[%s9660_s8 + $0x190] ss:$8 sps:$4 sm:$0xff]  }
 0x697   : > { %5155 = vmatprep.mubr.bf16.mxu0 %v3782_v49  ;;  %v6960_v9 = vld [vmem:[%s9660_s8 + $0x3c0] ss:$8 sps:$4 sm:$0xff]  }
 0x698   : > { %5156 = vmatmul.mubr.bf16.vlgmr.msra.gmra.mrb[112].mxu0 %v3778_v18  ;;  %v6968_v18 = vld [vmem:[%s9660_s8 + $0x3d4] ss:$8 sps:$4 sm:$0xff]   ;;  %v6963_v49 = vld [vmem:[%s9660_s8 + $0x1a0] ss:$8 sps:$4 sm:$0xff]  }
 0x699   : > { %5165 = vmatpush1.bf16.msra.mxu0 %v6888_v58  ;;  %v3760_v37 = vpop.permute.xlu1 %3759  ;;  %v9115_v20 = vpop.permute.xlu0 %3755  ;;  %v6965_v58 = vld [vmem:[%s9660_s8 + $0x1a4] ss:$8 sps:$4 sm:$0xff]  }
 0x69a   : > { %5166 = vmatprep.subr.bf16.mxu0 %v6896_v50  ;;  %v3790_v60 = vsel %vm2049_vm14, %v3757_v24, %v3760_v37  ;;  %v6966_v50 = vld [vmem:[%s9660_s8 + $0x3d0] ss:$8 sps:$4 sm:$0xff]   ;;  %v6971_v24 = vld [vmem:[%s9660_s8 + $0x1b4] ss:$8 sps:$4 sm:$0xff]   ;;  %v6974_v37 = vld [vmem:[%s9660_s8 + $0x3e4] ss:$8 sps:$4 sm:$0xff]  }
 0x69b   : > { %5196 = vmatprep.mubr.bf16.mxu0 %v3790_v60  ;;  %v6972_v60 = vld [vmem:[%s9660_s8 + $0x3e0] ss:$8 sps:$4 sm:$0xff]  }
 0x69d   : > { %5167 = vmatpush1.bf16.msra.mxu0 %v6894_v4  ;;  %v9124_v3 = vpop.permute.xlu1 %3800  ;;  %v9126_v33 = vpop.permute.xlu0 %3795  ;;  %v6969_v4 = vld [vmem:[%s9660_s8 + $0x1b0] ss:$8 sps:$4 sm:$0xff]  }
 0x69e   : > { %5168 = vmatprep.subr.bf16.mxu0 %v6902_v55  ;;  %v6977_v55 = vld [vmem:[%s9660_s8 + $0x1c4] ss:$8 sps:$4 sm:$0xff]  }
 0x6a1   : > { %5169 = vmatpush1.bf16.msra.mxu0 %v6900_v41  ;;  %v3731_v25 = vpop.permute.xlu0 %3730  ;;  %v3736_v51 = vpop.permute.xlu1 %3735  ;;  %v6980_v41 = vld [vmem:[%s9660_s8 + $0x3f4] ss:$8 sps:$4 sm:$0xff]  }
 0x6a2   : > { %v3762_v29 = vsel %vm2049_vm14, %v9079_v28, %v3731_v25  ;;  %v3766_v2 = vsel %vm2049_vm14, %v3733_v38, %v3736_v51  ;;  %5170 = vmatprep.subr.bf16.mxu0 %v6908_v56  ;;  %v6975_v56 = vld [vmem:[%s9660_s8 + $0x1c0] ss:$8 sps:$4 sm:$0xff]   ;;  %v6978_v38 = vld [vmem:[%s9660_s8 + $0x3f0] ss:$8 sps:$4 sm:$0xff]   ;;  %v6983_v25 = vld [vmem:[%s9660_s8 + $0x1d4] ss:$8 sps:$4 sm:$0xff]  }
 0x6a3   : > { %5073 = vmatprep.mubr.bf16.mxu1 %v3766_v2  ;;  %v6986_v51 = vld [vmem:[%s9660_s8 + $0x404] ss:$8 sps:$4 sm:$0xff]  }
 0x6a4   : > { %5074 = vmatmul.mubr.bf16.vlgmr.msra.gmra.mrb[144].mxu1 %v3762_v29  ;;  %v6984_v29 = vld [vmem:[%s9660_s8 + $0x400] ss:$8 sps:$4 sm:$0xff]   ;;  %v6989_v2 = vld [vmem:[%s9660_s8 + $0x1e4] ss:$8 sps:$4 sm:$0xff]  }
 0x6a5   : > { %5083 = vmatpush1.bf16.msra.mxu1 %v6903_v11  ;;  %5171 = vmatpush1.bf16.msra.mxu0 %v6906_v13  ;;  %v9150_v31 = vpop.permute.xlu1 %3808  ;;  %v3753_v11 = vrot.slane %v9079_v28, 6  ;;  %v6981_v13 = vld [vmem:[%s9660_s8 + $0x1d0] ss:$8 sps:$4 sm:$0xff]  }
 0x6a6   : > { %5084 = vmatprep.subr.bf16.mxu1 %v6911_v44  ;;  %5172 = vmatprep.subr.bf16.mxu0 %v6914_v21  ;;  %v3798_v21 = vrot.slane %v9077_v54, 1 }
 0x6a7   : > { %v3786_v44 = vsel %vm2049_vm14, %v3753_v11, %v9115_v20  ;;  %v6990_v20 = vld [vmem:[%s9660_s8 + $0x410] ss:$8 sps:$4 sm:$0xff]  }
 0x6a8   : > { %v7059_v11 = vld [vmem:[%s9660_s8 + $0x570] ss:$8 sps:$4 sm:$0xff]  }
 0x6a9   : > { %5085 = vmatpush1.bf16.msra.mxu1 %v6909_v5  ;;  %5173 = vmatpush1.bf16.msra.mxu0 %v6912_v59  ;;  %v3744_v53 = vpop.permute.xlu1 %3743  ;;  %v6992_v5 = vld [vmem:[%s9660_s8 + $0x414] ss:$8 sps:$4 sm:$0xff]   ;;  %v3816_v59 = vsel %vm2049_vm14, %v3798_v21, %v9124_v3  ;;  %v6998_v3 = vld [vmem:[%s9660_s8 + $0x424] ss:$8 sps:$4 sm:$0xff]  }
 0x6aa   : > { %5086 = vmatprep.subr.bf16.mxu1 %v6917_v48  ;;  %v3774_v30 = vsel %vm2049_vm14, %v3741_v16, %v3744_v53  ;;  %5174 = vmatprep.subr.bf16.mxu0 %v6920_v14  ;;  %v6987_v48 = vld [vmem:[%s9660_s8 + $0x1e0] ss:$8 sps:$4 sm:$0xff]   ;;  %v9322_v14 = vpop.permute.xlu0 %3804  ;;  %v6995_v16 = vld [vmem:[%s9660_s8 + $0x1f4] ss:$8 sps:$4 sm:$0xff]   ;;  %v6993_v53 = vld [vmem:[%s9660_s8 + $0x1f0] ss:$8 sps:$4 sm:$0xff]  }
 0x6ab   : > { %5114 = vmatprep.mubr.bf16.mxu1 %v3774_v30  ;;  %v7070_v21 = vld [vmem:[%s9660_s8 + $0x5a4] ss:$8 sps:$4 sm:$0xff]  }
 0x6ad   : > { %5087 = vmatpush1.bf16.msra.mxu1 %v6915_v22  ;;  %5175 = vmatpush1.bf16.msra.mxu0 %v6918_v15  ;;  %v6996_v22 = vld [vmem:[%s9660_s8 + $0x420] ss:$8 sps:$4 sm:$0xff]   ;;  %v7001_v15 = vld [vmem:[%s9660_s8 + $0x434] ss:$8 sps:$4 sm:$0xff]  }
 0x6ae   : > { %5088 = vmatprep.subr.bf16.mxu1 %v6923_v12  ;;  %5176 = vmatprep.subr.bf16.mxu0 %v6926_v52  ;;  %v3740_v30 = vpop.permute.xlu0 %3739  ;;  %v3737_v12 = vrot.slane %v9079_v28, 2  ;;  %v6999_v52 = vld [vmem:[%s9660_s8 + $0x430] ss:$8 sps:$4 sm:$0xff]   ;;  %v7007_v28 = vld [vmem:[%s9660_s8 + $0x454] ss:$8 sps:$4 sm:$0xff]  }
 0x6b1   : > { %5089 = vmatpush1.bf16.msra.mxu1 %v6921_v61  ;;  %5177 = vmatpush1.bf16.msra.mxu0 %v6924_v32  ;;  %v7004_v61 = vld [vmem:[%s9660_s8 + $0x444] ss:$8 sps:$4 sm:$0xff]   ;;  %v3770_v32 = vsel %vm2049_vm14, %v3737_v12, %v3740_v30  ;;  %v7104_v12 = vld [vmem:[%s9662_s10 + $0x58] sm:$0xff]  }
 0x6b2   : > { %5090 = vmatprep.subr.bf16.mxu1 %v6929_v23  ;;  %5178 = vmatprep.subr.bf16.mxu0 %v6932_v7  ;;  %v7002_v23 = vld [vmem:[%s9660_s8 + $0x440] ss:$8 sps:$4 sm:$0xff]   ;;  %v7005_v7 = vld [vmem:[%s9660_s8 + $0x450] ss:$8 sps:$4 sm:$0xff]   ;;  %v7076_v30 = vld [vmem:[%s9660_s8 + $0x5c4] ss:$8 sps:$4 sm:$0xff]  }
 0x6b5   : > { %5091 = vmatpush1.bf16.msra.mxu1 %v6927_v35  ;;  %5179 = vmatpush1.bf16.msra.mxu0 %v6930_v62  ;;  %v7010_v35 = vld [vmem:[%s9660_s8 + $0x464] ss:$8 sps:$4 sm:$0xff]   ;;  %v7008_v62 = vld [vmem:[%s9660_s8 + $0x460] ss:$8 sps:$4 sm:$0xff]  }
 0x6b6   : > { %5092 = vmatprep.subr.bf16.mxu1 %v6935_v36  ;;  %5180 = vmatprep.subr.bf16.mxu0 %v6938_v39  ;;  %v7013_v36 = vld [vmem:[%s9660_s8 + $0x474] ss:$8 sps:$4 sm:$0xff]   ;;  %v7011_v39 = vld [vmem:[%s9660_s8 + $0x470] ss:$8 sps:$4 sm:$0xff]  }
 0x6b9   : > { %5093 = vmatpush1.bf16.msra.mxu1 %v6933_v8  ;;  %5181 = vmatpush1.bf16.msra.mxu0 %v6936_v6  ;;  %v7016_v8 = vld [vmem:[%s9660_s8 + $0x484] ss:$8 sps:$4 sm:$0xff]   ;;  %v7014_v6 = vld [vmem:[%s9660_s8 + $0x480] ss:$8 sps:$4 sm:$0xff]  }
 0x6ba   : > { %5094 = vmatprep.subr.bf16.mxu1 %v6941_v34  ;;  %5182 = vmatprep.subr.bf16.mxu0 %v6944_v57  ;;  %v7019_v34 = vld [vmem:[%s9660_s8 + $0x494] ss:$8 sps:$4 sm:$0xff]   ;;  %v7017_v57 = vld [vmem:[%s9660_s8 + $0x490] ss:$8 sps:$4 sm:$0xff]  }
 0x6bd   : > { %5095 = vmatpush1.bf16.msra.mxu1 %v6939_v43  ;;  %5183 = vmatpush1.bf16.msra.mxu0 %v6942_v47  ;;  %v7022_v43 = vld [vmem:[%s9660_s8 + $0x4a4] ss:$8 sps:$4 sm:$0xff]   ;;  %v7020_v47 = vld [vmem:[%s9660_s8 + $0x4a0] ss:$8 sps:$4 sm:$0xff]  }
 0x6be   : > { %5096 = vmatprep.subr.bf16.mxu1 %v6947_v0  ;;  %5184 = vmatprep.subr.bf16.mxu0 %v6950_v26  ;;  %v7025_v0 = vld [vmem:[%s9660_s8 + $0x4b4] ss:$8 sps:$4 sm:$0xff]   ;;  %v7023_v26 = vld [vmem:[%s9660_s8 + $0x4b0] ss:$8 sps:$4 sm:$0xff]  }
 0x6c1   : > { %5097 = vmatpush1.bf16.msra.mxu1 %v6945_v19  ;;  %5185 = vmatpush1.bf16.msra.mxu0 %v6948_v10  ;;  %v7028_v19 = vld [vmem:[%s9660_s8 + $0x4c4] ss:$8 sps:$4 sm:$0xff]   ;;  %v7026_v10 = vld [vmem:[%s9660_s8 + $0x4c0] ss:$8 sps:$4 sm:$0xff]  }
 0x6c2   : > { %5098 = vmatprep.subr.bf16.mxu1 %v6953_v45  ;;  %5186 = vmatprep.subr.bf16.mxu0 %v6956_v17  ;;  %v7031_v45 = vld [vmem:[%s9660_s8 + $0x4d4] ss:$8 sps:$4 sm:$0xff]   ;;  %v7029_v17 = vld [vmem:[%s9660_s8 + $0x4d0] ss:$8 sps:$4 sm:$0xff]  }
 0x6c5   : > { %5099 = vmatpush1.bf16.msra.mxu1 %v6951_v63  ;;  %5187 = vmatpush1.bf16.msra.mxu0 %v6954_v40  ;;  %v7034_v63 = vld [vmem:[%s9660_s8 + $0x4e4] ss:$8 sps:$4 sm:$0xff]   ;;  %v7032_v40 = vld [vmem:[%s9660_s8 + $0x4e0] ss:$8 sps:$4 sm:$0xff]  }
 0x6c6   : > { %5100 = vmatprep.subr.bf16.mxu1 %v6959_v42  ;;  %5188 = vmatprep.subr.bf16.mxu0 %v6962_v46  ;;  %v7037_v42 = vld [vmem:[%s9660_s8 + $0x4f4] ss:$8 sps:$4 sm:$0xff]   ;;  %v7035_v46 = vld [vmem:[%s9660_s8 + $0x4f0] ss:$8 sps:$4 sm:$0xff]  }
 0x6c9   : > { %5101 = vmatpush1.bf16.msra.mxu1 %v6957_v27  ;;  %5189 = vmatpush1.bf16.msra.mxu0 %v6960_v9  ;;  %v7040_v27 = vld [vmem:[%s9660_s8 + $0x504] ss:$8 sps:$4 sm:$0xff]   ;;  %v7038_v9 = vld [vmem:[%s9660_s8 + $0x500] ss:$8 sps:$4 sm:$0xff]  }
 0x6ca   : > { %5102 = vmatprep.subr.bf16.mxu1 %v6965_v58  ;;  %5190 = vmatprep.subr.bf16.mxu0 %v6968_v18  ;;  %v3806_v58 = vrot.slane %v9077_v54, 3  ;;  %v7043_v18 = vld [vmem:[%s9660_s8 + $0x514] ss:$8 sps:$4 sm:$0xff]  }
 0x6cd   : > { %5103 = vmatpush1.bf16.msra.mxu1 %v6963_v49  ;;  %5191 = vmatpush1.bf16.msra.mxu0 %v6966_v50  ;;  %v3812_v49 = vsel %vm2049_vm14, %v9077_v54, %v9126_v33  ;;  %v3824_v50 = vsel %vm2049_vm14, %v3806_v58, %v9150_v31  ;;  %v7044_v33 = vld [vmem:[%s9660_s8 + $0x520] ss:$8 sps:$4 sm:$0xff]   ;;  %v7049_v31 = vld [vmem:[%s9660_s8 + $0x534] ss:$8 sps:$4 sm:$0xff]   ;;  %v5028_v58 = vlaneseq }
 0x6ce   : > { %5104 = vmatprep.subr.bf16.mxu1 %v6971_v24  ;;  %5192 = vmatprep.subr.bf16.mxu0 %v6974_v37  ;;  %v7041_v24 = vld [vmem:[%s9660_s8 + $0x510] ss:$8 sps:$4 sm:$0xff]   ;;  %v7046_v37 = vld [vmem:[%s9660_s8 + $0x524] ss:$8 sps:$4 sm:$0xff]  }
 0x6d1   : > { %5105 = vmatpush1.bf16.msra.mxu1 %v6969_v4  ;;  %5193 = vmatpush1.bf16.msra.mxu0 %v6972_v60  ;;  %v7047_v4 = vld [vmem:[%s9660_s8 + $0x530] ss:$8 sps:$4 sm:$0xff]   ;;  %v7052_v60 = vld [vmem:[%s9660_s8 + $0x544] ss:$8 sps:$4 sm:$0xff]  }
 0x6d2   : > { %5106 = vmatprep.subr.bf16.mxu1 %v6977_v55  ;;  %5194 = vmatprep.subr.bf16.mxu0 %v6980_v41  ;;  %v7050_v55 = vld [vmem:[%s9660_s8 + $0x540] ss:$8 sps:$4 sm:$0xff]   ;;  %v7055_v41 = vld [vmem:[%s9660_s8 + $0x554] ss:$8 sps:$4 sm:$0xff]  }
 0x6d5   : > { %5107 = vmatpush1.bf16.msra.mxu1 %v6975_v56  ;;  %5195 = vmatpush1.bf16.msra.mxu0 %v6978_v38  ;;  %v7053_v56 = vld [vmem:[%s9660_s8 + $0x550] ss:$8 sps:$4 sm:$0xff]   ;;  %v7058_v38 = vld [vmem:[%s9660_s8 + $0x564] ss:$8 sps:$4 sm:$0xff]  }
 0x6d6   : > { %5108 = vmatprep.subr.bf16.mxu1 %v6983_v25  ;;  %5205 = vmatprep.subr.bf16.mxu0 %v6986_v51  ;;  %v7056_v25 = vld [vmem:[%s9660_s8 + $0x560] ss:$8 sps:$4 sm:$0xff]   ;;  %v7061_v51 = vld [vmem:[%s9660_s8 + $0x574] ss:$8 sps:$4 sm:$0xff]  }
 0x6d8   : > { %5197 = vmatmul.mubr.bf16.vlgmr.msra.gmra.mrb[112].mxu0 %v3786_v44  ;;  %v7065_v44 = vld [vmem:[%s9660_s8 + $0x590] ss:$8 sps:$4 sm:$0xff]  }
 0x6d9   : > { %5109 = vmatpush1.bf16.msra.mxu1 %v6981_v13  ;;  %5206 = vmatpush1.bf16.msra.mxu0 %v6984_v29  ;;  %v7064_v13 = vld [vmem:[%s9660_s8 + $0x584] ss:$8 sps:$4 sm:$0xff]   ;;  %v7062_v29 = vld [vmem:[%s9660_s8 + $0x580] ss:$8 sps:$4 sm:$0xff]  }
 0x6da   : > { %5237 = vmatprep.mubr.bf16.mxu0 %v3816_v59  ;;  %5110 = vmatprep.subr.bf16.mxu1 %v6989_v2  ;;  %v7067_v2 = vld [vmem:[%s9660_s8 + $0x594] ss:$8 sps:$4 sm:$0xff]   ;;  %v7099_v59 = vld [vmem:[%s9662_s10] sm:$0xff]  }
 0x6db   : > { %5207 = vmatprep.subr.bf16.mxu0 %v6992_v5  ;;  %v7098_v5 = vld [vmem:[%s9662_s10 + $0x40] sm:$0xff]  }
 0x6dd   : > { %5111 = vmatpush1.bf16.msra.mxu1 %v6987_v48  ;;  %5208 = vmatpush1.bf16.msra.mxu0 %v6990_v20  ;;  %v7100_v48 = vld [vmem:[%s9662_s10 + $0x48] sm:$0xff]  }
 0x6de   : > { %5112 = vmatprep.subr.bf16.mxu1 %v6995_v16  ;;  %5209 = vmatprep.subr.bf16.mxu0 %v6998_v3  ;;  %v7068_v20 = vld [vmem:[%s9660_s8 + $0x5a0] ss:$8 sps:$4 sm:$0xff]   ;;  %v7073_v3 = vld [vmem:[%s9660_s8 + $0x5b4] ss:$8 sps:$4 sm:$0xff]  }
 0x6df   : > { %v7101_v16 = vld [vmem:[%s9662_s10 + $0x8] sm:$0xff]  }
 0x6e1   : > { %5113 = vmatpush1.bf16.msra.mxu1 %v6993_v53  ;;  %5210 = vmatpush1.bf16.msra.mxu0 %v6996_v22  ;;  %v7102_v53 = vld [vmem:[%s9662_s10 + $0x50] sm:$0xff]  }
 0x6e2   : > { %5211 = vmatprep.subr.bf16.mxu0 %v7001_v15  ;;  %6484 = vmatprep.subr.bf16.mxu1 %v7098_v5  ;;  %v7071_v22 = vld [vmem:[%s9660_s8 + $0x5b0] ss:$8 sps:$4 sm:$0xff]  }
 0x6e3   : > { %v7103_v15 = vld [vmem:[%s9662_s10 + $0x10] sm:$0xff]  }
 0x6e4   : > { %5115 = vmatmul.mubr.bf16.vlgmr.msra.gmra.mrb[144].mxu1 %v3770_v32  ;;  %v7079_v32 = vld [vmem:[%s9660_s8 + $0x5d4] ss:$8 sps:$4 sm:$0xff]  }
 0x6e5   : > { %5212 = vmatpush1.bf16.msra.mxu0 %v6999_v52  ;;  %6485 = vmatpush3.bf16.msra.mxu1 %v7099_v59  ;;  %v7074_v52 = vld [vmem:[%s9660_s8 + $0x5c0] ss:$8 sps:$4 sm:$0xff]  }
 0x6e6   : > { %5213 = vmatprep.subr.bf16.mxu0 %v7004_v61  ;;  %6486 = vmatprep.subr.bf16.mxu1 %v7100_v48  ;;  %v7105_v61 = vld [vmem:[%s9662_s10 + $0x18] sm:$0xff]  }
 0x6e9   : > { %5214 = vmatpush1.bf16.msra.mxu0 %v7002_v23  ;;  %6487 = vmatpush3.bf16.msra.mxu1 %v7101_v16  ;;  %v7106_v23 = vld [vmem:[%s9662_s10 + $0x60] sm:$0xff]  }
 0x6ea   : > { %5215 = vmatprep.subr.bf16.mxu0 %v7007_v28  ;;  %6488 = vmatprep.subr.bf16.mxu1 %v7102_v53  ;;  %v7077_v28 = vld [vmem:[%s9660_s8 + $0x5d0] ss:$8 sps:$4 sm:$0xff]  }
 0x6ed   : > { %5216 = vmatpush1.bf16.msra.mxu0 %v7005_v7  ;;  %6489 = vmatpush3.bf16.msra.mxu1 %v7103_v15  ;;  %v7107_v7 = vld [vmem:[%s9662_s10 + $0x20] sm:$0xff]  }
 0x6ee   : > { %5217 = vmatprep.subr.bf16.mxu0 %v7010_v35  ;;  %6490 = vmatprep.subr.bf16.mxu1 %v7104_v12  ;;  %v7082_v35 = vld [vmem:[%s9660_s8 + $0x5e4] ss:$8 sps:$4 sm:$0xff]  }
 0x6f1   : > { %5218 = vmatpush1.bf16.msra.mxu0 %v7008_v62  ;;  %6491 = vmatpush3.bf16.msra.mxu1 %v7105_v61  ;;  %v7108_v62 = vld [vmem:[%s9662_s10 + $0x68] sm:$0xff]  }
 0x6f2   : > { %5219 = vmatprep.subr.bf16.mxu0 %v7013_v36  ;;  %6492 = vmatprep.subr.bf16.mxu1 %v7106_v23  ;;  %v7080_v36 = vld [vmem:[%s9660_s8 + $0x5e0] ss:$8 sps:$4 sm:$0xff]  }
 0x6f5   : > { %5220 = vmatpush1.bf16.msra.mxu0 %v7011_v39  ;;  %6493 = vmatpush3.bf16.msra.mxu1 %v7107_v7  ;;  %v7109_v39 = vld [vmem:[%s9662_s10 + $0x28] sm:$0xff]  }
 0x6f6   : > { %5221 = vmatprep.subr.bf16.mxu0 %v7016_v8  ;;  %v7085_v8 = vld [vmem:[%s9660_s8 + $0x5f4] ss:$8 sps:$4 sm:$0xff]   ;;  %6494 = vmatprep.subr.bf16.mxu1 %v7108_v62 }
 0x6f9   : > { %5222 = vmatpush1.bf16.msra.mxu0 %v7014_v6  ;;  %v7083_v6 = vld [vmem:[%s9660_s8 + $0x5f0] ss:$8 sps:$4 sm:$0xff]   ;;  %6495 = vmatpush3.bf16.msra.mxu1 %v7109_v39 }
 0x6fa   : > { %5223 = vmatprep.subr.bf16.mxu0 %v7019_v34  ;;  %v7088_v34 = vld [vmem:[%s9660_s8 + $0x604] ss:$8 sps:$4 sm:$0xff]  }
 0x6fd   : > { %5224 = vmatpush1.bf16.msra.mxu0 %v7017_v57  ;;  %v3802_v57 = vrot.slane %v9077_v54, 2 }
 0x6fe   : > { %5225 = vmatprep.subr.bf16.mxu0 %v7022_v43  ;;  %v7086_v43 = vld [vmem:[%s9660_s8 + $0x600] ss:$8 sps:$4 sm:$0xff]  }
 0x701   : > { %5226 = vmatpush1.bf16.msra.mxu0 %v7020_v47  ;;  %v7091_v47 = vld [vmem:[%s9660_s8 + $0x614] ss:$8 sps:$4 sm:$0xff]  }
 0x702   : > { %5227 = vmatprep.subr.bf16.mxu0 %v7025_v0  ;;  %v3820_v0 = vsel %vm2049_vm14, %v3802_v57, %v9322_v14  ;;  %v7097_v14 = vld [vmem:[%s9660_s8 + $0x634] ss:$8 sps:$4 sm:$0xff]  }
 0x705   : > { %5228 = vmatpush1.bf16.msra.mxu0 %v7023_v26  ;;  %v7089_v26 = vld [vmem:[%s9660_s8 + $0x610] ss:$8 sps:$4 sm:$0xff]  }
 0x706   : > { %5229 = vmatprep.subr.bf16.mxu0 %v7028_v19  ;;  %v7094_v19 = vld [vmem:[%s9660_s8 + $0x624] ss:$8 sps:$4 sm:$0xff]  }
 0x709   : > { %5230 = vmatpush1.bf16.msra.mxu0 %v7026_v10  ;;  %v7092_v10 = vld [vmem:[%s9660_s8 + $0x620] ss:$8 sps:$4 sm:$0xff]  }
 0x70a   : > { %5231 = vmatprep.subr.bf16.mxu0 %v7031_v45  ;;  %v3810_v45 = vrot.slane %v9077_v54, 4  ;;  %v7113_v54 = vld [vmem:[%s9662_s10 + $0x38] sm:$0xff]  }
 0x70d   : > { %5232 = vmatpush1.bf16.msra.mxu0 %v7029_v17 }
 0x70e   : > { %5233 = vmatprep.subr.bf16.mxu0 %v7034_v63 }
 0x711   : > { %5234 = vmatpush1.bf16.msra.mxu0 %v7032_v40 }
 0x712   : > { %5235 = vmatprep.subr.bf16.mxu0 %v7037_v42 }
 0x715   : > { %5236 = vmatpush1.bf16.msra.mxu0 %v7035_v46  ;;  %v7110_v46 = vld [vmem:[%s9662_s10 + $0x70] sm:$0xff]  }
 0x716   : > { %5246 = vmatprep.subr.bf16.mxu0 %v7040_v27  ;;  %v7111_v27 = vld [vmem:[%s9662_s10 + $0x30] sm:$0xff]   ;;  %6496 = vmatprep.subr.bf16.mxu1 %v7110_v46 }
 0x717   : > { %6497 = vmatpush3.bf16.msra.mxu1 %v7111_v27 }
 0x718   : > { %5238 = vmatmul.mubr.bf16.vlgmr.msra.gmra.mrb[112].mxu0 %v3812_v49 }
 0x719   : > { %5247 = vmatpush1.bf16.msra.mxu0 %v7038_v9  ;;  %5278 = vmatprep.mubr.bf16.mxu0 %v3824_v50  ;;  %v7112_v9 = vld [vmem:[%s9662_s10 + $0x78] sm:$0xff]   ;;  %v4026_v50 = vld [vmem:[%s9661_s9] sm:$0x3] }
 0x71a   : > { %5248 = vmatprep.subr.bf16.mxu0 %v7043_v18  ;;  %6498 = vmatprep.subr.bf16.mxu1 %v7112_v9  ;;  %v5029_v18 = vshrl.u32 %v5028_v58, 7 }
 0x71b   : > { %6499 = vmatpush3.bf16.msra.mxu1 %v7113_v54 }
 0x71c   : > { %v5030_v49 = vsub.s32 0, %v5029_v18 }
 0x71d   : > { %5249 = vmatpush1.bf16.msra.mxu0 %v7041_v24  ;;  %v5034_v24 = vsub.s32 1, %v5029_v18 }
 0x71e   : > { %5250 = vmatprep.subr.bf16.mxu0 %v7046_v37  ;;  %v5031_v37 = vrot.slane %v4026_v50, %v5030_v49 }
 0x721   : > { %5251 = vmatpush1.bf16.msra.mxu0 %v7044_v33  ;;  %v5035_v33 = vrot.slane %v4026_v50, %v5034_v24 }
 0x722   : > { %5252 = vmatprep.subr.bf16.mxu0 %v7049_v31 }
 0x725   : > { %5253 = vmatpush1.bf16.msra.mxu0 %v7047_v4 }
 0x726   : > { %5254 = vmatprep.subr.bf16.mxu0 %v7052_v60 }
 0x729   : > { %5255 = vmatpush1.bf16.msra.mxu0 %v7050_v55 }
 0x72a   : > { %5256 = vmatprep.subr.bf16.mxu0 %v7055_v41 }
 0x72d   : > { %5257 = vmatpush1.bf16.msra.mxu0 %v7053_v56 }
 0x72e   : > { %5258 = vmatprep.subr.bf16.mxu0 %v7058_v38 }
 0x731   : > { %5259 = vmatpush1.bf16.msra.mxu0 %v7056_v25 }
 0x732   : > { %5260 = vmatprep.subr.bf16.mxu0 %v7061_v51 }
 0x735   : > { %5261 = vmatpush1.bf16.msra.mxu0 %v7059_v11 }
 0x736   : > { %5262 = vmatprep.subr.bf16.mxu0 %v7064_v13 }
 0x739   : > { %5263 = vmatpush1.bf16.msra.mxu0 %v7062_v29 }
 0x73a   : > { %5264 = vmatprep.subr.bf16.mxu0 %v7067_v2 }
 0x73d   : > { %5265 = vmatpush1.bf16.msra.mxu0 %v7065_v44  ;;  %v5364_v44 = vld [vmem:[%s9663_s11] sm:$0x1] }
 0x73e   : > { %5266 = vmatprep.subr.bf16.mxu0 %v7070_v21 }
 0x741   : > { %5267 = vmatpush1.bf16.msra.mxu0 %v7068_v20 }
 0x742   : > { %5268 = vmatprep.subr.bf16.mxu0 %v7073_v3 }
 0x745   : > { %5269 = vmatpush1.bf16.msra.mxu0 %v7071_v22 }
 0x746   : > { %5270 = vmatprep.subr.bf16.mxu0 %v7076_v30 }
 0x749   : > { %5271 = vmatpush1.bf16.msra.mxu0 %v7074_v52 }
 0x74a   : > { %5272 = vmatprep.subr.bf16.mxu0 %v7079_v32 }
 0x74d   : > { %5273 = vmatpush1.bf16.msra.mxu0 %v7077_v28 }
 0x74e   : > { %5274 = vmatprep.subr.bf16.mxu0 %v7082_v35 }
 0x751   : > { %5275 = vmatpush1.bf16.msra.mxu0 %v7080_v36 }
 0x752   : > { %5276 = vmatprep.subr.bf16.mxu0 %v7085_v8 }
 0x755   : > { %5277 = vmatpush1.bf16.msra.mxu0 %v7083_v6 }
 0x756   : > { %5287 = vmatprep.subr.bf16.mxu0 %v7088_v34 }
 0x758   : > { %5279 = vmatmul.mubr.bf16.vlgmr.msra.gmra.mrb[112].mxu0 %v3820_v0 }
 0x759   : > { %5288 = vmatpush1.bf16.msra.mxu0 %v7086_v43  ;;  %5319 = vmatprep.mubr.bf16.mxu0 %v7178_v1  ;;  %v7095_v1 = vld [vmem:[%s9660_s8 + $0x630] ss:$8 sps:$4 sm:$0xff]  }
 0x75a   : > { %5289 = vmatprep.subr.bf16.mxu0 %v7091_v47 }
 0x75d   : > { %5290 = vmatpush1.bf16.msra.mxu0 %v7089_v26 }
 0x75e   : > { %5291 = vmatprep.subr.bf16.mxu0 %v7094_v19 }
 0x761   : > { %5292 = vmatpush1.bf16.msra.mxu0 %v7092_v10 }
 0x762   : > { %5293 = vmatprep.subr.bf16.mxu0 %v7097_v14 }
 0x765   : > { %5294 = vmatpush1.bf16.msra.mxu0 %v7095_v1 }
 0x768   : > { %5977 = vmatmul.mubr.msk.bf16.vlgmr.msra.gmra.mrb[112].mxu0 %vm2049_vm14, %v3810_v45 }
 0x7b7   : > { %v5116_v17 = vpop.f32.mrb[144].mxu1 }
 0x7b8   : > { %v5118_v63 = vpop.f32.mrb[145].mxu1  ;;  %v6560_v31 = vadd.f32 %v5116_v17, %v5031_v37 }
 0x7b9   : > { %v5120_v40 = vpop.f32.mrb[146].mxu1  ;;  %v6562_v4 = vadd.f32 %v5118_v63, %v5035_v33 }
 0x7ba   : > { %v5121_v42 = vpop.f32.mrb[147].mxu1 }
 0x83b   : > { %v5321_v60 = vpop.f32.mrb[112].mxu0 }
 0x83c   : > { %v6561_v55 = vadd.f32 %v6560_v31, %v5321_v60  ;;  %v5323_v41 = vpop.f32.mrb[113].mxu0 }
 0x83d   : > { %v6563_v56 = vadd.f32 %v6562_v4, %v5323_v41  ;;  %v5325_v38 = vpop.f32.mrb[114].mxu0 }
 0x83e   : > { %v5328_v25 = vmax.f32 %v6561_v55, 0.0  ;;  %v5326_v51 = vpop.f32.mrb[115].mxu0 }
 0x83f   : > { %v5329_v11 = vmax.f32 %v6563_v56, 0.0 }
 0x840   : > { %v5330_v29 = vpack.c.bf16 %v5328_v25, %v5328_v25 }
 0x841   : > { %v5331_v13 = vpack.c.bf16 %v5329_v11, %v5329_v11 }
 0x843   : > { %5493 = vmatprep.mubr.bf16.mxu1 %v5331_v13 }
 0x844   : > { %5494 = vmatmul.mubr.bf16.vlgmr.msra.gmra.mrb[148].mxu1 %v5330_v29 }
 0x917   : > { %v6500_v2 = vpop.f32.mrb[148].mxu1 }
 0x918   : > { %v6501_v21 = vpop.f32.mrb[149].mxu1 }
 0x919   : > { %v6502_v5 = vadd.f32 %v6501_v21, %v6500_v2  ;;  %v6503_v59 = vpop.f32.mrb[150].mxu1 }
 0x91a   : > { %v6504_v48 = vpop.f32.mrb[151].mxu1 }
 0x91b   : > { %v5496_v20 = vadd.f32 %v6502_v5, %v5364_v44 }
 0x91d   : > { %v5501_v16 = vmax.f32 %v5496_v20, 0.0 }
 0x91f   : > { %5503 = vst.msk [vmem:[%s650_s29] sm:$0x1] %vm5502_vm2, %v5501_v16 }
 0x920   : > { %7127 = shalt.err (!%p7124_p5)
}
 0x921   : > { %s7128_s16 = scalar_lea.hbm %s9608_s18, 16  ;;  %s7132_s25 = scalar_lea.hbm %s9664_s12, 32 }
 0x922   : > { %p7129_p7 = scmp.ne.s32.totalorder %s9608_s18, %s7128_s16  ;;  %p7133_p12 = scmp.lt.u32.totalorder %s9608_s18, %s9664_s12 }
 0x923   : > { %p7134_p13 = scmp.lt.u32.totalorder %s7132_s25, %s7128_s16  ;;  %p7136_p1 = scmp.lt.u32.totalorder %s7128_s16, %s9608_s18 }
 0x924   : > { %p7130_p10 = pnand %p7129_p7, %p7288_p6 }
 0x925   : > { %p7135_p0 = por %p7134_p13, %p7133_p12 }
 0x926   : > { %p7131_p11 = pneg %p7130_p10 }
 0x927   : > { %p7137_p2 = por %p7136_p1, %p7135_p0 }
 0x929   : > { %p7138_p3 = pnand %p7137_p2, %p7131_p11 }
 0x92b   : > { %7141 = shalt.err (!%p7138_p3)
}
 0x92c   : > { %6587 = dma.vmem_to_hbm [thread:$0]  (%p7288_p6), %s9610_s17, 16, %s9608_s18, %s5505_s20  }
 0x92d PF: > { %s5529_s26 = sand.u32 1, %s7164_s21   ;;  %p6590_p4 = pnand %p5580_p9, %p7292_p8 }
 0x92e   : > { %s5530_s2 = scalar_lea.sflag [#allocation4], %s5529_s26 }
 0x92f   : > { %7159 = dma.done.wait (!%p6590_p4), %s5530_s2, 16  }
 0x930   : > { %7161 = vsyncadd (!%p6590_p4), %s5530_s2, 4294967280  ;;  %p22_p5 = scmp.ge.s32.totalorder %s7273_s27, 4   ;;  %s9682_s21 = smov %s7168_s22 }
 0x931   : > { %s9683_s22 = smov %s7172_s23  ;;  %s9684_s23 = smov %s7286_s30 }
 0x932   : > { %s9685_s24 = smov %s7273_s27  ;;  %24 = sbr.rel (!%p22_p5) target bundleno = 6 (0x6), region = 149 }
 0x939   :  { %5534 = vsyncpa [#allocation4], 1 }
 0x93a   :  { %5536 = vsyncpa [#allocation4 + $0x1], 1 }

</bundles_post_ra>
